<compile_context>
chip_gen: v7x
topology: tpu7x:2x2x1
jax: 0.10.0
libtpu: 0.0.40
codegen_flags: <defaults>
</compile_context>

<pallas_src>
import functools

import jax
import jax.numpy as jnp
from jax.experimental import pallas as pl
from jax.experimental.pallas import tpu as pltpu

LANE = 128


def _round_up(x, m):
    return ((x + m - 1) // m) * m


def _vmem_limit_bytes():
    """Generation-aware scoped-VMEM limit (v5e/v6e: 128 MiB phys, v7x: 64 MiB)."""
    try:
        cap = int(pltpu.get_tpu_info().vmem_capacity_bytes)
    except Exception:
        cap = 64 * 1024 * 1024
    # Leave ~25% headroom for compiler-managed buffers; cap well below 128 MiB.
    return min((cap * 3) // 4, 100 * 1024 * 1024)


def _sage_layer_kernel(a_ref, hk_ref, hm_ref, invdeg_ref, w_ref, b_ref,
                       o_ref, acc_ref, *, fi_p, apply_relu):
    """One SAGEConv('mean') layer, row-tiled (i) with K-reduction (k) over nodes.

       acc  = sum_k A01[i,k] @ h[k]                       (MXU, f32 accumulate)
       out  = h[i] @ W_self + (acc * inv_deg) @ W_neigh + b   (+ ReLU)
    """
    k = pl.program_id(1)

    @pl.when(k == 0)
    def _():
        acc_ref[...] = jnp.zeros_like(acc_ref)

    # Neighbor-sum accumulation (0/1 adjacency is exact in bf16).
    acc_ref[...] += jnp.dot(a_ref[...], hk_ref[...],
                            preferred_element_type=jnp.float32)

    @pl.when(k == pl.num_programs(1) - 1)
    def _():
        # Exact mean: f32 per-row inverse degree applied on the VPU.
        h_neigh = (acc_ref[...] * invdeg_ref[...]).astype(jnp.bfloat16)
        # Two dots on static slices of the packed weight (no concat buffer).
        out = jnp.dot(hm_ref[...], w_ref[:fi_p, :],
                      preferred_element_type=jnp.float32)
        out += jnp.dot(h_neigh, w_ref[fi_p:, :],
                       preferred_element_type=jnp.float32)
        out += b_ref[...]
        if apply_relu:
            out = jnp.maximum(out, 0.0)
        o_ref[...] = out.astype(o_ref.dtype)


def _sage_layer(h, a_bf, inv_deg, w_cat, bias, *, apply_relu, out_dtype, tm, tk):
    n, fi_p = h.shape
    fo_p = w_cat.shape[1]
    grid = (n // tm, n // tk)

    flops = 2 * n * n * fi_p + 2 * n * (2 * fi_p) * fo_p
    bytes_accessed = (a_bf.size * 2 + 2 * h.size * h.dtype.itemsize
                      + w_cat.size * 2 + bias.size * 4 + inv_deg.size * 4
                      + n * fo_p * jnp.dtype(out_dtype).itemsize)

    kernel = functools.partial(_sage_layer_kernel, fi_p=fi_p,
                               apply_relu=apply_relu)
    return pl.pallas_call(
        kernel,
        out_shape=jax.ShapeDtypeStruct((n, fo_p), out_dtype),
        grid=grid,
        in_specs=[
            pl.BlockSpec((tm, tk), lambda i, k: (i, k)),          # A row/K tile
            pl.BlockSpec((tk, fi_p), lambda i, k: (k, 0)),        # h K-tile (aggregation)
            pl.BlockSpec((tm, fi_p), lambda i, k: (i, 0)),        # h row-tile (self term)
            pl.BlockSpec((tm, 1), lambda i, k: (i, 0)),           # 1/deg rows (f32)
            pl.BlockSpec((2 * fi_p, fo_p), lambda i, k: (0, 0)),  # packed [W_self;W_neigh]
            pl.BlockSpec((1, fo_p), lambda i, k: (0, 0)),         # bias
        ],
        out_specs=pl.BlockSpec((tm, fo_p), lambda i, k: (i, 0)),
        scratch_shapes=[pltpu.VMEM((tm, fi_p), jnp.float32)],     # A@h accumulator
        compiler_params=pltpu.CompilerParams(
            dimension_semantics=("parallel", "arbitrary"),
            vmem_limit_bytes=_vmem_limit_bytes()),
        cost_estimate=pl.CostEstimate(flops=flops, transcendentals=0,
                                      bytes_accessed=bytes_accessed),
    )(a_bf, h, h, inv_deg, w_cat, bias)


@functools.partial(jax.jit, static_argnames=("n_classes", "tm", "tk"))
def sage_forward_pallas(a_bf, inv_deg, x_p, packed, n_classes, tm, tk):
    """3-layer SAGE forward (eval). Inputs are pre-prepared (bf16 / padded)."""
    h = x_p
    n_layers = len(packed)
    for l, (w_cat, bias) in enumerate(packed):
        last = (l == n_layers - 1)
        h = _sage_layer(h, a_bf, inv_deg, w_cat, bias,
                        apply_relu=not last,
                        out_dtype=jnp.float32 if last else jnp.bfloat16,
                        tm=tm, tk=tk)
    return h[:, :n_classes]


# ---------------------- one-time preparation (hoisted out of forward) -----------

def prepare_graph(adj01):
    """Exact 0/1 bf16 adjacency + f32 inverse in-degree column (done once per graph)."""
    deg = jnp.sum(adj01, axis=1, keepdims=True)
    inv_deg = jnp.where(deg > 0, 1.0 / jnp.maximum(deg, 1.0), 0.0).astype(jnp.float32)
    return adj01.astype(jnp.bfloat16), inv_deg


def prepare_features(x, in_feats_padded):
    """Pad node features to 128 lanes, cast to bf16 (done once per feature matrix)."""
    n, f = x.shape
    return jnp.zeros((n, in_feats_padded), jnp.bfloat16).at[:, :f].set(
        x.astype(jnp.bfloat16))


def pack_params(params, in_feats):
    """Pad feature dims to 128 lanes, stack [W_self ; W_neigh], cast weights to bf16."""
    packed = []
    fi_p = _round_up(in_feats, LANE)
    for (w_self, w_neigh, bias) in params:
        fi, fo = w_self.shape
        fo_p = _round_up(fo, LANE)
        w_cat = jnp.zeros((2 * fi_p, fo_p), jnp.float32)
        w_cat = w_cat.at[:fi, :fo].set(w_self)
        w_cat = w_cat.at[fi_p:fi_p + fi, :fo].set(w_neigh)   # keep [fi_p:fi_p+fi] alignment
        b_p = jnp.zeros((1, fo_p), jnp.float32).at[0, :fo].set(bias)
        packed.append((w_cat.astype(jnp.bfloat16), b_p))
        fi_p = fo_p
    return packed


# ---------------------- reference / data construction ---------------------------

def sage_forward_ref(a_mean, x, params):
    """Pure-JAX f32 reference of the same forward (for a sanity check)."""
    h = x
    hi = jax.lax.Precision.HIGHEST
    for l, (w_self, w_neigh, bias) in enumerate(params):
        h_neigh = jnp.dot(a_mean, h, precision=hi)
        h = (jnp.dot(h, w_self, precision=hi)
             + jnp.dot(h_neigh, w_neigh, precision=hi) + bias)
        if l != len(params) - 1:
            h = jnp.maximum(h, 0.0)
    return h


def build_adjacency01(key, n_nodes, edge_prob=0.05):
    """Random directed graph -> dense 0/1 adjacency, f32 [N, N] (no self loops)."""
    adj = (jax.random.uniform(key, (n_nodes, n_nodes)) < edge_prob).astype(jnp.float32)
    return adj * (1.0 - jnp.eye(n_nodes, dtype=jnp.float32))


def init_params(key, in_feats, n_hidden, n_classes):
    """Xavier-ish init for 3 SAGEConv layers; W stored as [F_in, F_out], bias [F_out]."""
    dims = [(in_feats, n_hidden), (n_hidden, n_hidden), (n_hidden, n_classes)]
    params = []
    for (fi, fo) in dims:
        key, k1, k2 = jax.random.split(key, 3)
        scale = (2.0 / (fi + fo)) ** 0.5
        w_self = scale * jax.random.normal(k1, (fi, fo), dtype=jnp.float32)
        w_neigh = scale * jax.random.normal(k2, (fi, fo), dtype=jnp.float32)
        bias = jnp.zeros((fo,), dtype=jnp.float32)
        params.append((w_self, w_neigh, bias))
    return params


if __name__ == "__main__":
    key = jax.random.PRNGKey(0)
    k_graph, k_feat, k_param = jax.random.split(key, 3)

    n_nodes, in_feats, n_hidden, n_classes = 512, 32, 32, 16

    adj01 = build_adjacency01(k_graph, n_nodes, edge_prob=0.05)
    x = jax.random.normal(k_feat, (n_nodes, in_feats), dtype=jnp.float32)
    params = init_params(k_param, in_feats, n_hidden, n_classes)

    # One-time prep (hoisted out of the per-call forward path).
    a_bf, inv_deg = prepare_graph(adj01)
    packed = pack_params(params, in_feats)
    fi_p0 = packed[0][0].shape[0] // 2
    x_p = prepare_features(x, fi_p0)

    # Tile sizes: 256-row / 256-K tiles (MXU-friendly on v6e/v7x); full-extent fallback.
    tm = 256 if n_nodes % 256 == 0 else n_nodes
    tk = 256 if n_nodes % 256 == 0 else n_nodes

    out = sage_forward_pallas(a_bf, inv_deg, x_p, packed, n_classes, tm, tk)
    out = jax.block_until_ready(out)
    assert out.shape == (n_nodes, n_classes)
    assert out.dtype == jnp.float32

    a_mean = adj01 * inv_deg           # exact f32 mean-normalized adjacency for reference
    ref = sage_forward_ref(a_mean, x, params)
    max_err = float(jnp.max(jnp.abs(out - ref)))
    assert max_err < 0.15, f"max abs error vs f32 reference: {max_err}"
    print("KERNEL_OK")
</pallas_src>

<mosaic_0001>
module attributes {stable_mosaic.version = 11 : i64} {
  func.func @_sage_layer_kernel(%arg0: i32, %arg1: i32, %arg2: memref<256x256xbf16, #tpu.memory_space<vmem>>, %arg3: memref<256x128xbf16, #tpu.memory_space<vmem>>, %arg4: memref<256x128xbf16, #tpu.memory_space<vmem>>, %arg5: memref<256x1xf32, #tpu.memory_space<vmem>>, %arg6: memref<256x128xbf16, #tpu.memory_space<vmem>>, %arg7: memref<1x128xf32, #tpu.memory_space<vmem>>, %arg8: memref<256x128xbf16, #tpu.memory_space<vmem>>, %arg9: memref<256x128xf32, #tpu.memory_space<vmem>>) attributes {dimension_semantics = [#tpu.dimension_semantics<parallel>, #tpu.dimension_semantics<arbitrary>], iteration_bounds = array<i64: 2, 2>, scalar_prefetch = 0 : i64, scratch_operands = 1 : i64, tpu.core_type = #tpu.core_type<tc>, window_params = [{transform_indices = @transform_0, window_bounds = array<i64: 256, 256>}, {transform_indices = @transform_1, window_bounds = array<i64: 256, 128>}, {transform_indices = @transform_2, window_bounds = array<i64: 256, 128>}, {transform_indices = @transform_3, window_bounds = array<i64: 256, 1>}, {pipeline_mode = #tpu.pipeline_mode<synchronous>, transform_indices = @transform_4, window_bounds = array<i64: 256, 128>}, {pipeline_mode = #tpu.pipeline_mode<synchronous>, transform_indices = @transform_5, window_bounds = array<i64: 1, 128>}, {transform_indices = @transform_6, window_bounds = array<i64: 256, 128>}]} {
    %c0_i32 = arith.constant 0 : i32
    %0 = arith.cmpi eq, %arg1, %c0_i32 : i32
    %1 = arith.extui %0 : i1 to i32
    %c0_i32_0 = arith.constant 0 : i32
    %2 = arith.cmpi ne, %1, %c0_i32_0 : i32
    scf.if %2 {
      %cst_9 = arith.constant 0.000000e+00 : f32
      %12 = vector.broadcast %cst_9 : f32 to vector<256x128xf32>
      %c0_10 = arith.constant 0 : index
      %c0_11 = arith.constant 0 : index
      %13 = vector.load %arg9[%c0_10, %c0_11] : memref<256x128xf32, #tpu.memory_space<vmem>>, vector<256x128xf32>
      tpu.vector_store %arg9[%c0_10, %c0_11], %12 {strides = array<i32>} : memref<256x128xf32, #tpu.memory_space<vmem>>, vector<256x128xf32>,
    } else {
    }
    %c0 = arith.constant 0 : index
    %c0_1 = arith.constant 0 : index
    %3 = vector.load %arg9[%c0, %c0_1] : memref<256x128xf32, #tpu.memory_space<vmem>>, vector<256x128xf32>
    %c0_2 = arith.constant 0 : index
    %c0_3 = arith.constant 0 : index
    %4 = vector.load %arg2[%c0_2, %c0_3] : memref<256x256xbf16, #tpu.memory_space<vmem>>, vector<256x256xbf16>
    %c0_4 = arith.constant 0 : index
    %c0_5 = arith.constant 0 : index
    %5 = vector.load %arg3[%c0_4, %c0_5] : memref<256x128xbf16, #tpu.memory_space<vmem>>, vector<256x128xbf16>
    %cst = arith.constant dense<0.000000e+00> : vector<256x128xf32>
    %6 = tpu.matmul %4, %5, %cst {dimension_numbers = #tpu.dot_dimension_numbers<[1], [0], [0], [1], [0, 0, 1, 1], [], []>} : vector<256x256xbf16>, vector<256x128xbf16>, vector<256x128xf32> -> vector<256x128xf32>
    %7 = arith.addf %3, %6 : vector<256x128xf32>
    %c0_6 = arith.constant 0 : index
    %c0_7 = arith.constant 0 : index
    %8 = vector.load %arg9[%c0_6, %c0_7] : memref<256x128xf32, #tpu.memory_space<vmem>>, vector<256x128xf32>
    tpu.vector_store %arg9[%c0_6, %c0_7], %7 {strides = array<i32>} : memref<256x128xf32, #tpu.memory_space<vmem>>, vector<256x128xf32>,
    %c1_i32 = arith.constant 1 : i32
    %9 = arith.cmpi eq, %arg1, %c1_i32 : i32
    %10 = arith.extui %9 : i1 to i32
    %c0_i32_8 = arith.constant 0 : i32
    %11 = arith.cmpi ne, %10, %c0_i32_8 : i32
    scf.if %11 {
      %c0_9 = arith.constant 0 : index
      %c0_10 = arith.constant 0 : index
      %12 = vector.load %arg9[%c0_9, %c0_10] : memref<256x128xf32, #tpu.memory_space<vmem>>, vector<256x128xf32>
      %c0_11 = arith.constant 0 : index
      %c0_12 = arith.constant 0 : index
      %13 = vector.load %arg5[%c0_11, %c0_12] : memref<256x1xf32, #tpu.memory_space<vmem>>, vector<256x1xf32>
      %14 = vector.broadcast %13 : vector<256x1xf32> to vector<256x128xf32>
      %15 = arith.mulf %12, %14 : vector<256x128xf32>
      %16 = arith.truncf %15 : vector<256x128xf32> to vector<256x128xbf16>
      %c0_13 = arith.constant 0 : index
      %c0_14 = arith.constant 0 : index
      %17 = vector.load %arg4[%c0_13, %c0_14] : memref<256x128xbf16, #tpu.memory_space<vmem>>, vector<256x128xbf16>
      %c0_15 = arith.constant 0 : index
      %c0_16 = arith.constant 0 : index
      %18 = vector.load %arg6[%c0_15, %c0_16] : memref<256x128xbf16, #tpu.memory_space<vmem>>, vector<128x128xbf16>
      %cst_17 = arith.constant dense<0.000000e+00> : vector<256x128xf32>
      %19 = tpu.matmul %17, %18, %cst_17 {dimension_numbers = #tpu.dot_dimension_numbers<[1], [0], [0], [1], [0, 0, 1, 1], [], []>} : vector<256x128xbf16>, vector<128x128xbf16>, vector<256x128xf32> -> vector<256x128xf32>
      %c128 = arith.constant 128 : index
      %c0_18 = arith.constant 0 : index
      %20 = vector.load %arg6[%c128, %c0_18] : memref<256x128xbf16, #tpu.memory_space<vmem>>, vector<128x128xbf16>
      %cst_19 = arith.constant dense<0.000000e+00> : vector<256x128xf32>
      %21 = tpu.matmul %16, %20, %cst_19 {dimension_numbers = #tpu.dot_dimension_numbers<[1], [0], [0], [1], [0, 0, 1, 1], [], []>} : vector<256x128xbf16>, vector<128x128xbf16>, vector<256x128xf32> -> vector<256x128xf32>
      %22 = arith.addf %19, %21 : vector<256x128xf32>
      %c0_20 = arith.constant 0 : index
      %c0_21 = arith.constant 0 : index
      %23 = vector.load %arg7[%c0_20, %c0_21] : memref<1x128xf32, #tpu.memory_space<vmem>>, vector<1x128xf32>
      %24 = vector.broadcast %23 : vector<1x128xf32> to vector<256x128xf32>
      %25 = arith.addf %22, %24 : vector<256x128xf32>
      %cst_22 = arith.constant 0.000000e+00 : f32
      %26 = vector.broadcast %cst_22 : f32 to vector<256x128xf32>
      %27 = arith.maximumf %25, %26 : vector<256x128xf32>
      %28 = arith.truncf %27 : vector<256x128xf32> to vector<256x128xbf16>
      %c0_23 = arith.constant 0 : index
      %c0_24 = arith.constant 0 : index
      %29 = vector.load %arg8[%c0_23, %c0_24] : memref<256x128xbf16, #tpu.memory_space<vmem>>, vector<256x128xbf16>
      tpu.vector_store %arg8[%c0_23, %c0_24], %28 {strides = array<i32>} : memref<256x128xbf16, #tpu.memory_space<vmem>>, vector<256x128xbf16>,
    } else {
    }
    return
  }
  func.func @transform_0(%arg0: i32, %arg1: i32) -> (i32, i32) {
    %c0_i32 = arith.constant 0 : i32
    return %arg0, %arg1 : i32, i32
  }
  func.func @transform_1(%arg0: i32, %arg1: i32) -> (i32, i32) {
    %c0_i32 = arith.constant 0 : i32
    %c0_i32_0 = arith.constant 0 : i32
    return %arg1, %c0_i32 : i32, i32
  }
  func.func @transform_2(%arg0: i32, %arg1: i32) -> (i32, i32) {
    %c0_i32 = arith.constant 0 : i32
    %c0_i32_0 = arith.constant 0 : i32
    return %arg0, %c0_i32 : i32, i32
  }
  func.func @transform_3(%arg0: i32, %arg1: i32) -> (i32, i32) {
    %c0_i32 = arith.constant 0 : i32
    %c0_i32_0 = arith.constant 0 : i32
    return %arg0, %c0_i32 : i32, i32
  }
  func.func @transform_4(%arg0: i32, %arg1: i32) -> (i32, i32) {
    %c0_i32 = arith.constant 0 : i32
    %c0_i32_0 = arith.constant 0 : i32
    %c0_i32_1 = arith.constant 0 : i32
    return %c0_i32, %c0_i32_0 : i32, i32
  }
  func.func @transform_5(%arg0: i32, %arg1: i32) -> (i32, i32) {
    %c0_i32 = arith.constant 0 : i32
    %c0_i32_0 = arith.constant 0 : i32
    %c0_i32_1 = arith.constant 0 : i32
    return %c0_i32, %c0_i32_0 : i32, i32
  }
  func.func @transform_6(%arg0: i32, %arg1: i32) -> (i32, i32) {
    %c0_i32 = arith.constant 0 : i32
    %c0_i32_0 = arith.constant 0 : i32
    return %arg0, %c0_i32 : i32, i32
  }
}

module attributes {stable_mosaic.version = 11 : i64} {
  func.func @_sage_layer_kernel(%arg0: i32, %arg1: i32, %arg2: memref<256x256xbf16, #tpu.memory_space<vmem>>, %arg3: memref<256x128xbf16, #tpu.memory_space<vmem>>, %arg4: memref<256x128xbf16, #tpu.memory_space<vmem>>, %arg5: memref<256x1xf32, #tpu.memory_space<vmem>>, %arg6: memref<256x128xbf16, #tpu.memory_space<vmem>>, %arg7: memref<1x128xf32, #tpu.memory_space<vmem>>, %arg8: memref<256x128xbf16, #tpu.memory_space<vmem>>, %arg9: memref<256x128xf32, #tpu.memory_space<vmem>>) attributes {dimension_semantics = [#tpu.dimension_semantics<parallel>, #tpu.dimension_semantics<arbitrary>], iteration_bounds = array<i64: 2, 2>, scalar_prefetch = 0 : i64, scratch_operands = 1 : i64, tpu.core_type = #tpu.core_type<tc>, window_params = [{transform_indices = @transform_0, window_bounds = array<i64: 256, 256>}, {transform_indices = @transform_1, window_bounds = array<i64: 256, 128>}, {transform_indices = @transform_2, window_bounds = array<i64: 256, 128>}, {transform_indices = @transform_3, window_bounds = array<i64: 256, 1>}, {pipeline_mode = #tpu.pipeline_mode<synchronous>, transform_indices = @transform_4, window_bounds = array<i64: 256, 128>}, {pipeline_mode = #tpu.pipeline_mode<synchronous>, transform_indices = @transform_5, window_bounds = array<i64: 1, 128>}, {transform_indices = @transform_6, window_bounds = array<i64: 256, 128>}]} {
    %c0_i32 = arith.constant 0 : i32
    %0 = arith.cmpi eq, %arg1, %c0_i32 : i32
    %1 = arith.extui %0 : i1 to i32
    %c0_i32_0 = arith.constant 0 : i32
    %2 = arith.cmpi ne, %1, %c0_i32_0 : i32
    scf.if %2 {
      %cst_9 = arith.constant 0.000000e+00 : f32
      %12 = vector.broadcast %cst_9 : f32 to vector<256x128xf32>
      %c0_10 = arith.constant 0 : index
      %c0_11 = arith.constant 0 : index
      %13 = vector.load %arg9[%c0_10, %c0_11] : memref<256x128xf32, #tpu.memory_space<vmem>>, vector<256x128xf32>
      tpu.vector_store %arg9[%c0_10, %c0_11], %12 {strides = array<i32>} : memref<256x128xf32, #tpu.memory_space<vmem>>, vector<256x128xf32>,
    } else {
    }
    %c0 = arith.constant 0 : index
    %c0_1 = arith.constant 0 : index
    %3 = vector.load %arg9[%c0, %c0_1] : memref<256x128xf32, #tpu.memory_space<vmem>>, vector<256x128xf32>
    %c0_2 = arith.constant 0 : index
    %c0_3 = arith.constant 0 : index
    %4 = vector.load %arg2[%c0_2, %c0_3] : memref<256x256xbf16, #tpu.memory_space<vmem>>, vector<256x256xbf16>
    %c0_4 = arith.constant 0 : index
    %c0_5 = arith.constant 0 : index
    %5 = vector.load %arg3[%c0_4, %c0_5] : memref<256x128xbf16, #tpu.memory_space<vmem>>, vector<256x128xbf16>
    %cst = arith.constant dense<0.000000e+00> : vector<256x128xf32>
    %6 = tpu.matmul %4, %5, %cst {dimension_numbers = #tpu.dot_dimension_numbers<[1], [0], [0], [1], [0, 0, 1, 1], [], []>} : vector<256x256xbf16>, vector<256x128xbf16>, vector<256x128xf32> -> vector<256x128xf32>
    %7 = arith.addf %3, %6 : vector<256x128xf32>
    %c0_6 = arith.constant 0 : index
    %c0_7 = arith.constant 0 : index
    %8 = vector.load %arg9[%c0_6, %c0_7] : memref<256x128xf32, #tpu.memory_space<vmem>>, vector<256x128xf32>
    tpu.vector_store %arg9[%c0_6, %c0_7], %7 {strides = array<i32>} : memref<256x128xf32, #tpu.memory_space<vmem>>, vector<256x128xf32>,
    %c1_i32 = arith.constant 1 : i32
    %9 = arith.cmpi eq, %arg1, %c1_i32 : i32
    %10 = arith.extui %9 : i1 to i32
    %c0_i32_8 = arith.constant 0 : i32
    %11 = arith.cmpi ne, %10, %c0_i32_8 : i32
    scf.if %11 {
      %c0_9 = arith.constant 0 : index
      %c0_10 = arith.constant 0 : index
      %12 = vector.load %arg9[%c0_9, %c0_10] : memref<256x128xf32, #tpu.memory_space<vmem>>, vector<256x128xf32>
      %c0_11 = arith.constant 0 : index
      %c0_12 = arith.constant 0 : index
      %13 = vector.load %arg5[%c0_11, %c0_12] : memref<256x1xf32, #tpu.memory_space<vmem>>, vector<256x1xf32>
      %14 = vector.broadcast %13 : vector<256x1xf32> to vector<256x128xf32>
      %15 = arith.mulf %12, %14 : vector<256x128xf32>
      %16 = arith.truncf %15 : vector<256x128xf32> to vector<256x128xbf16>
      %c0_13 = arith.constant 0 : index
      %c0_14 = arith.constant 0 : index
      %17 = vector.load %arg4[%c0_13, %c0_14] : memref<256x128xbf16, #tpu.memory_space<vmem>>, vector<256x128xbf16>
      %c0_15 = arith.constant 0 : index
      %c0_16 = arith.constant 0 : index
      %18 = vector.load %arg6[%c0_15, %c0_16] : memref<256x128xbf16, #tpu.memory_space<vmem>>, vector<128x128xbf16>
      %cst_17 = arith.constant dense<0.000000e+00> : vector<256x128xf32>
      %19 = tpu.matmul %17, %18, %cst_17 {dimension_numbers = #tpu.dot_dimension_numbers<[1], [0], [0], [1], [0, 0, 1, 1], [], []>} : vector<256x128xbf16>, vector<128x128xbf16>, vector<256x128xf32> -> vector<256x128xf32>
      %c128 = arith.constant 128 : index
      %c0_18 = arith.constant 0 : index
      %20 = vector.load %arg6[%c128, %c0_18] : memref<256x128xbf16, #tpu.memory_space<vmem>>, vector<128x128xbf16>
      %cst_19 = arith.constant dense<0.000000e+00> : vector<256x128xf32>
      %21 = tpu.matmul %16, %20, %cst_19 {dimension_numbers = #tpu.dot_dimension_numbers<[1], [0], [0], [1], [0, 0, 1, 1], [], []>} : vector<256x128xbf16>, vector<128x128xbf16>, vector<256x128xf32> -> vector<256x128xf32>
      %22 = arith.addf %19, %21 : vector<256x128xf32>
      %c0_20 = arith.constant 0 : index
      %c0_21 = arith.constant 0 : index
      %23 = vector.load %arg7[%c0_20, %c0_21] : memref<1x128xf32, #tpu.memory_space<vmem>>, vector<1x128xf32>
      %24 = vector.broadcast %23 : vector<1x128xf32> to vector<256x128xf32>
      %25 = arith.addf %22, %24 : vector<256x128xf32>
      %cst_22 = arith.constant 0.000000e+00 : f32
      %26 = vector.broadcast %cst_22 : f32 to vector<256x128xf32>
      %27 = arith.maximumf %25, %26 : vector<256x128xf32>
      %28 = arith.truncf %27 : vector<256x128xf32> to vector<256x128xbf16>
      %c0_23 = arith.constant 0 : index
      %c0_24 = arith.constant 0 : index
      %29 = vector.load %arg8[%c0_23, %c0_24] : memref<256x128xbf16, #tpu.memory_space<vmem>>, vector<256x128xbf16>
      tpu.vector_store %arg8[%c0_23, %c0_24], %28 {strides = array<i32>} : memref<256x128xbf16, #tpu.memory_space<vmem>>, vector<256x128xbf16>,
    } else {
    }
    return
  }
  func.func @transform_0(%arg0: i32, %arg1: i32) -> (i32, i32) {
    %c0_i32 = arith.constant 0 : i32
    return %arg0, %arg1 : i32, i32
  }
  func.func @transform_1(%arg0: i32, %arg1: i32) -> (i32, i32) {
    %c0_i32 = arith.constant 0 : i32
    %c0_i32_0 = arith.constant 0 : i32
    return %arg1, %c0_i32 : i32, i32
  }
  func.func @transform_2(%arg0: i32, %arg1: i32) -> (i32, i32) {
    %c0_i32 = arith.constant 0 : i32
    %c0_i32_0 = arith.constant 0 : i32
    return %arg0, %c0_i32 : i32, i32
  }
  func.func @transform_3(%arg0: i32, %arg1: i32) -> (i32, i32) {
    %c0_i32 = arith.constant 0 : i32
    %c0_i32_0 = arith.constant 0 : i32
    return %arg0, %c0_i32 : i32, i32
  }
  func.func @transform_4(%arg0: i32, %arg1: i32) -> (i32, i32) {
    %c0_i32 = arith.constant 0 : i32
    %c0_i32_0 = arith.constant 0 : i32
    %c0_i32_1 = arith.constant 0 : i32
    return %c0_i32, %c0_i32_0 : i32, i32
  }
  func.func @transform_5(%arg0: i32, %arg1: i32) -> (i32, i32) {
    %c0_i32 = arith.constant 0 : i32
    %c0_i32_0 = arith.constant 0 : i32
    %c0_i32_1 = arith.constant 0 : i32
    return %c0_i32, %c0_i32_0 : i32, i32
  }
  func.func @transform_6(%arg0: i32, %arg1: i32) -> (i32, i32) {
    %c0_i32 = arith.constant 0 : i32
    %c0_i32_0 = arith.constant 0 : i32
    return %arg0, %c0_i32 : i32, i32
  }
}

module attributes {stable_mosaic.version = 11 : i64} {
  func.func @_sage_layer_kernel(%arg0: i32, %arg1: i32, %arg2: memref<256x256xbf16, #tpu.memory_space<vmem>>, %arg3: memref<256x128xbf16, #tpu.memory_space<vmem>>, %arg4: memref<256x128xbf16, #tpu.memory_space<vmem>>, %arg5: memref<256x1xf32, #tpu.memory_space<vmem>>, %arg6: memref<256x128xbf16, #tpu.memory_space<vmem>>, %arg7: memref<1x128xf32, #tpu.memory_space<vmem>>, %arg8: memref<256x128xf32, #tpu.memory_space<vmem>>, %arg9: memref<256x128xf32, #tpu.memory_space<vmem>>) attributes {dimension_semantics = [#tpu.dimension_semantics<parallel>, #tpu.dimension_semantics<arbitrary>], iteration_bounds = array<i64: 2, 2>, scalar_prefetch = 0 : i64, scratch_operands = 1 : i64, tpu.core_type = #tpu.core_type<tc>, window_params = [{transform_indices = @transform_0, window_bounds = array<i64: 256, 256>}, {transform_indices = @transform_1, window_bounds = array<i64: 256, 128>}, {transform_indices = @transform_2, window_bounds = array<i64: 256, 128>}, {transform_indices = @transform_3, window_bounds = array<i64: 256, 1>}, {pipeline_mode = #tpu.pipeline_mode<synchronous>, transform_indices = @transform_4, window_bounds = array<i64: 256, 128>}, {pipeline_mode = #tpu.pipeline_mode<synchronous>, transform_indices = @transform_5, window_bounds = array<i64: 1, 128>}, {transform_indices = @transform_6, window_bounds = array<i64: 256, 128>}]} {
    %c0_i32 = arith.constant 0 : i32
    %0 = arith.cmpi eq, %arg1, %c0_i32 : i32
    %1 = arith.extui %0 : i1 to i32
    %c0_i32_0 = arith.constant 0 : i32
    %2 = arith.cmpi ne, %1, %c0_i32_0 : i32
    scf.if %2 {
      %cst_9 = arith.constant 0.000000e+00 : f32
      %12 = vector.broadcast %cst_9 : f32 to vector<256x128xf32>
      %c0_10 = arith.constant 0 : index
      %c0_11 = arith.constant 0 : index
      %13 = vector.load %arg9[%c0_10, %c0_11] : memref<256x128xf32, #tpu.memory_space<vmem>>, vector<256x128xf32>
      tpu.vector_store %arg9[%c0_10, %c0_11], %12 {strides = array<i32>} : memref<256x128xf32, #tpu.memory_space<vmem>>, vector<256x128xf32>,
    } else {
    }
    %c0 = arith.constant 0 : index
    %c0_1 = arith.constant 0 : index
    %3 = vector.load %arg9[%c0, %c0_1] : memref<256x128xf32, #tpu.memory_space<vmem>>, vector<256x128xf32>
    %c0_2 = arith.constant 0 : index
    %c0_3 = arith.constant 0 : index
    %4 = vector.load %arg2[%c0_2, %c0_3] : memref<256x256xbf16, #tpu.memory_space<vmem>>, vector<256x256xbf16>
    %c0_4 = arith.constant 0 : index
    %c0_5 = arith.constant 0 : index
    %5 = vector.load %arg3[%c0_4, %c0_5] : memref<256x128xbf16, #tpu.memory_space<vmem>>, vector<256x128xbf16>
    %cst = arith.constant dense<0.000000e+00> : vector<256x128xf32>
    %6 = tpu.matmul %4, %5, %cst {dimension_numbers = #tpu.dot_dimension_numbers<[1], [0], [0], [1], [0, 0, 1, 1], [], []>} : vector<256x256xbf16>, vector<256x128xbf16>, vector<256x128xf32> -> vector<256x128xf32>
    %7 = arith.addf %3, %6 : vector<256x128xf32>
    %c0_6 = arith.constant 0 : index
    %c0_7 = arith.constant 0 : index
    %8 = vector.load %arg9[%c0_6, %c0_7] : memref<256x128xf32, #tpu.memory_space<vmem>>, vector<256x128xf32>
    tpu.vector_store %arg9[%c0_6, %c0_7], %7 {strides = array<i32>} : memref<256x128xf32, #tpu.memory_space<vmem>>, vector<256x128xf32>,
    %c1_i32 = arith.constant 1 : i32
    %9 = arith.cmpi eq, %arg1, %c1_i32 : i32
    %10 = arith.extui %9 : i1 to i32
    %c0_i32_8 = arith.constant 0 : i32
    %11 = arith.cmpi ne, %10, %c0_i32_8 : i32
    scf.if %11 {
      %c0_9 = arith.constant 0 : index
      %c0_10 = arith.constant 0 : index
      %12 = vector.load %arg9[%c0_9, %c0_10] : memref<256x128xf32, #tpu.memory_space<vmem>>, vector<256x128xf32>
      %c0_11 = arith.constant 0 : index
      %c0_12 = arith.constant 0 : index
      %13 = vector.load %arg5[%c0_11, %c0_12] : memref<256x1xf32, #tpu.memory_space<vmem>>, vector<256x1xf32>
      %14 = vector.broadcast %13 : vector<256x1xf32> to vector<256x128xf32>
      %15 = arith.mulf %12, %14 : vector<256x128xf32>
      %16 = arith.truncf %15 : vector<256x128xf32> to vector<256x128xbf16>
      %c0_13 = arith.constant 0 : index
      %c0_14 = arith.constant 0 : index
      %17 = vector.load %arg4[%c0_13, %c0_14] : memref<256x128xbf16, #tpu.memory_space<vmem>>, vector<256x128xbf16>
      %c0_15 = arith.constant 0 : index
      %c0_16 = arith.constant 0 : index
      %18 = vector.load %arg6[%c0_15, %c0_16] : memref<256x128xbf16, #tpu.memory_space<vmem>>, vector<128x128xbf16>
      %cst_17 = arith.constant dense<0.000000e+00> : vector<256x128xf32>
      %19 = tpu.matmul %17, %18, %cst_17 {dimension_numbers = #tpu.dot_dimension_numbers<[1], [0], [0], [1], [0, 0, 1, 1], [], []>} : vector<256x128xbf16>, vector<128x128xbf16>, vector<256x128xf32> -> vector<256x128xf32>
      %c128 = arith.constant 128 : index
      %c0_18 = arith.constant 0 : index
      %20 = vector.load %arg6[%c128, %c0_18] : memref<256x128xbf16, #tpu.memory_space<vmem>>, vector<128x128xbf16>
      %cst_19 = arith.constant dense<0.000000e+00> : vector<256x128xf32>
      %21 = tpu.matmul %16, %20, %cst_19 {dimension_numbers = #tpu.dot_dimension_numbers<[1], [0], [0], [1], [0, 0, 1, 1], [], []>} : vector<256x128xbf16>, vector<128x128xbf16>, vector<256x128xf32> -> vector<256x128xf32>
      %22 = arith.addf %19, %21 : vector<256x128xf32>
      %c0_20 = arith.constant 0 : index
      %c0_21 = arith.constant 0 : index
      %23 = vector.load %arg7[%c0_20, %c0_21] : memref<1x128xf32, #tpu.memory_space<vmem>>, vector<1x128xf32>
      %24 = vector.broadcast %23 : vector<1x128xf32> to vector<256x128xf32>
      %25 = arith.addf %22, %24 : vector<256x128xf32>
      %c0_22 = arith.constant 0 : index
      %c0_23 = arith.constant 0 : index
      %26 = vector.load %arg8[%c0_22, %c0_23] : memref<256x128xf32, #tpu.memory_space<vmem>>, vector<256x128xf32>
      tpu.vector_store %arg8[%c0_22, %c0_23], %25 {strides = array<i32>} : memref<256x128xf32, #tpu.memory_space<vmem>>, vector<256x128xf32>,
    } else {
    }
    return
  }
  func.func @transform_0(%arg0: i32, %arg1: i32) -> (i32, i32) {
    %c0_i32 = arith.constant 0 : i32
    return %arg0, %arg1 : i32, i32
  }
  func.func @transform_1(%arg0: i32, %arg1: i32) -> (i32, i32) {
    %c0_i32 = arith.constant 0 : i32
    %c0_i32_0 = arith.constant 0 : i32
    return %arg1, %c0_i32 : i32, i32
  }
  func.func @transform_2(%arg0: i32, %arg1: i32) -> (i32, i32) {
    %c0_i32 = arith.constant 0 : i32
    %c0_i32_0 = arith.constant 0 : i32
    return %arg0, %c0_i32 : i32, i32
  }
  func.func @transform_3(%arg0: i32, %arg1: i32) -> (i32, i32) {
    %c0_i32 = arith.constant 0 : i32
    %c0_i32_0 = arith.constant 0 : i32
    return %arg0, %c0_i32 : i32, i32
  }
  func.func @transform_4(%arg0: i32, %arg1: i32) -> (i32, i32) {
    %c0_i32 = arith.constant 0 : i32
    %c0_i32_0 = arith.constant 0 : i32
    %c0_i32_1 = arith.constant 0 : i32
    return %c0_i32, %c0_i32_0 : i32, i32
  }
  func.func @transform_5(%arg0: i32, %arg1: i32) -> (i32, i32) {
    %c0_i32 = arith.constant 0 : i32
    %c0_i32_0 = arith.constant 0 : i32
    %c0_i32_1 = arith.constant 0 : i32
    return %c0_i32, %c0_i32_0 : i32, i32
  }
  func.func @transform_6(%arg0: i32, %arg1: i32) -> (i32, i32) {
    %c0_i32 = arith.constant 0 : i32
    %c0_i32_0 = arith.constant 0 : i32
    return %arg0, %c0_i32 : i32, i32
  }
}

</mosaic_0001>

<bundles_post_ra>
// kernel: sage_forward_pallas.5
= control target key start
LH: loop header
LB: loop body
LE: loop exit
PB: predicated region body
PF: predicated region fallthrough
CT: control target
= control target key end

     0   :  { %s3261_s0 = inlined_call_operand.vmem [shape: bf16[512,512], index: 0, kind: input, shape index: {}]   ;;  %s3262_s1 = inlined_call_operand.vmem [shape: bf16[512,128], index: 1, kind: input, shape index: {}, may-alias: {1,2}]   ;;  %s3263_s2 = inlined_call_operand.vmem [shape: bf16[512,128], index: 2, kind: input, shape index: {}, may-alias: {1,2}]   ;;  %s3264_s3 = inlined_call_operand.vmem [shape: f32[512,1], index: 3, kind: input, shape index: {}]   ;;  %s3265_s4 = inlined_call_operand.vmem [shape: bf16[256,128], index: 4, kind: input, shape index: {}]   ;;  %s3266_s5 = inlined_call_operand.vmem [shape: f32[1,128], index: 5, kind: input, shape index: {}]   ;;  %s3267_s6 = inlined_call_operand.vmem [shape: f32[512,128], index: 6, kind: output, shape index: {}]  }
   0x1   :  { %3268 = sst [smem:[#allocation4_spill]] %s3261_s0 }
   0x2   :  { %s2807_s21 = smov 0   ;;  %s2809_s22 = smov 0  }
   0x3   :  { %s2811_s23 = smov 0   ;;  %s2813_s24 = smov 0  }
   0x4   :  { %s2815_s25 = smov 0   ;;  %s2817_s26 = smov 0  }
   0x5   :  { %s2819_s27 = smov 0  }
   0x6 LB: > { %s25_s28 = sadd.s32 1, %s2760_s25  ;;  %s28_s29 = sadd.s32 1, %s2764_s26  ;;  %s2768_s27 = sphi %s2819_s27, %s16_s27   ;;  %s2764_s26 = sphi %s2817_s26, %s3275_s26   ;;  %s2760_s25 = sphi %s2815_s25, %s3274_s25   ;;  %s2756_s24 = sphi %s2813_s24, %s3273_s24   ;;  %s2752_s23 = sphi %s2811_s23, %s3272_s23   ;;  %s2748_s22 = sphi %s2809_s22, %s3271_s22   ;;  %s2744_s21 = sphi %s2807_s21, %s3270_s21  }
   0x7   : > { %p26_p0 = scmp.ge.s32.totalorder %s25_s28, 2  ;;  %p44_p1 = scmp.ne.s32.totalorder %s2748_s22, %s2744_s21 }
   0x8   : > { %p45_p2 = scmp.eq.s32.totalorder %s2768_s27, 0  ;;  %s37_s9 = sadd.s32 1, %s2748_s22 }
   0x9   : > { %s3277_s28 = smov (%p26_p0, %s25_s28), 0  ;;  %s3279_s29 = smov (!%p26_p0, %s28_s29), %s2764_s26 }
   0xa   : > { %p46_p3 = por %p45_p2, %p44_p1  ;;  %p30_p4 = scmp.ge.s32.totalorder %s3279_s29, 2 }
   0xb   : > { %s33_s30 = ssub.s32 %s2760_s25, %s3277_s28  ;;  %p2152_p6 = scmp.ge.s32.totalorder %s2768_s27, 4 }
   0xc   : > { %s3281_s29 = smov (%p30_p4, %s3279_s29), 0 }
   0xd   : > { %s32_s7 = ssub.s32 %s2764_s26, %s3281_s29  ;;  %222 = sbr.rel (%p2152_p6) target bundleno = 46 (0x2e), region = 24 }
   0xe   : > { %s34_s8 = sor.u32 %s33_s30, %s32_s7 }
   0xf   : > { %p35_p5 = scmp.eq.s32.totalorder %s34_s8, 0 }
  0x11   : > { %s2858_s10 = scalar_select %p35_p5, %s2748_s22, %s37_s9  }
  0x14   : > { %225 = sbr.rel (!%p46_p3) target bundleno = 46 (0x2e), region = 28  ;;  %s227_s11 = sand.u32 (%p46_p3), 1, %s2748_s22  }
  0x15   : > { %s2155_s12 = sshll.u32 (%p46_p3), %s2760_s25, 1  ;;  %s2153_s13 = sshll.u32 (%p46_p3), %s227_s11, 8 }
  0x16   : > { %s2253_s14 = sshll.u32 (%p46_p3), %s2764_s26, 7  ;;  %s3269_s0 = sld [smem:[#allocation4_spill]] (%p46_p3) }
  0x17   : > { %s233_s15 = sadd.s32 (%p46_p3), %s2253_s14, %s2155_s12  ;;  %s2872_s20 = scalar_lea.vmem (%p46_p3), [#allocation3], %s2153_s13 }
  0x18   : > { %s2157_s16 = sshll.u32 (%p46_p3), %s233_s15, 2 }
  0x1c   : > { %s2867_s19 = scalar_lea.vmem %s3269_s0, %s2157_s16 }
  0x1d   : > { %v325_v0 = vld [vmem:[%s2867_s19] sm:$0xff]  ;;  %v327_v1 = vld [vmem:[%s2867_s19 + $0x10] sm:$0xff] }
  0x1e   : > { %v329_v2 = vld [vmem:[%s2867_s19 + $0x20] sm:$0xff]  ;;  %326 = vst [vmem:[%s2872_s20] sm:$0xff] %v325_v0  ;;  %328 = vst [vmem:[%s2872_s20 + $0x8] sm:$0xff] %v327_v1  ;;  %v331_v3 = vld [vmem:[%s2867_s19 + $0x30] sm:$0xff] }
  0x1f   : > { %330 = vst [vmem:[%s2872_s20 + $0x10] sm:$0xff] %v329_v2  ;;  %v333_v4 = vld [vmem:[%s2867_s19 + $0x40] sm:$0xff]  ;;  %v335_v5 = vld [vmem:[%s2867_s19 + $0x50] sm:$0xff]  ;;  %332 = vst [vmem:[%s2872_s20 + $0x18] sm:$0xff] %v331_v3 }
  0x20   : > { %334 = vst [vmem:[%s2872_s20 + $0x20] sm:$0xff] %v333_v4  ;;  %336 = vst [vmem:[%s2872_s20 + $0x28] sm:$0xff] %v335_v5  ;;  %v337_v6 = vld [vmem:[%s2867_s19 + $0x60] sm:$0xff]  ;;  %v339_v7 = vld [vmem:[%s2867_s19 + $0x70] sm:$0xff] }
  0x21   : > { %v341_v8 = vld [vmem:[%s2867_s19 + $0x80] sm:$0xff]  ;;  %338 = vst [vmem:[%s2872_s20 + $0x30] sm:$0xff] %v337_v6  ;;  %340 = vst [vmem:[%s2872_s20 + $0x38] sm:$0xff] %v339_v7  ;;  %v343_v9 = vld [vmem:[%s2867_s19 + $0x90] sm:$0xff] }
  0x22   : > { %342 = vst [vmem:[%s2872_s20 + $0x40] sm:$0xff] %v341_v8  ;;  %v345_v10 = vld [vmem:[%s2867_s19 + $0xa0] sm:$0xff]  ;;  %v347_v11 = vld [vmem:[%s2867_s19 + $0xb0] sm:$0xff]  ;;  %344 = vst [vmem:[%s2872_s20 + $0x48] sm:$0xff] %v343_v9 }
  0x23   : > { %346 = vst [vmem:[%s2872_s20 + $0x50] sm:$0xff] %v345_v10  ;;  %348 = vst [vmem:[%s2872_s20 + $0x58] sm:$0xff] %v347_v11  ;;  %v349_v12 = vld [vmem:[%s2867_s19 + $0xc0] sm:$0xff]  ;;  %v351_v13 = vld [vmem:[%s2867_s19 + $0xd0] sm:$0xff] }
  0x24   : > { %v353_v14 = vld [vmem:[%s2867_s19 + $0xe0] sm:$0xff]  ;;  %350 = vst [vmem:[%s2872_s20 + $0x60] sm:$0xff] %v349_v12  ;;  %352 = vst [vmem:[%s2872_s20 + $0x68] sm:$0xff] %v351_v13  ;;  %v355_v15 = vld [vmem:[%s2867_s19 + $0xf0] sm:$0xff] }
  0x25   : > { %354 = vst [vmem:[%s2872_s20 + $0x70] sm:$0xff] %v353_v14  ;;  %v357_v16 = vld [vmem:[%s2867_s19 + $0x100] sm:$0xff]  ;;  %v359_v17 = vld [vmem:[%s2867_s19 + $0x110] sm:$0xff]  ;;  %356 = vst [vmem:[%s2872_s20 + $0x78] sm:$0xff] %v355_v15 }
  0x26   : > { %358 = vst [vmem:[%s2872_s20 + $0x80] sm:$0xff] %v357_v16  ;;  %360 = vst [vmem:[%s2872_s20 + $0x88] sm:$0xff] %v359_v17  ;;  %v361_v18 = vld [vmem:[%s2867_s19 + $0x120] sm:$0xff]  ;;  %v363_v19 = vld [vmem:[%s2867_s19 + $0x130] sm:$0xff] }
  0x27   : > { %v365_v20 = vld [vmem:[%s2867_s19 + $0x140] sm:$0xff]  ;;  %362 = vst [vmem:[%s2872_s20 + $0x90] sm:$0xff] %v361_v18  ;;  %364 = vst [vmem:[%s2872_s20 + $0x98] sm:$0xff] %v363_v19  ;;  %v367_v21 = vld [vmem:[%s2867_s19 + $0x150] sm:$0xff] }
  0x28   : > { %366 = vst [vmem:[%s2872_s20 + $0xa0] sm:$0xff] %v365_v20  ;;  %v369_v22 = vld [vmem:[%s2867_s19 + $0x160] sm:$0xff]  ;;  %v371_v23 = vld [vmem:[%s2867_s19 + $0x170] sm:$0xff]  ;;  %368 = vst [vmem:[%s2872_s20 + $0xa8] sm:$0xff] %v367_v21 }
  0x29   : > { %370 = vst [vmem:[%s2872_s20 + $0xb0] sm:$0xff] %v369_v22  ;;  %372 = vst [vmem:[%s2872_s20 + $0xb8] sm:$0xff] %v371_v23  ;;  %v373_v24 = vld [vmem:[%s2867_s19 + $0x180] sm:$0xff]  ;;  %v375_v25 = vld [vmem:[%s2867_s19 + $0x190] sm:$0xff] }
  0x2a   : > { %v377_v26 = vld [vmem:[%s2867_s19 + $0x1a0] sm:$0xff]  ;;  %374 = vst [vmem:[%s2872_s20 + $0xc0] sm:$0xff] %v373_v24  ;;  %376 = vst [vmem:[%s2872_s20 + $0xc8] sm:$0xff] %v375_v25  ;;  %v379_v27 = vld [vmem:[%s2867_s19 + $0x1b0] sm:$0xff] }
  0x2b   : > { %378 = vst [vmem:[%s2872_s20 + $0xd0] sm:$0xff] %v377_v26  ;;  %v381_v28 = vld [vmem:[%s2867_s19 + $0x1c0] sm:$0xff]  ;;  %v383_v29 = vld [vmem:[%s2867_s19 + $0x1d0] sm:$0xff]  ;;  %380 = vst [vmem:[%s2872_s20 + $0xd8] sm:$0xff] %v379_v27 }
  0x2c   : > { %382 = vst [vmem:[%s2872_s20 + $0xe0] sm:$0xff] %v381_v28  ;;  %384 = vst [vmem:[%s2872_s20 + $0xe8] sm:$0xff] %v383_v29  ;;  %v385_v30 = vld [vmem:[%s2867_s19 + $0x1e0] sm:$0xff]  ;;  %v387_v31 = vld [vmem:[%s2867_s19 + $0x1f0] sm:$0xff] }
  0x2d   : > { %386 = vst [vmem:[%s2872_s20 + $0xf0] sm:$0xff] %v385_v30  ;;  %388 = vst [vmem:[%s2872_s20 + $0xf8] sm:$0xff] %v387_v31 }
  0x2e PF: > { %p2158_p7 = scmp.ge.s32.totalorder %s2768_s27, 1  ;;  %p420_p8 = scmp.lt.s32.totalorder %s2768_s27, 5 }
  0x30   : > { %p421_p9 = pnand %p2158_p7, %p420_p8 }
  0x31   : > { %s427_s30 = sand.u32 (!%p421_p9), 1, %s2744_s21   ;;  %s2160_s7 = sshll.u32 (!%p421_p9), %s2752_s23, 5 }
  0x32   : > { %424 = sbr.rel (%p421_p9) target bundleno = 774 (0x306), region = 78  ;;  %s2159_s8 = sshll.u32 (!%p421_p9), %s427_s30, 8 }
  0x33   : > { %p474_p10 = scmp.lt.s32.totalorder (!%p421_p9), %s2160_s7, 63  ;;  %s2162_s9 = sshll.u32 (!%p421_p9), %s2756_s24, 5 }
  0x34   : > { %p480_p11 = scmp.lt.s32.totalorder (!%p421_p9), %s2162_s9, 63  ;;  %p2168_p12 = scmp.ne.s32.totalorder (!%p421_p9), %s2752_s23, 0 }
  0x39   : > { %s3283_s7 = smov (!%p474_p10, %s2160_s7), 63  ;;  %s3285_s9 = smov (!%p480_p11, %s2162_s9), 63 }
  0x3a   : > { %s2161_s11 = sshll.u32 %s3283_s7, 2  ;;  %s2163_s15 = sshll.u32 %s3285_s9, 2  ;;  %v2770_v32 = vmov (!%p2168_p12), 0.0  }
  0x3b   : > { %s2943_s14 = scalar_lea.vmem %s3262_s1, %s2161_s11  ;;  %s2165_s16 = sshll.u32 %s3285_s9, 3  ;;  %502 = vst [vmem:[#allocation2] sm:$0xff] (!%p2168_p12), %v2770_v32  ;;  %503 = vst [vmem:[#allocation2 + $0x8] sm:$0xff] (!%p2168_p12), %v2770_v32 }
  0x3c   : > { %s2948_s19 = scalar_lea.vmem %s3263_s2, %s2163_s15  ;;  %s2953_s24 = scalar_lea.vmem %s3264_s3, %s2165_s16  ;;  %504 = vst [vmem:[#allocation2 + $0x10] sm:$0xff] (!%p2168_p12), %v2770_v32  ;;  %505 = vst [vmem:[#allocation2 + $0x18] sm:$0xff] (!%p2168_p12), %v2770_v32 }
  0x3d   : > { %s2958_s0 = scalar_lea.vmem %s3267_s6, %s2165_s16  ;;  %s2960_s11 = scalar_lea.vmem [#allocation3], %s2159_s8  ;;  %506 = vst [vmem:[#allocation2 + $0x20] sm:$0xff] (!%p2168_p12), %v2770_v32  ;;  %507 = vst [vmem:[#allocation2 + $0x28] sm:$0xff] (!%p2168_p12), %v2770_v32 }
  0x3e   : > { %501 = sbr.rel (%p2168_p12) target bundleno = 75 (0x4b), region = 86  ;;  %508 = vst [vmem:[#allocation2 + $0x30] sm:$0xff] (!%p2168_p12), %v2770_v32  ;;  %509 = vst [vmem:[#allocation2 + $0x38] sm:$0xff] (!%p2168_p12), %v2770_v32 }
  0x3f   : > { %510 = vst [vmem:[#allocation2 + $0x40] sm:$0xff] (!%p2168_p12), %v2770_v32  ;;  %511 = vst [vmem:[#allocation2 + $0x48] sm:$0xff] (!%p2168_p12), %v2770_v32 }
  0x40   : > { %512 = vst [vmem:[#allocation2 + $0x50] sm:$0xff] (!%p2168_p12), %v2770_v32  ;;  %513 = vst [vmem:[#allocation2 + $0x58] sm:$0xff] (!%p2168_p12), %v2770_v32 }
  0x41   : > { %514 = vst [vmem:[#allocation2 + $0x60] sm:$0xff] (!%p2168_p12), %v2770_v32  ;;  %515 = vst [vmem:[#allocation2 + $0x68] sm:$0xff] (!%p2168_p12), %v2770_v32 }
  0x42   : > { %516 = vst [vmem:[#allocation2 + $0x70] sm:$0xff] (!%p2168_p12), %v2770_v32  ;;  %517 = vst [vmem:[#allocation2 + $0x78] sm:$0xff] (!%p2168_p12), %v2770_v32 }
  0x43   : > { %518 = vst [vmem:[#allocation2 + $0x80] sm:$0xff] (!%p2168_p12), %v2770_v32  ;;  %519 = vst [vmem:[#allocation2 + $0x88] sm:$0xff] (!%p2168_p12), %v2770_v32 }
  0x44   : > { %520 = vst [vmem:[#allocation2 + $0x90] sm:$0xff] (!%p2168_p12), %v2770_v32  ;;  %521 = vst [vmem:[#allocation2 + $0x98] sm:$0xff] (!%p2168_p12), %v2770_v32 }
  0x45   : > { %522 = vst [vmem:[#allocation2 + $0xa0] sm:$0xff] %v2770_v32  ;;  %523 = vst [vmem:[#allocation2 + $0xa8] sm:$0xff] %v2770_v32 }
  0x46   : > { %524 = vst [vmem:[#allocation2 + $0xb0] sm:$0xff] %v2770_v32  ;;  %525 = vst [vmem:[#allocation2 + $0xb8] sm:$0xff] %v2770_v32 }
  0x47   : > { %526 = vst [vmem:[#allocation2 + $0xc0] sm:$0xff] %v2770_v32  ;;  %527 = vst [vmem:[#allocation2 + $0xc8] sm:$0xff] %v2770_v32 }
  0x48   : > { %528 = vst [vmem:[#allocation2 + $0xd0] sm:$0xff] %v2770_v32  ;;  %529 = vst [vmem:[#allocation2 + $0xd8] sm:$0xff] %v2770_v32 }
  0x49   : > { %530 = vst [vmem:[#allocation2 + $0xe0] sm:$0xff] %v2770_v32  ;;  %531 = vst [vmem:[#allocation2 + $0xe8] sm:$0xff] %v2770_v32 }
  0x4a   : > { %532 = vst [vmem:[#allocation2 + $0xf0] sm:$0xff] %v2770_v32  ;;  %533 = vst [vmem:[#allocation2 + $0xf8] sm:$0xff] %v2770_v32 }
  0x4b PF: > { %v2616_v33 = vld [vmem:[%s2943_s14 + $0x40] sm:$0xff]   ;;  %v2618_v35 = vld [vmem:[%s2943_s14 + $0x48] sm:$0xff]   ;;  %v2620_v37 = vld [vmem:[%s2943_s14 + $0x50] sm:$0xff]   ;;  %p2217_p13 = scmp.ne.s32.totalorder %s2752_s23, 1 }
  0x4c   : > { %v2617_v34 = vld [vmem:[%s2943_s14] sm:$0xff]   ;;  %2254 = vmatprep.subr.bf16.mxu0 %v2616_v33  ;;  %2510 = vmatprep.subr.bf16.mxu1 %v2616_v33  ;;  %v2619_v36 = vld [vmem:[%s2943_s14 + $0x8] sm:$0xff]   ;;  %v2621_v38 = vld [vmem:[%s2943_s14 + $0x10] sm:$0xff]  }
  0x4d   : > { %2255 = vmatpush3.bf16.msra.mxu0 %v2617_v34  ;;  %2518 = vmatpush3.bf16.msra.mxu1 %v2617_v34  ;;  %v2622_v39 = vld [vmem:[%s2943_s14 + $0x58] sm:$0xff]   ;;  %v2624_v41 = vld [vmem:[%s2943_s14 + $0x60] sm:$0xff]   ;;  %v2626_v43 = vld [vmem:[%s2943_s14 + $0x68] sm:$0xff]  }
  0x4e   : > { %2256 = vmatprep.subr.bf16.mxu0 %v2618_v35  ;;  %2511 = vmatprep.subr.bf16.mxu1 %v2618_v35  ;;  %v2623_v40 = vld [vmem:[%s2943_s14 + $0x18] sm:$0xff]   ;;  %v2625_v42 = vld [vmem:[%s2943_s14 + $0x20] sm:$0xff]   ;;  %v2627_v46 = vld [vmem:[%s2943_s14 + $0x28] sm:$0xff]  }
  0x4f   : > { %v2634_v44 = vld [vmem:[%s2960_s11 + $0x4] ss:$8 sps:$4 sm:$0xff]   ;;  %v2628_v47 = vld [vmem:[%s2943_s14 + $0x70] sm:$0xff]   ;;  %v2630_v49 = vld [vmem:[%s2943_s14 + $0x78] sm:$0xff]  }
  0x50   : > { %v2637_v45 = vld [vmem:[%s2960_s11 + $0x84] ss:$8 sps:$4 sm:$0xff]   ;;  %918 = vmatprep.mubr.bf16.mxu0 %v2634_v44  ;;  %v2629_v48 = vld [vmem:[%s2943_s14 + $0x30] sm:$0xff]   ;;  %v2631_v50 = vld [vmem:[%s2943_s14 + $0x38] sm:$0xff]  }
  0x51   : > { %2257 = vmatpush3.bf16.msra.mxu0 %v2619_v36  ;;  %2519 = vmatpush3.bf16.msra.mxu1 %v2619_v36  ;;  %v2632_v51 = vld [vmem:[%s2960_s11] ss:$8 sps:$4 sm:$0xff]   ;;  %v2638_v53 = vld [vmem:[%s2960_s11 + $0x14] ss:$8 sps:$4 sm:$0xff]   ;;  %v2642_v55 = vld [vmem:[%s2960_s11 + $0x10] ss:$8 sps:$4 sm:$0xff]  }
  0x52   : > { %2258 = vmatprep.subr.bf16.mxu0 %v2620_v37  ;;  %2512 = vmatprep.subr.bf16.mxu1 %v2620_v37  ;;  %v2635_v52 = vld [vmem:[%s2960_s11 + $0x80] ss:$8 sps:$4 sm:$0xff]   ;;  %v2640_v54 = vld [vmem:[%s2960_s11 + $0x94] ss:$8 sps:$4 sm:$0xff]   ;;  %v2643_v56 = vld [vmem:[%s2960_s11 + $0x90] ss:$8 sps:$4 sm:$0xff]  }
  0x53   : > { %982 = vmatprep.mubr.bf16.mxu1 %v2637_v45  ;;  %v2644_v57 = vld [vmem:[%s2960_s11 + $0x24] ss:$8 sps:$4 sm:$0xff]   ;;  %v2648_v59 = vld [vmem:[%s2960_s11 + $0x20] ss:$8 sps:$4 sm:$0xff]   ;;  %v2650_v61 = vld [vmem:[%s2960_s11 + $0x34] ss:$8 sps:$4 sm:$0xff]  }
  0x54   : > { %v2646_v58 = vld [vmem:[%s2960_s11 + $0xa4] ss:$8 sps:$4 sm:$0xff]   ;;  %v2649_v60 = vld [vmem:[%s2960_s11 + $0xa0] ss:$8 sps:$4 sm:$0xff]   ;;  %v2652_v62 = vld [vmem:[%s2960_s11 + $0xb4] ss:$8 sps:$4 sm:$0xff]  }
  0x55   : > { %2259 = vmatpush3.bf16.msra.mxu0 %v2621_v38  ;;  %2520 = vmatpush3.bf16.msra.mxu1 %v2621_v38  ;;  %v2654_v63 = vld [vmem:[%s2960_s11 + $0x30] ss:$8 sps:$4 sm:$0xff]   ;;  %v2656_v1 = vld [vmem:[%s2960_s11 + $0x44] ss:$8 sps:$4 sm:$0xff]   ;;  %v2660_v3 = vld [vmem:[%s2960_s11 + $0x40] ss:$8 sps:$4 sm:$0xff]  }
  0x56   : > { %2260 = vmatprep.subr.bf16.mxu0 %v2622_v39  ;;  %2513 = vmatprep.subr.bf16.mxu1 %v2622_v39  ;;  %v2655_v0 = vld [vmem:[%s2960_s11 + $0xb0] ss:$8 sps:$4 sm:$0xff]   ;;  %v2658_v2 = vld [vmem:[%s2960_s11 + $0xc4] ss:$8 sps:$4 sm:$0xff]   ;;  %v2661_v4 = vld [vmem:[%s2960_s11 + $0xc0] ss:$8 sps:$4 sm:$0xff]  }
  0x57   : > { %v2662_v5 = vld [vmem:[%s2960_s11 + $0x54] ss:$8 sps:$4 sm:$0xff]   ;;  %v2666_v7 = vld [vmem:[%s2960_s11 + $0x50] ss:$8 sps:$4 sm:$0xff]   ;;  %v2668_v9 = vld [vmem:[%s2960_s11 + $0x64] ss:$8 sps:$4 sm:$0xff]  }
  0x58   : > { %v2664_v6 = vld [vmem:[%s2960_s11 + $0xd4] ss:$8 sps:$4 sm:$0xff]   ;;  %v2667_v8 = vld [vmem:[%s2960_s11 + $0xd0] ss:$8 sps:$4 sm:$0xff]   ;;  %v2670_v10 = vld [vmem:[%s2960_s11 + $0xe4] ss:$8 sps:$4 sm:$0xff]  }
  0x59   : > { %2261 = vmatpush3.bf16.msra.mxu0 %v2623_v40  ;;  %2521 = vmatpush3.bf16.msra.mxu1 %v2623_v40  ;;  %v2672_v11 = vld [vmem:[%s2960_s11 + $0x60] ss:$8 sps:$4 sm:$0xff]   ;;  %v2674_v13 = vld [vmem:[%s2960_s11 + $0x74] ss:$8 sps:$4 sm:$0xff]   ;;  %v2678_v15 = vld [vmem:[%s2960_s11 + $0x70] ss:$8 sps:$4 sm:$0xff]  }
  0x5a   : > { %2262 = vmatprep.subr.bf16.mxu0 %v2624_v41  ;;  %2514 = vmatprep.subr.bf16.mxu1 %v2624_v41  ;;  %v2673_v12 = vld [vmem:[%s2960_s11 + $0xe0] ss:$8 sps:$4 sm:$0xff]   ;;  %v2676_v14 = vld [vmem:[%s2960_s11 + $0xf4] ss:$8 sps:$4 sm:$0xff]   ;;  %v2679_v16 = vld [vmem:[%s2960_s11 + $0xf0] ss:$8 sps:$4 sm:$0xff]  }
  0x5b   : > { %v534_v19 = vld [vmem:[#allocation2] sm:$0xff]  ;;  %v535_v27 = vld [vmem:[#allocation2 + $0x8] sm:$0xff]  ;;  %v536_v39 = vld [vmem:[#allocation2 + $0x10] sm:$0xff] }
  0x5c   : > { %v550_v21 = vld [vmem:[#allocation2 + $0x80] sm:$0xff]  ;;  %v551_v29 = vld [vmem:[#allocation2 + $0x88] sm:$0xff]  ;;  %v552_v41 = vld [vmem:[#allocation2 + $0x90] sm:$0xff] }
  0x5d   : > { %2263 = vmatpush3.bf16.msra.mxu0 %v2625_v42  ;;  %2522 = vmatpush3.bf16.msra.mxu1 %v2625_v42 }
  0x5e   : > { %2264 = vmatprep.subr.bf16.mxu0 %v2626_v43  ;;  %2515 = vmatprep.subr.bf16.mxu1 %v2626_v43 }
  0x61   : > { %2265 = vmatpush3.bf16.msra.mxu0 %v2627_v46  ;;  %2523 = vmatpush3.bf16.msra.mxu1 %v2627_v46 }
  0x62   : > { %2266 = vmatprep.subr.bf16.mxu0 %v2628_v47  ;;  %2516 = vmatprep.subr.bf16.mxu1 %v2628_v47  ;;  %v537_v47 = vld [vmem:[#allocation2 + $0x18] sm:$0xff] }
  0x65   : > { %2267 = vmatpush3.bf16.msra.mxu0 %v2629_v48  ;;  %2524 = vmatpush3.bf16.msra.mxu1 %v2629_v48 }
  0x66   : > { %2268 = vmatprep.subr.bf16.mxu0 %v2630_v49  ;;  %2517 = vmatprep.subr.bf16.mxu1 %v2630_v49  ;;  %v553_v49 = vld [vmem:[#allocation2 + $0x98] sm:$0xff] }
  0x69   : > { %2269 = vmatpush3.bf16.msra.mxu0 %v2631_v50  ;;  %2525 = vmatpush3.bf16.msra.mxu1 %v2631_v50 }
  0x6c   : > { %919 = vmatmul.mubr.bf16.vlgmr.msra.gmra.mrb[0].mxu0 %v2632_v51  ;;  %983 = vmatmul.mubr.bf16.vlgmr.msra.gmra.mrb[0].mxu1 %v2635_v52 }
  0x6d   : > { %926 = vmatprep.mubr.bf16.mxu0 %v2638_v53  ;;  %990 = vmatprep.mubr.bf16.mxu1 %v2640_v54 }
  0x74   : > { %927 = vmatmul.mubr.bf16.gmra.mrb[4].mxu0 %v2642_v55  ;;  %991 = vmatmul.mubr.bf16.gmra.mrb[4].mxu1 %v2643_v56 }
  0x75   : > { %934 = vmatprep.mubr.bf16.mxu0 %v2644_v57  ;;  %998 = vmatprep.mubr.bf16.mxu1 %v2646_v58 }
  0x7c   : > { %935 = vmatmul.mubr.bf16.gmra.mrb[8].mxu0 %v2648_v59  ;;  %999 = vmatmul.mubr.bf16.gmra.mrb[8].mxu1 %v2649_v60  ;;  %v538_v59 = vld [vmem:[#allocation2 + $0x20] sm:$0xff] }
  0x7d   : > { %942 = vmatprep.mubr.bf16.mxu0 %v2650_v61  ;;  %1006 = vmatprep.mubr.bf16.mxu1 %v2652_v62  ;;  %v554_v61 = vld [vmem:[#allocation2 + $0xa0] sm:$0xff] }
  0x84   : > { %943 = vmatmul.mubr.bf16.gmra.mrb[12].mxu0 %v2654_v63  ;;  %1007 = vmatmul.mubr.bf16.gmra.mrb[12].mxu1 %v2655_v0 }
  0x85   : > { %950 = vmatprep.mubr.bf16.mxu0 %v2656_v1  ;;  %1014 = vmatprep.mubr.bf16.mxu1 %v2658_v2 }
  0x8c   : > { %951 = vmatmul.mubr.bf16.gmra.mrb[16].mxu0 %v2660_v3  ;;  %1015 = vmatmul.mubr.bf16.gmra.mrb[16].mxu1 %v2661_v4  ;;  %v539_v3 = vld [vmem:[#allocation2 + $0x28] sm:$0xff] }
  0x8d   : > { %958 = vmatprep.mubr.bf16.mxu0 %v2662_v5  ;;  %1022 = vmatprep.mubr.bf16.mxu1 %v2664_v6  ;;  %v555_v5 = vld [vmem:[#allocation2 + $0xa8] sm:$0xff] }
  0x94   : > { %959 = vmatmul.mubr.bf16.gmra.mrb[20].mxu0 %v2666_v7  ;;  %1023 = vmatmul.mubr.bf16.gmra.mrb[20].mxu1 %v2667_v8 }
  0x95   : > { %966 = vmatprep.mubr.bf16.mxu0 %v2668_v9  ;;  %1030 = vmatprep.mubr.bf16.mxu1 %v2670_v10 }
  0x9c   : > { %967 = vmatmul.mubr.bf16.gmra.mrb[24].mxu0 %v2672_v11  ;;  %1031 = vmatmul.mubr.bf16.gmra.mrb[24].mxu1 %v2673_v12 }
  0x9d   : > { %974 = vmatprep.mubr.bf16.mxu0 %v2674_v13  ;;  %1038 = vmatprep.mubr.bf16.mxu1 %v2676_v14 }
  0xa4   : > { %975 = vmatmul.mubr.bf16.gmra.mrb[28].mxu0 %v2678_v15  ;;  %1039 = vmatmul.mubr.bf16.gmra.mrb[28].mxu1 %v2679_v16  ;;  %v540_v15 = vld [vmem:[#allocation2 + $0x30] sm:$0xff] }
 0x13f   : > { %v2270_v17 = vpop.f32.mrb[0].mxu0  ;;  %v2318_v18 = vpop.f32.mrb[0].mxu1 }
 0x140   : > { %v2271_v20 = vpop.f32.mrb[1].mxu0  ;;  %v2319_v22 = vpop.f32.mrb[1].mxu1 }
 0x141   : > { %v2272_v23 = vadd.f32 %v2271_v20, %v2270_v17  ;;  %v2320_v24 = vadd.f32 %v2319_v22, %v2318_v18  ;;  %v2273_v25 = vpop.f32.mrb[2].mxu0  ;;  %v2321_v26 = vpop.f32.mrb[2].mxu1  ;;  %v556_v17 = vld [vmem:[#allocation2 + $0xb0] sm:$0xff] }
 0x142   : > { %v2274_v28 = vpop.f32.mrb[3].mxu0  ;;  %v2322_v30 = vpop.f32.mrb[3].mxu1 }
 0x143   : > { %v1047_v31 = vadd.f32 %v2272_v23, %v534_v19  ;;  %v1063_v32 = vadd.f32 %v2320_v24, %v550_v21  ;;  %v2275_v33 = vadd.f32 %v2274_v28, %v2273_v25  ;;  %v2323_v34 = vadd.f32 %v2322_v30, %v2321_v26  ;;  %v541_v23 = vld [vmem:[#allocation2 + $0x38] sm:$0xff] }
 0x144   : > { %v557_v25 = vld [vmem:[#allocation2 + $0xb8] sm:$0xff] }
 0x145   : > { %1079 = vst [vmem:[#allocation2] sm:$0xff] %v1047_v31  ;;  %1095 = vst [vmem:[#allocation2 + $0x80] sm:$0xff] %v1063_v32  ;;  %v1048_v35 = vadd.f32 %v2275_v33, %v535_v27  ;;  %v1064_v36 = vadd.f32 %v2323_v34, %v551_v29 }
 0x147   : > { %1080 = vst [vmem:[#allocation2 + $0x8] sm:$0xff] %v1048_v35  ;;  %1096 = vst [vmem:[#allocation2 + $0x88] sm:$0xff] %v1064_v36  ;;  %v2276_v37 = vpop.f32.mrb[4].mxu0  ;;  %v2324_v38 = vpop.f32.mrb[4].mxu1  ;;  %v542_v35 = vld [vmem:[#allocation2 + $0x40] sm:$0xff] }
 0x148   : > { %v2277_v40 = vpop.f32.mrb[5].mxu0  ;;  %v2325_v42 = vpop.f32.mrb[5].mxu1 }
 0x149   : > { %v2278_v43 = vadd.f32 %v2277_v40, %v2276_v37  ;;  %v2326_v44 = vadd.f32 %v2325_v42, %v2324_v38  ;;  %v2279_v45 = vpop.f32.mrb[6].mxu0  ;;  %v2327_v46 = vpop.f32.mrb[6].mxu1  ;;  %v558_v37 = vld [vmem:[#allocation2 + $0xc0] sm:$0xff] }
 0x14a   : > { %v2280_v48 = vpop.f32.mrb[7].mxu0  ;;  %v2328_v50 = vpop.f32.mrb[7].mxu1 }
 0x14b   : > { %v1049_v51 = vadd.f32 %v2278_v43, %v536_v39  ;;  %v1065_v52 = vadd.f32 %v2326_v44, %v552_v41  ;;  %v2281_v53 = vadd.f32 %v2280_v48, %v2279_v45  ;;  %v2329_v54 = vadd.f32 %v2328_v50, %v2327_v46  ;;  %v543_v43 = vld [vmem:[#allocation2 + $0x48] sm:$0xff] }
 0x14c   : > { %v559_v45 = vld [vmem:[#allocation2 + $0xc8] sm:$0xff] }
 0x14d   : > { %1081 = vst [vmem:[#allocation2 + $0x10] sm:$0xff] %v1049_v51  ;;  %1097 = vst [vmem:[#allocation2 + $0x90] sm:$0xff] %v1065_v52  ;;  %v1050_v55 = vadd.f32 %v2281_v53, %v537_v47  ;;  %v1066_v56 = vadd.f32 %v2329_v54, %v553_v49 }
 0x14f   : > { %1082 = vst [vmem:[#allocation2 + $0x18] sm:$0xff] %v1050_v55  ;;  %1098 = vst [vmem:[#allocation2 + $0x98] sm:$0xff] %v1066_v56  ;;  %v2282_v57 = vpop.f32.mrb[8].mxu0  ;;  %v2330_v58 = vpop.f32.mrb[8].mxu1  ;;  %v544_v55 = vld [vmem:[#allocation2 + $0x50] sm:$0xff] }
 0x150   : > { %v2283_v60 = vpop.f32.mrb[9].mxu0  ;;  %v2331_v62 = vpop.f32.mrb[9].mxu1 }
 0x151   : > { %v2284_v63 = vadd.f32 %v2283_v60, %v2282_v57  ;;  %v2332_v0 = vadd.f32 %v2331_v62, %v2330_v58  ;;  %v2285_v1 = vpop.f32.mrb[10].mxu0  ;;  %v2333_v2 = vpop.f32.mrb[10].mxu1  ;;  %v560_v57 = vld [vmem:[#allocation2 + $0xd0] sm:$0xff] }
 0x152   : > { %v2286_v4 = vpop.f32.mrb[11].mxu0  ;;  %v2334_v6 = vpop.f32.mrb[11].mxu1 }
 0x153   : > { %v1051_v7 = vadd.f32 %v2284_v63, %v538_v59  ;;  %v1067_v8 = vadd.f32 %v2332_v0, %v554_v61  ;;  %v2287_v9 = vadd.f32 %v2286_v4, %v2285_v1  ;;  %v2335_v10 = vadd.f32 %v2334_v6, %v2333_v2  ;;  %v545_v63 = vld [vmem:[#allocation2 + $0x58] sm:$0xff] }
 0x154   : > { %v561_v1 = vld [vmem:[#allocation2 + $0xd8] sm:$0xff] }
 0x155   : > { %1083 = vst [vmem:[#allocation2 + $0x20] sm:$0xff] %v1051_v7  ;;  %1099 = vst [vmem:[#allocation2 + $0xa0] sm:$0xff] %v1067_v8  ;;  %v1052_v11 = vadd.f32 %v2287_v9, %v539_v3  ;;  %v1068_v12 = vadd.f32 %v2335_v10, %v555_v5 }
 0x157   : > { %1084 = vst [vmem:[#allocation2 + $0x28] sm:$0xff] %v1052_v11  ;;  %1100 = vst [vmem:[#allocation2 + $0xa8] sm:$0xff] %v1068_v12  ;;  %v2288_v13 = vpop.f32.mrb[12].mxu0  ;;  %v2336_v14 = vpop.f32.mrb[12].mxu1  ;;  %v546_v11 = vld [vmem:[#allocation2 + $0x60] sm:$0xff] }
 0x158   : > { %v2289_v16 = vpop.f32.mrb[13].mxu0  ;;  %v2337_v18 = vpop.f32.mrb[13].mxu1 }
 0x159   : > { %v2290_v19 = vadd.f32 %v2289_v16, %v2288_v13  ;;  %v2338_v20 = vadd.f32 %v2337_v18, %v2336_v14  ;;  %v2291_v21 = vpop.f32.mrb[14].mxu0  ;;  %v2339_v22 = vpop.f32.mrb[14].mxu1  ;;  %v562_v13 = vld [vmem:[#allocation2 + $0xe0] sm:$0xff] }
 0x15a   : > { %v2292_v24 = vpop.f32.mrb[15].mxu0  ;;  %v2340_v26 = vpop.f32.mrb[15].mxu1 }
 0x15b   : > { %v1053_v27 = vadd.f32 %v2290_v19, %v540_v15  ;;  %v1069_v28 = vadd.f32 %v2338_v20, %v556_v17  ;;  %v2293_v29 = vadd.f32 %v2292_v24, %v2291_v21  ;;  %v2341_v30 = vadd.f32 %v2340_v26, %v2339_v22  ;;  %v547_v19 = vld [vmem:[#allocation2 + $0x68] sm:$0xff] }
 0x15c   : > { %v563_v21 = vld [vmem:[#allocation2 + $0xe8] sm:$0xff] }
 0x15d   : > { %1085 = vst [vmem:[#allocation2 + $0x30] sm:$0xff] %v1053_v27  ;;  %1101 = vst [vmem:[#allocation2 + $0xb0] sm:$0xff] %v1069_v28  ;;  %v1054_v31 = vadd.f32 %v2293_v29, %v541_v23  ;;  %v1070_v32 = vadd.f32 %v2341_v30, %v557_v25 }
 0x15f   : > { %1086 = vst [vmem:[#allocation2 + $0x38] sm:$0xff] %v1054_v31  ;;  %1102 = vst [vmem:[#allocation2 + $0xb8] sm:$0xff] %v1070_v32  ;;  %v2294_v33 = vpop.f32.mrb[16].mxu0  ;;  %v2342_v34 = vpop.f32.mrb[16].mxu1  ;;  %v548_v31 = vld [vmem:[#allocation2 + $0x70] sm:$0xff] }
 0x160   : > { %v2295_v36 = vpop.f32.mrb[17].mxu0  ;;  %v2343_v38 = vpop.f32.mrb[17].mxu1 }
 0x161   : > { %v2296_v39 = vadd.f32 %v2295_v36, %v2294_v33  ;;  %v2344_v40 = vadd.f32 %v2343_v38, %v2342_v34  ;;  %v2297_v41 = vpop.f32.mrb[18].mxu0  ;;  %v2345_v42 = vpop.f32.mrb[18].mxu1  ;;  %v564_v33 = vld [vmem:[#allocation2 + $0xf0] sm:$0xff] }
 0x162   : > { %v2298_v44 = vpop.f32.mrb[19].mxu0  ;;  %v2346_v46 = vpop.f32.mrb[19].mxu1 }
 0x163   : > { %v1055_v47 = vadd.f32 %v2296_v39, %v542_v35  ;;  %v1071_v48 = vadd.f32 %v2344_v40, %v558_v37  ;;  %v2299_v49 = vadd.f32 %v2298_v44, %v2297_v41  ;;  %v2347_v50 = vadd.f32 %v2346_v46, %v2345_v42  ;;  %v549_v39 = vld [vmem:[#allocation2 + $0x78] sm:$0xff] }
 0x164   : > { %v565_v41 = vld [vmem:[#allocation2 + $0xf8] sm:$0xff] }
 0x165   : > { %1087 = vst [vmem:[#allocation2 + $0x40] sm:$0xff] %v1055_v47  ;;  %1103 = vst [vmem:[#allocation2 + $0xc0] sm:$0xff] %v1071_v48  ;;  %v1056_v51 = vadd.f32 %v2299_v49, %v543_v43  ;;  %v1072_v52 = vadd.f32 %v2347_v50, %v559_v45  ;;  %v1149_v49 = vld [vmem:[%s2953_s24 + $0x10] sm:$0xff] (!%p2217_p13)  ;;  %v1147_v50 = vld [vmem:[%s2953_s24] sm:$0xff] (!%p2217_p13) }
 0x167   : > { %1088 = vst [vmem:[#allocation2 + $0x48] sm:$0xff] %v1056_v51  ;;  %1104 = vst [vmem:[#allocation2 + $0xc8] sm:$0xff] %v1072_v52  ;;  %v2300_v53 = vpop.f32.mrb[20].mxu0  ;;  %v2348_v54 = vpop.f32.mrb[20].mxu1  ;;  %v2771_v51 = vmov (!%p2217_p13), 0   ;;  %v1150_v52 = vld [vmem:[%s2953_s24 + $0x18] sm:$0xff] (!%p2217_p13) }
 0x168   : > { %v2301_v56 = vpop.f32.mrb[21].mxu0  ;;  %v2349_v58 = vpop.f32.mrb[21].mxu1  ;;  %2681 = vset.pattern.permute.xlu1 (!%p2217_p13), %v2771_v51  ;;  %2680 = vset.pattern.permute.xlu0 (!%p2217_p13), %v2771_v51 }
 0x169   : > { %v2302_v59 = vadd.f32 %v2301_v56, %v2300_v53  ;;  %v2350_v60 = vadd.f32 %v2349_v58, %v2348_v54  ;;  %v2303_v61 = vpop.f32.mrb[22].mxu0  ;;  %v2351_v62 = vpop.f32.mrb[22].mxu1  ;;  %1191 = vperm.xlu1 (!%p2217_p13), %2681, %v1149_v49   ;;  %1181 = vperm.xlu0 (!%p2217_p13), %2680, %v1147_v50   ;;  %v1148_v53 = vld [vmem:[%s2953_s24 + $0x8] sm:$0xff] (!%p2217_p13)  ;;  %v1154_v56 = vld [vmem:[%s2953_s24 + $0x38] sm:$0xff] (!%p2217_p13)  ;;  %v2682_v58 = vld [vmem:[%s3265_s4] sm:$0xff] (!%p2217_p13)  }
 0x16a   : > { %v2304_v0 = vpop.f32.mrb[23].mxu0  ;;  %v2352_v2 = vpop.f32.mrb[23].mxu1  ;;  %v1152_v54 = vld [vmem:[%s2953_s24 + $0x28] sm:$0xff] (!%p2217_p13)  ;;  %2462 = vmatprep.subr.bf16.mxu0 (!%p2217_p13), %v2682_v58  ;;  %v2713_v49 = vld [vmem:[%s2948_s19 + $0x78] sm:$0xff] (!%p2217_p13)  }
 0x16b   : > { %v1057_v3 = vadd.f32 %v2302_v59, %v544_v55  ;;  %v1073_v4 = vadd.f32 %v2350_v60, %v560_v57  ;;  %v2305_v5 = vadd.f32 %v2304_v0, %v2303_v61  ;;  %v2353_v6 = vadd.f32 %v2352_v2, %v2351_v62  ;;  %v1151_v55 = vld [vmem:[%s2953_s24 + $0x20] sm:$0xff] (!%p2217_p13)  ;;  %v1153_v57 = vld [vmem:[%s2953_s24 + $0x30] sm:$0xff] (!%p2217_p13)  ;;  %v1156_v60 = vld [vmem:[%s2953_s24 + $0x48] sm:$0xff] (!%p2217_p13)  ;;  %2463 = vmatpush3.bf16.msra.mxu0 (!%p2217_p13), %v2682_v58 }
 0x16c   : > { %v2683_v59 = vld [vmem:[%s3265_s4 + $0x40] sm:$0xff] (!%p2217_p13)   ;;  %v2684_v61 = vld [vmem:[%s3265_s4 + $0x8] sm:$0xff] (!%p2217_p13)   ;;  %v2686_v0 = vld [vmem:[%s3265_s4 + $0x10] sm:$0xff] (!%p2217_p13)  }
 0x16d   : > { %1089 = vst [vmem:[#allocation2 + $0x50] sm:$0xff] %v1057_v3  ;;  %1105 = vst [vmem:[#allocation2 + $0xd0] sm:$0xff] %v1073_v4  ;;  %v1058_v7 = vadd.f32 %v2305_v5, %v545_v63  ;;  %v1074_v8 = vadd.f32 %v2353_v6, %v561_v1  ;;  %1196 = vperm.xlu1 (!%p2217_p13), %2681, %v1150_v52   ;;  %1186 = vperm.xlu0 (!%p2217_p13), %2680, %v1148_v53   ;;  %v2685_v62 = vld [vmem:[%s3265_s4 + $0x48] sm:$0xff] (!%p2217_p13)   ;;  %v1155_v63 = vld [vmem:[%s2953_s24 + $0x40] sm:$0xff] (!%p2217_p13) }
 0x16e   : > { %2414 = vmatprep.subr.bf16.mxu1 (!%p2217_p13), %v2683_v59  ;;  %2464 = vmatprep.subr.bf16.mxu0 (!%p2217_p13), %v2684_v61  ;;  %v2687_v1 = vld [vmem:[%s3265_s4 + $0x50] sm:$0xff] (!%p2217_p13)   ;;  %v1158_v2 = vld [vmem:[%s2953_s24 + $0x58] sm:$0xff] (!%p2217_p13)  ;;  %v1160_v6 = vld [vmem:[%s2953_s24 + $0x68] sm:$0xff] (!%p2217_p13) }
 0x16f   : > { %1090 = vst [vmem:[#allocation2 + $0x58] sm:$0xff] %v1058_v7  ;;  %1106 = vst [vmem:[#allocation2 + $0xd8] sm:$0xff] %v1074_v8  ;;  %v2306_v9 = vpop.f32.mrb[24].mxu0  ;;  %v2354_v10 = vpop.f32.mrb[24].mxu1  ;;  %2415 = vmatpush3.bf16.msra.mxu1 (!%p2217_p13), %v2683_v59  ;;  %v1157_v3 = vld [vmem:[%s2953_s24 + $0x50] sm:$0xff] (!%p2217_p13)  ;;  %2465 = vmatpush3.bf16.msra.mxu0 (!%p2217_p13), %v2684_v61  ;;  %v2688_v4 = vld [vmem:[%s3265_s4 + $0x18] sm:$0xff] (!%p2217_p13)  }
 0x170   : > { %v2307_v12 = vpop.f32.mrb[25].mxu0  ;;  %v2355_v14 = vpop.f32.mrb[25].mxu1  ;;  %2416 = vmatprep.subr.bf16.mxu1 (!%p2217_p13), %v2685_v62  ;;  %2466 = vmatprep.subr.bf16.mxu0 (!%p2217_p13), %v2686_v0  ;;  %v2689_v5 = vld [vmem:[%s3265_s4 + $0x58] sm:$0xff] (!%p2217_p13)   ;;  %v1159_v7 = vld [vmem:[%s2953_s24 + $0x60] sm:$0xff] (!%p2217_p13)  ;;  %v1117_v52 = vld [vmem:[#allocation2 + $0x10] sm:$0xff] (!%p2217_p13) }
 0x171   : > { %v2308_v15 = vadd.f32 %v2307_v12, %v2306_v9  ;;  %v2356_v16 = vadd.f32 %v2355_v14, %v2354_v10  ;;  %v2309_v17 = vpop.f32.mrb[26].mxu0  ;;  %v2357_v18 = vpop.f32.mrb[26].mxu1  ;;  %1206 = vperm.xlu1 (!%p2217_p13), %2681, %v1152_v54   ;;  %1201 = vperm.xlu0 (!%p2217_p13), %2680, %v1151_v55   ;;  %v2690_v8 = vld [vmem:[%s3265_s4 + $0x20] sm:$0xff] (!%p2217_p13)   ;;  %v1162_v10 = vld [vmem:[%s2953_s24 + $0x78] sm:$0xff] (!%p2217_p13)  ;;  %v2692_v12 = vld [vmem:[%s3265_s4 + $0x28] sm:$0xff] (!%p2217_p13)  }
 0x172   : > { %v2310_v20 = vpop.f32.mrb[27].mxu0  ;;  %v2358_v22 = vpop.f32.mrb[27].mxu1  ;;  %v2691_v9 = vld [vmem:[%s3265_s4 + $0x60] sm:$0xff] (!%p2217_p13)   ;;  %v2693_v14 = vld [vmem:[%s3265_s4 + $0x68] sm:$0xff] (!%p2217_p13)   ;;  %v1118_v54 = vld [vmem:[#allocation2 + $0x18] sm:$0xff] (!%p2217_p13) }
 0x173   : > { %v1059_v23 = vadd.f32 %v2308_v15, %v546_v11  ;;  %v1075_v24 = vadd.f32 %v2356_v16, %v562_v13  ;;  %v2311_v25 = vadd.f32 %v2310_v20, %v2309_v17  ;;  %v2359_v26 = vadd.f32 %v2358_v22, %v2357_v18  ;;  %2417 = vmatpush3.bf16.msra.mxu1 (!%p2217_p13), %v2685_v62  ;;  %v1161_v11 = vld [vmem:[%s2953_s24 + $0x70] sm:$0xff] (!%p2217_p13)  ;;  %v2698_v13 = vld [vmem:[%s2948_s19] sm:$0xff] (!%p2217_p13)   ;;  %v1164_v15 = vld [vmem:[%s2953_s24 + $0x88] sm:$0xff] (!%p2217_p13) }
 0x174   : > { %2418 = vmatprep.subr.bf16.mxu1 (!%p2217_p13), %v2687_v1  ;;  %2467 = vmatpush3.bf16.msra.mxu0 (!%p2217_p13), %v2686_v0  ;;  %v1163_v16 = vld [vmem:[%s2953_s24 + $0x80] sm:$0xff] (!%p2217_p13)  ;;  %v2694_v17 = vld [vmem:[%s3265_s4 + $0x30] sm:$0xff] (!%p2217_p13)   ;;  %v2697_v22 = vld [vmem:[%s3265_s4 + $0x78] sm:$0xff] (!%p2217_p13)  }
 0x175   : > { %1091 = vst [vmem:[#allocation2 + $0x60] sm:$0xff] %v1059_v23  ;;  %1107 = vst [vmem:[#allocation2 + $0xe0] sm:$0xff] %v1075_v24  ;;  %v1060_v27 = vadd.f32 %v2311_v25, %v547_v19  ;;  %v1076_v28 = vadd.f32 %v2359_v26, %v563_v21  ;;  %1216 = vperm.xlu1 (!%p2217_p13), %2681, %v1154_v56   ;;  %1211 = vperm.xlu0 (!%p2217_p13), %2680, %v1153_v57   ;;  %v2695_v18 = vld [vmem:[%s3265_s4 + $0x70] sm:$0xff] (!%p2217_p13)   ;;  %v1166_v19 = vld [vmem:[%s2953_s24 + $0x98] sm:$0xff] (!%p2217_p13) }
 0x176   : > { %2468 = vmatprep.subr.bf16.mxu0 (!%p2217_p13), %v2688_v4  ;;  %2478 = vmatprep.mubr.bf16.mxu0 (!%p2217_p13), %v2698_v13  ;;  %v1165_v20 = vld [vmem:[%s2953_s24 + $0x90] sm:$0xff] (!%p2217_p13)  ;;  %v2696_v21 = vld [vmem:[%s3265_s4 + $0x38] sm:$0xff] (!%p2217_p13)   ;;  %v1168_v23 = vld [vmem:[%s2953_s24 + $0xa8] sm:$0xff] (!%p2217_p13) }
 0x177   : > { %1092 = vst [vmem:[#allocation2 + $0x68] sm:$0xff] %v1060_v27  ;;  %1108 = vst [vmem:[#allocation2 + $0xe8] sm:$0xff] %v1076_v28  ;;  %v2312_v29 = vpop.f32.mrb[28].mxu0  ;;  %v2360_v30 = vpop.f32.mrb[28].mxu1  ;;  %2419 = vmatpush3.bf16.msra.mxu1 (!%p2217_p13), %v2687_v1  ;;  %v1167_v24 = vld [vmem:[%s2953_s24 + $0xa0] sm:$0xff] (!%p2217_p13)  ;;  %v1170_v25 = vld [vmem:[%s2953_s24 + $0xb8] sm:$0xff] (!%p2217_p13) }
 0x178   : > { %v2313_v32 = vpop.f32.mrb[29].mxu0  ;;  %v2361_v34 = vpop.f32.mrb[29].mxu1  ;;  %2420 = vmatprep.subr.bf16.mxu1 (!%p2217_p13), %v2689_v5  ;;  %2469 = vmatpush3.bf16.msra.mxu0 (!%p2217_p13), %v2688_v4  ;;  %v1169_v26 = vld [vmem:[%s2953_s24 + $0xb0] sm:$0xff] (!%p2217_p13)  ;;  %v2699_v27 = vld [vmem:[%s2948_s19 + $0x8] sm:$0xff] (!%p2217_p13)   ;;  %v1115_v53 = vld [vmem:[#allocation2] sm:$0xff] (!%p2217_p13) }
 0x179   : > { %v2314_v35 = vadd.f32 %v2313_v32, %v2312_v29  ;;  %v2362_v36 = vadd.f32 %v2361_v34, %v2360_v30  ;;  %v2315_v37 = vpop.f32.mrb[30].mxu0  ;;  %v2363_v38 = vpop.f32.mrb[30].mxu1  ;;  %1114 = sbr.rel (%p2217_p13) target bundleno = 774 (0x306), region = 90  ;;  %1226 = vperm.xlu1 (!%p2217_p13), %2681, %v1156_v60   ;;  %1221 = vperm.xlu0 (!%p2217_p13), %2680, %v1155_v63   ;;  %v2700_v28 = vld [vmem:[%s2948_s19 + $0x10] sm:$0xff] (!%p2217_p13)   ;;  %v1172_v29 = vld [vmem:[%s2953_s24 + $0xc8] sm:$0xff] (!%p2217_p13)  ;;  %v1171_v30 = vld [vmem:[%s2953_s24 + $0xc0] sm:$0xff] (!%p2217_p13) }
 0x17a   : > { %v2316_v40 = vpop.f32.mrb[31].mxu0  ;;  %v2364_v42 = vpop.f32.mrb[31].mxu1  ;;  %2470 = vmatprep.subr.bf16.mxu0 (!%p2217_p13), %v2690_v8  ;;  %v1173_v32 = vld [vmem:[%s2953_s24 + $0xd0] sm:$0xff] (!%p2217_p13)  ;;  %v2702_v34 = vld [vmem:[%s2948_s19 + $0x20] sm:$0xff] (!%p2217_p13)   ;;  %v1116_v55 = vld [vmem:[#allocation2 + $0x8] sm:$0xff] (!%p2217_p13) }
 0x17b   : > { %v1061_v43 = vadd.f32 %v2314_v35, %v548_v31  ;;  %v1077_v44 = vadd.f32 %v2362_v36, %v564_v33  ;;  %v2317_v45 = vadd.f32 %v2316_v40, %v2315_v37  ;;  %v2365_v46 = vadd.f32 %v2364_v42, %v2363_v38  ;;  %2421 = vmatpush3.bf16.msra.mxu1 (!%p2217_p13), %v2689_v5  ;;  %v1174_v31 = vld [vmem:[%s2953_s24 + $0xd8] sm:$0xff] (!%p2217_p13)  ;;  %v1176_v35 = vld [vmem:[%s2953_s24 + $0xe8] sm:$0xff] (!%p2217_p13)  ;;  %v1175_v36 = vld [vmem:[%s2953_s24 + $0xe0] sm:$0xff] (!%p2217_p13) }
 0x17c   : > { %2422 = vmatprep.subr.bf16.mxu1 (!%p2217_p13), %v2691_v9  ;;  %2471 = vmatpush3.bf16.msra.mxu0 (!%p2217_p13), %v2690_v8  ;;  %v2701_v33 = vld [vmem:[%s2948_s19 + $0x18] sm:$0xff] (!%p2217_p13)   ;;  %v1177_v38 = vld [vmem:[%s2953_s24 + $0xf0] sm:$0xff] (!%p2217_p13)  ;;  %v2706_v42 = vld [vmem:[%s2948_s19 + $0x40] sm:$0xff] (!%p2217_p13)  }
 0x17d   : > { %1093 = vst [vmem:[#allocation2 + $0x70] sm:$0xff] %v1061_v43  ;;  %1109 = vst [vmem:[#allocation2 + $0xf0] sm:$0xff] %v1077_v44  ;;  %v1062_v47 = vadd.f32 %v2317_v45, %v549_v39  ;;  %v1078_v48 = vadd.f32 %v2365_v46, %v565_v41  ;;  %1236 = vperm.xlu1 (!%p2217_p13), %2681, %v1158_v2   ;;  %1231 = vperm.xlu0 (!%p2217_p13), %2680, %v1157_v3   ;;  %v1178_v37 = vld [vmem:[%s2953_s24 + $0xf8] sm:$0xff] (!%p2217_p13)  ;;  %v2703_v39 = vld [vmem:[%s2948_s19 + $0x28] sm:$0xff] (!%p2217_p13)  }
 0x17e   : > { %2472 = vmatprep.subr.bf16.mxu0 (!%p2217_p13), %v2692_v12  ;;  %v2704_v40 = vld [vmem:[%s2948_s19 + $0x30] sm:$0xff] (!%p2217_p13)   ;;  %v2705_v41 = vld [vmem:[%s2948_s19 + $0x38] sm:$0xff] (!%p2217_p13)   ;;  %v2707_v43 = vld [vmem:[%s2948_s19 + $0x48] sm:$0xff] (!%p2217_p13)  }
 0x17f   : > { %1094 = vst [vmem:[#allocation2 + $0x78] sm:$0xff] %v1062_v47  ;;  %1110 = vst [vmem:[#allocation2 + $0xf8] sm:$0xff] %v1078_v48  ;;  %2423 = vmatpush3.bf16.msra.mxu1 (!%p2217_p13), %v2691_v9  ;;  %v2708_v44 = vld [vmem:[%s2948_s19 + $0x50] sm:$0xff] (!%p2217_p13)   ;;  %v2709_v45 = vld [vmem:[%s2948_s19 + $0x58] sm:$0xff] (!%p2217_p13)  }
 0x180   : > { %2424 = vmatprep.subr.bf16.mxu1 %v2693_v14  ;;  %2473 = vmatpush3.bf16.msra.mxu0 %v2692_v12  ;;  %v2710_v46 = vld [vmem:[%s2948_s19 + $0x60] sm:$0xff]   ;;  %v2711_v47 = vld [vmem:[%s2948_s19 + $0x68] sm:$0xff]   ;;  %v2712_v48 = vld [vmem:[%s2948_s19 + $0x70] sm:$0xff]  }
 0x181   : > { %1246 = vperm.xlu1 %2681, %v1160_v6   ;;  %1241 = vperm.xlu0 %2680, %v1159_v7   ;;  %v1120_v62 = vld [vmem:[#allocation2 + $0x28] sm:$0xff]  ;;  %v1119_v63 = vld [vmem:[#allocation2 + $0x20] sm:$0xff]  ;;  %v1122_v6 = vld [vmem:[#allocation2 + $0x38] sm:$0xff] }
 0x182   : > { %2474 = vmatprep.subr.bf16.mxu0 %v2694_v17  ;;  %v1121_v7 = vld [vmem:[#allocation2 + $0x30] sm:$0xff]  ;;  %v1124_v13 = vld [vmem:[#allocation2 + $0x48] sm:$0xff] }
 0x183   : > { %2425 = vmatpush3.bf16.msra.mxu1 %v2693_v14  ;;  %v1123_v14 = vld [vmem:[#allocation2 + $0x40] sm:$0xff] }
 0x184   : > { %2426 = vmatprep.subr.bf16.mxu1 %v2695_v18  ;;  %2475 = vmatpush3.bf16.msra.mxu0 %v2694_v17 }
 0x185   : > { %1256 = vperm.xlu1 %2681, %v1162_v10   ;;  %1251 = vperm.xlu0 %2680, %v1161_v11  }
 0x186   : > { %2476 = vmatprep.subr.bf16.mxu0 %v2696_v21 }
 0x187   : > { %2427 = vmatpush3.bf16.msra.mxu1 %v2695_v18 }
 0x188   : > { %2428 = vmatprep.subr.bf16.mxu1 %v2697_v22  ;;  %2477 = vmatpush3.bf16.msra.mxu0 %v2696_v21  ;;  %v1125_v21 = vld [vmem:[#allocation2 + $0x50] sm:$0xff] }
 0x189   : > { %1266 = vperm.xlu1 %2681, %v1164_v15   ;;  %1261 = vperm.xlu0 %2680, %v1163_v16  }
 0x18b   : > { %2429 = vmatpush3.bf16.msra.mxu1 %v2697_v22  ;;  %2479 = vmatmul.mubr.bf16.vlgmr.msra.gmra.mrb[0].mxu0 %v2699_v27  ;;  %v1128_v27 = vld [vmem:[#allocation2 + $0x68] sm:$0xff] }
 0x18c   : > { %2482 = vmatprep.mubr.bf16.mxu0 %v2700_v28  ;;  %v1127_v28 = vld [vmem:[#allocation2 + $0x60] sm:$0xff] }
 0x18d   : > { %1276 = vperm.xlu1 %2681, %v1166_v19   ;;  %1271 = vperm.xlu0 %2680, %v1165_v20   ;;  %v1126_v20 = vld [vmem:[#allocation2 + $0x58] sm:$0xff] }
 0x191   : > { %1286 = vperm.xlu1 %2681, %v1168_v23   ;;  %1281 = vperm.xlu0 %2680, %v1167_v24  }
 0x193   : > { %2483 = vmatmul.mubr.bf16.gmra.mrb[4].mxu0 %v2701_v33 }
 0x194   : > { %2486 = vmatprep.mubr.bf16.mxu0 %v2702_v34  ;;  %v1130_v34 = vld [vmem:[#allocation2 + $0x78] sm:$0xff] }
 0x195   : > { %1296 = vperm.xlu1 %2681, %v1170_v25   ;;  %1291 = vperm.xlu0 %2680, %v1169_v26  }
 0x199   : > { %1306 = vperm.xlu1 %2681, %v1172_v29   ;;  %1301 = vperm.xlu0 %2680, %v1171_v30  }
 0x19b   : > { %2487 = vmatmul.mubr.bf16.gmra.mrb[8].mxu0 %v2703_v39 }
 0x19c   : > { %2490 = vmatprep.mubr.bf16.mxu0 %v2704_v40 }
 0x19d   : > { %1316 = vperm.xlu1 %2681, %v1174_v31   ;;  %1311 = vperm.xlu0 %2680, %v1173_v32  }
 0x1a1   : > { %1326 = vperm.xlu1 %2681, %v1176_v35   ;;  %1321 = vperm.xlu0 %2680, %v1175_v36   ;;  %v1129_v35 = vld [vmem:[#allocation2 + $0x70] sm:$0xff] }
 0x1a3   : > { %2491 = vmatmul.mubr.bf16.gmra.mrb[12].mxu0 %v2705_v41  ;;  %v1132_v41 = vld [vmem:[#allocation2 + $0x88] sm:$0xff] }
 0x1a4   : > { %2494 = vmatprep.mubr.bf16.mxu0 %v2706_v42  ;;  %v1131_v42 = vld [vmem:[#allocation2 + $0x80] sm:$0xff] }
 0x1a5   : > { %1336 = vperm.xlu1 %2681, %v1178_v37   ;;  %1331 = vperm.xlu0 %2680, %v1177_v38  }
 0x1ab   : > { %2495 = vmatmul.mubr.bf16.gmra.mrb[16].mxu0 %v2707_v43 }
 0x1ac   : > { %2498 = vmatprep.mubr.bf16.mxu0 %v2708_v44 }
 0x1b3   : > { %2499 = vmatmul.mubr.bf16.gmra.mrb[20].mxu0 %v2709_v45 }
 0x1b4   : > { %2502 = vmatprep.mubr.bf16.mxu0 %v2710_v46 }
 0x1bb   : > { %2503 = vmatmul.mubr.bf16.gmra.mrb[24].mxu0 %v2711_v47 }
 0x1bc   : > { %2506 = vmatprep.mubr.bf16.mxu0 %v2712_v48  ;;  %v1134_v48 = vld [vmem:[#allocation2 + $0x98] sm:$0xff] }
 0x1c3   : > { %2507 = vmatmul.mubr.bf16.gmra.mrb[28].mxu0 %v2713_v49  ;;  %v1133_v49 = vld [vmem:[#allocation2 + $0x90] sm:$0xff] }
 0x1e8   : > { %v1192_v50 = vpop.permute.xlu1 %1191  ;;  %v1182_v51 = vpop.permute.xlu0 %1181 }
 0x1e9   : > { %v1341_v58 = vmul.f32 %v1192_v50, %v1117_v52  ;;  %v1339_v59 = vmul.f32 %v1182_v51, %v1115_v53 }
 0x1ec   : > { %v1197_v56 = vpop.permute.xlu1 %1196  ;;  %v1187_v57 = vpop.permute.xlu0 %1186 }
 0x1ed   : > { %v1342_v60 = vmul.f32 %v1197_v56, %v1118_v54  ;;  %v1340_v61 = vmul.f32 %v1187_v57, %v1116_v55  ;;  %v1136_v55 = vld [vmem:[#allocation2 + $0xa8] sm:$0xff]  ;;  %v1135_v56 = vld [vmem:[#allocation2 + $0xa0] sm:$0xff] }
 0x1ef   : > { %v1372_v0 = vpack.c.bf16 %v1342_v60, %v1341_v58  ;;  %v1371_v1 = vpack.c.bf16 %v1340_v61, %v1339_v59 }
 0x1f0   : > { %v1207_v2 = vpop.permute.xlu1 %1206  ;;  %v1202_v3 = vpop.permute.xlu0 %1201 }
 0x1f1   : > { %v1344_v4 = vmul.f32 %v1207_v2, %v1120_v62  ;;  %v1343_v5 = vmul.f32 %v1202_v3, %v1119_v63  ;;  %2430 = vmatprep.mubr.bf16.mxu1 %v1371_v1  ;;  %v1138_v62 = vld [vmem:[#allocation2 + $0xb8] sm:$0xff]  ;;  %v1137_v63 = vld [vmem:[#allocation2 + $0xb0] sm:$0xff] }
 0x1f2   : > { %2431 = vmatmul.mubr.bf16.vlgmr.msra.gmra.mrb[0].mxu1 %v1372_v0 }
 0x1f3   : > { %v1373_v8 = vpack.c.bf16 %v1344_v4, %v1343_v5  ;;  %v1140_v5 = vld [vmem:[#allocation2 + $0xc8] sm:$0xff] }
 0x1f4   : > { %v1217_v9 = vpop.permute.xlu1 %1216  ;;  %v1212_v10 = vpop.permute.xlu0 %1211 }
 0x1f5   : > { %v1346_v11 = vmul.f32 %v1217_v9, %v1122_v6  ;;  %v1345_v12 = vmul.f32 %v1212_v10, %v1121_v7  ;;  %2434 = vmatprep.mubr.bf16.mxu1 %v1373_v8  ;;  %v1139_v6 = vld [vmem:[#allocation2 + $0xc0] sm:$0xff] }
 0x1f7   : > { %v1374_v15 = vpack.c.bf16 %v1346_v11, %v1345_v12  ;;  %v1142_v12 = vld [vmem:[#allocation2 + $0xd8] sm:$0xff] }
 0x1f8   : > { %v1227_v16 = vpop.permute.xlu1 %1226  ;;  %v1222_v17 = vpop.permute.xlu0 %1221 }
 0x1f9   : > { %v1348_v18 = vmul.f32 %v1227_v16, %v1124_v13  ;;  %v1347_v19 = vmul.f32 %v1222_v17, %v1123_v14  ;;  %v1141_v13 = vld [vmem:[#allocation2 + $0xd0] sm:$0xff] }
 0x1fa   : > { %2435 = vmatmul.mubr.bf16.gmra.mrb[4].mxu1 %v1374_v15 }
 0x1fb   : > { %v1375_v22 = vpack.c.bf16 %v1348_v18, %v1347_v19  ;;  %v1144_v19 = vld [vmem:[#allocation2 + $0xe8] sm:$0xff] }
 0x1fc   : > { %v1237_v23 = vpop.permute.xlu1 %1236  ;;  %v1232_v24 = vpop.permute.xlu0 %1231 }
 0x1fd   : > { %v1350_v25 = vmul.f32 %v1237_v23, %v1126_v20  ;;  %v1349_v26 = vmul.f32 %v1232_v24, %v1125_v21  ;;  %2438 = vmatprep.mubr.bf16.mxu1 %v1375_v22  ;;  %v1143_v20 = vld [vmem:[#allocation2 + $0xe0] sm:$0xff] }
 0x1ff   : > { %v1376_v29 = vpack.c.bf16 %v1350_v25, %v1349_v26  ;;  %v1146_v26 = vld [vmem:[#allocation2 + $0xf8] sm:$0xff] }
 0x200   : > { %v1247_v30 = vpop.permute.xlu1 %1246  ;;  %v1242_v31 = vpop.permute.xlu0 %1241 }
 0x201   : > { %v1352_v32 = vmul.f32 %v1247_v30, %v1128_v27  ;;  %v1351_v33 = vmul.f32 %v1242_v31, %v1127_v28  ;;  %v1145_v27 = vld [vmem:[#allocation2 + $0xf0] sm:$0xff] }
 0x202   : > { %2439 = vmatmul.mubr.bf16.gmra.mrb[8].mxu1 %v1376_v29 }
 0x203   : > { %v1377_v36 = vpack.c.bf16 %v1352_v32, %v1351_v33 }
 0x204   : > { %v1257_v37 = vpop.permute.xlu1 %1256  ;;  %v1252_v38 = vpop.permute.xlu0 %1251 }
 0x205   : > { %v1354_v39 = vmul.f32 %v1257_v37, %v1130_v34  ;;  %v1353_v40 = vmul.f32 %v1252_v38, %v1129_v35  ;;  %2442 = vmatprep.mubr.bf16.mxu1 %v1377_v36 }
 0x207   : > { %v1378_v43 = vpack.c.bf16 %v1354_v39, %v1353_v40 }
 0x208   : > { %v1267_v44 = vpop.permute.xlu1 %1266  ;;  %v1262_v45 = vpop.permute.xlu0 %1261 }
 0x209   : > { %v1356_v46 = vmul.f32 %v1267_v44, %v1132_v41  ;;  %v1355_v47 = vmul.f32 %v1262_v45, %v1131_v42 }
 0x20a   : > { %2443 = vmatmul.mubr.bf16.gmra.mrb[12].mxu1 %v1378_v43 }
 0x20b   : > { %v1379_v50 = vpack.c.bf16 %v1356_v46, %v1355_v47 }
 0x20c   : > { %v1277_v51 = vpop.permute.xlu1 %1276  ;;  %v1272_v52 = vpop.permute.xlu0 %1271 }
 0x20d   : > { %v1358_v53 = vmul.f32 %v1277_v51, %v1134_v48  ;;  %v1357_v54 = vmul.f32 %v1272_v52, %v1133_v49  ;;  %2446 = vmatprep.mubr.bf16.mxu1 %v1379_v50 }
 0x20f   : > { %v1380_v57 = vpack.c.bf16 %v1358_v53, %v1357_v54 }
 0x210   : > { %v1287_v58 = vpop.permute.xlu1 %1286  ;;  %v1282_v59 = vpop.permute.xlu0 %1281 }
 0x211   : > { %v1360_v60 = vmul.f32 %v1287_v58, %v1136_v55  ;;  %v1359_v61 = vmul.f32 %v1282_v59, %v1135_v56 }
 0x212   : > { %2447 = vmatmul.mubr.bf16.gmra.mrb[16].mxu1 %v1380_v57 }
 0x213   : > { %v1381_v0 = vpack.c.bf16 %v1360_v60, %v1359_v61 }
 0x214   : > { %v1297_v1 = vpop.permute.xlu1 %1296  ;;  %v1292_v2 = vpop.permute.xlu0 %1291 }
 0x215   : > { %v1362_v3 = vmul.f32 %v1297_v1, %v1138_v62  ;;  %v1361_v4 = vmul.f32 %v1292_v2, %v1137_v63  ;;  %2450 = vmatprep.mubr.bf16.mxu1 %v1381_v0 }
 0x217   : > { %v1382_v7 = vpack.c.bf16 %v1362_v3, %v1361_v4  ;;  %v3153_v3 = vld [vmem:[%s3266_s5] ss:$0 sm:$0xff] }
 0x218   : > { %v1307_v8 = vpop.permute.xlu1 %1306  ;;  %v1302_v9 = vpop.permute.xlu0 %1301 }
 0x219   : > { %v1364_v10 = vmul.f32 %v1307_v8, %v1140_v5  ;;  %v1363_v11 = vmul.f32 %v1302_v9, %v1139_v6 }
 0x21a   : > { %2451 = vmatmul.mubr.bf16.gmra.mrb[20].mxu1 %v1382_v7 }
 0x21b   : > { %v1383_v14 = vpack.c.bf16 %v1364_v10, %v1363_v11 }
 0x21c   : > { %v1317_v15 = vpop.permute.xlu1 %1316  ;;  %v1312_v16 = vpop.permute.xlu0 %1311 }
 0x21d   : > { %v1366_v17 = vmul.f32 %v1317_v15, %v1142_v12  ;;  %v1365_v18 = vmul.f32 %v1312_v16, %v1141_v13  ;;  %2454 = vmatprep.mubr.bf16.mxu1 %v1383_v14 }
 0x21f   : > { %v1384_v21 = vpack.c.bf16 %v1366_v17, %v1365_v18 }
 0x220   : > { %v1327_v22 = vpop.permute.xlu1 %1326  ;;  %v1322_v23 = vpop.permute.xlu0 %1321 }
 0x221   : > { %v1368_v24 = vmul.f32 %v1327_v22, %v1144_v19  ;;  %v1367_v25 = vmul.f32 %v1322_v23, %v1143_v20 }
 0x222   : > { %2455 = vmatmul.mubr.bf16.gmra.mrb[24].mxu1 %v1384_v21 }
 0x223   : > { %v1385_v28 = vpack.c.bf16 %v1368_v24, %v1367_v25 }
 0x224   : > { %v1337_v29 = vpop.permute.xlu1 %1336  ;;  %v1332_v30 = vpop.permute.xlu0 %1331 }
 0x225   : > { %v1370_v31 = vmul.f32 %v1337_v29, %v1146_v26  ;;  %v1369_v32 = vmul.f32 %v1332_v30, %v1145_v27  ;;  %2458 = vmatprep.mubr.bf16.mxu1 %v1385_v28 }
 0x227   : > { %v1386_v33 = vpack.c.bf16 %v1370_v31, %v1369_v32 }
 0x22a   : > { %2459 = vmatmul.mubr.bf16.gmra.mrb[28].mxu1 %v1386_v33 }
 0x25e   : > { %v2480_v34 = vpop.f32.mrb[0].mxu0 }
 0x25f   : > { %v1838_v35 = vpop.f32.mrb[1].mxu0 }
 0x260   : > { %v2481_v36 = vpop.f32.mrb[2].mxu0 }
 0x261   : > { %v1841_v37 = vpop.f32.mrb[3].mxu0 }
 0x266   : > { %v2484_v38 = vpop.f32.mrb[4].mxu0 }
 0x267   : > { %v1854_v39 = vpop.f32.mrb[5].mxu0 }
 0x268   : > { %v2485_v40 = vpop.f32.mrb[6].mxu0 }
 0x269   : > { %v1857_v41 = vpop.f32.mrb[7].mxu0 }
 0x26e   : > { %v2488_v42 = vpop.f32.mrb[8].mxu0 }
 0x26f   : > { %v1870_v43 = vpop.f32.mrb[9].mxu0 }
 0x270   : > { %v2489_v44 = vpop.f32.mrb[10].mxu0 }
 0x271   : > { %v3108_v45 = vpop.f32.mrb[11].mxu0 }
 0x276   : > { %v3110_v46 = vpop.f32.mrb[12].mxu0 }
 0x277   : > { %v3112_v47 = vpop.f32.mrb[13].mxu0 }
 0x278   : > { %v3114_v48 = vpop.f32.mrb[14].mxu0 }
 0x279   : > { %v3116_v49 = vpop.f32.mrb[15].mxu0 }
 0x27e   : > { %v3118_v50 = vpop.f32.mrb[16].mxu0 }
 0x27f   : > { %v3120_v51 = vpop.f32.mrb[17].mxu0 }
 0x280   : > { %v3122_v52 = vpop.f32.mrb[18].mxu0 }
 0x281   : > { %v3124_v53 = vpop.f32.mrb[19].mxu0 }
 0x286   : > { %v3126_v54 = vpop.f32.mrb[20].mxu0 }
 0x287   : > { %v3128_v55 = vpop.f32.mrb[21].mxu0 }
 0x288   : > { %v3130_v56 = vpop.f32.mrb[22].mxu0 }
 0x289   : > { %v3132_v57 = vpop.f32.mrb[23].mxu0 }
 0x28e   : > { %v3134_v58 = vpop.f32.mrb[24].mxu0 }
 0x28f   : > { %v3136_v59 = vpop.f32.mrb[25].mxu0 }
 0x290   : > { %v3138_v60 = vpop.f32.mrb[26].mxu0 }
 0x291   : > { %v3140_v61 = vpop.f32.mrb[27].mxu0 }
 0x296   : > { %v3142_v62 = vpop.f32.mrb[28].mxu0 }
 0x297   : > { %v3144_v63 = vpop.f32.mrb[29].mxu0 }
 0x298   : > { %v3146_v0 = vpop.f32.mrb[30].mxu0 }
 0x299   : > { %v3148_v1 = vpop.f32.mrb[31].mxu0 }
 0x2c5   : > { %v2432_v2 = vpop.f32.mrb[0].mxu1 }
 0x2c6   : > { %v1847_v4 = vadd.f32 %v2480_v34, %v2432_v2  ;;  %v1533_v5 = vpop.f32.mrb[1].mxu1 }
 0x2c7   : > { %v1839_v6 = vadd.f32 %v1838_v35, %v1533_v5  ;;  %v2433_v7 = vpop.f32.mrb[2].mxu1 }
 0x2c8   : > { %v1974_v8 = vadd.f32 %v3153_v3, %v1847_v4  ;;  %v1850_v9 = vadd.f32 %v2481_v36, %v2433_v7  ;;  %v1536_v10 = vpop.f32.mrb[3].mxu1 }
 0x2c9   : > { %v1972_v11 = vadd.f32 %v3153_v3, %v1839_v6  ;;  %v1842_v12 = vadd.f32 %v1841_v37, %v1536_v10 }
 0x2ca   : > { %2006 = vst [vmem:[%s2958_s0 + $0x10] sm:$0xff] %v1974_v8  ;;  %v1975_v13 = vadd.f32 %v3153_v3, %v1850_v9 }
 0x2cb   : > { %2004 = vst [vmem:[%s2958_s0] sm:$0xff] %v1972_v11  ;;  %v1973_v14 = vadd.f32 %v3153_v3, %v1842_v12 }
 0x2cc   : > { %2007 = vst [vmem:[%s2958_s0 + $0x18] sm:$0xff] %v1975_v13 }
 0x2cd   : > { %2005 = vst [vmem:[%s2958_s0 + $0x8] sm:$0xff] %v1973_v14  ;;  %v2436_v15 = vpop.f32.mrb[4].mxu1 }
 0x2ce   : > { %v1863_v16 = vadd.f32 %v2484_v38, %v2436_v15  ;;  %v1549_v17 = vpop.f32.mrb[5].mxu1 }
 0x2cf   : > { %v1855_v18 = vadd.f32 %v1854_v39, %v1549_v17  ;;  %v2437_v19 = vpop.f32.mrb[6].mxu1 }
 0x2d0   : > { %v1978_v20 = vadd.f32 %v3153_v3, %v1863_v16  ;;  %v1866_v21 = vadd.f32 %v2485_v40, %v2437_v19  ;;  %v1552_v22 = vpop.f32.mrb[7].mxu1 }
 0x2d1   : > { %v1976_v23 = vadd.f32 %v3153_v3, %v1855_v18  ;;  %v1858_v24 = vadd.f32 %v1857_v41, %v1552_v22 }
 0x2d2   : > { %2010 = vst [vmem:[%s2958_s0 + $0x30] sm:$0xff] %v1978_v20  ;;  %v1979_v25 = vadd.f32 %v3153_v3, %v1866_v21 }
 0x2d3   : > { %2008 = vst [vmem:[%s2958_s0 + $0x20] sm:$0xff] %v1976_v23  ;;  %v1977_v26 = vadd.f32 %v3153_v3, %v1858_v24 }
 0x2d4   : > { %2011 = vst [vmem:[%s2958_s0 + $0x38] sm:$0xff] %v1979_v25 }
 0x2d5   : > { %2009 = vst [vmem:[%s2958_s0 + $0x28] sm:$0xff] %v1977_v26  ;;  %v2440_v27 = vpop.f32.mrb[8].mxu1 }
 0x2d6   : > { %v1879_v28 = vadd.f32 %v2488_v42, %v2440_v27  ;;  %v1565_v29 = vpop.f32.mrb[9].mxu1 }
 0x2d7   : > { %v1871_v30 = vadd.f32 %v1870_v43, %v1565_v29  ;;  %v2441_v31 = vpop.f32.mrb[10].mxu1 }
 0x2d8   : > { %v1982_v32 = vadd.f32 %v3153_v3, %v1879_v28  ;;  %v1882_v33 = vadd.f32 %v2489_v44, %v2441_v31  ;;  %v1568_v34 = vpop.f32.mrb[11].mxu1 }
 0x2d9   : > { %v1980_v35 = vadd.f32 %v3153_v3, %v1871_v30  ;;  %v1874_v36 = vadd.f32 %v3108_v45, %v1568_v34 }
 0x2da   : > { %2014 = vst [vmem:[%s2958_s0 + $0x50] sm:$0xff] %v1982_v32  ;;  %v1983_v37 = vadd.f32 %v3153_v3, %v1882_v33 }
 0x2db   : > { %2012 = vst [vmem:[%s2958_s0 + $0x40] sm:$0xff] %v1980_v35  ;;  %v1981_v38 = vadd.f32 %v3153_v3, %v1874_v36 }
 0x2dc   : > { %2015 = vst [vmem:[%s2958_s0 + $0x58] sm:$0xff] %v1983_v37 }
 0x2dd   : > { %2013 = vst [vmem:[%s2958_s0 + $0x48] sm:$0xff] %v1981_v38  ;;  %v2444_v39 = vpop.f32.mrb[12].mxu1 }
 0x2de   : > { %v1895_v40 = vadd.f32 %v3110_v46, %v2444_v39  ;;  %v1581_v41 = vpop.f32.mrb[13].mxu1 }
 0x2df   : > { %v1887_v42 = vadd.f32 %v3112_v47, %v1581_v41  ;;  %v2445_v43 = vpop.f32.mrb[14].mxu1 }
 0x2e0   : > { %v1986_v44 = vadd.f32 %v3153_v3, %v1895_v40  ;;  %v1898_v45 = vadd.f32 %v3114_v48, %v2445_v43  ;;  %v1584_v2 = vpop.f32.mrb[15].mxu1 }
 0x2e1   : > { %v1984_v4 = vadd.f32 %v3153_v3, %v1887_v42  ;;  %v1890_v5 = vadd.f32 %v3116_v49, %v1584_v2 }
 0x2e2   : > { %2018 = vst [vmem:[%s2958_s0 + $0x70] sm:$0xff] %v1986_v44  ;;  %v1987_v6 = vadd.f32 %v3153_v3, %v1898_v45 }
 0x2e3   : > { %2016 = vst [vmem:[%s2958_s0 + $0x60] sm:$0xff] %v1984_v4  ;;  %v1985_v46 = vadd.f32 %v3153_v3, %v1890_v5 }
 0x2e4   : > { %2019 = vst [vmem:[%s2958_s0 + $0x78] sm:$0xff] %v1987_v6 }
 0x2e5   : > { %2017 = vst [vmem:[%s2958_s0 + $0x68] sm:$0xff] %v1985_v46  ;;  %v2448_v47 = vpop.f32.mrb[16].mxu1 }
 0x2e6   : > { %v1911_v48 = vadd.f32 %v3118_v50, %v2448_v47  ;;  %v1597_v7 = vpop.f32.mrb[17].mxu1 }
 0x2e7   : > { %v1903_v8 = vadd.f32 %v3120_v51, %v1597_v7  ;;  %v2449_v9 = vpop.f32.mrb[18].mxu1 }
 0x2e8   : > { %v1990_v49 = vadd.f32 %v3153_v3, %v1911_v48  ;;  %v1914_v10 = vadd.f32 %v3122_v52, %v2449_v9  ;;  %v1600_v11 = vpop.f32.mrb[19].mxu1 }
 0x2e9   : > { %v1988_v12 = vadd.f32 %v3153_v3, %v1903_v8  ;;  %v1906_v13 = vadd.f32 %v3124_v53, %v1600_v11 }
 0x2ea   : > { %2022 = vst [vmem:[%s2958_s0 + $0x90] sm:$0xff] %v1990_v49  ;;  %v1991_v14 = vadd.f32 %v3153_v3, %v1914_v10 }
 0x2eb   : > { %2020 = vst [vmem:[%s2958_s0 + $0x80] sm:$0xff] %v1988_v12  ;;  %v1989_v50 = vadd.f32 %v3153_v3, %v1906_v13 }
 0x2ec   : > { %2023 = vst [vmem:[%s2958_s0 + $0x98] sm:$0xff] %v1991_v14 }
 0x2ed   : > { %2021 = vst [vmem:[%s2958_s0 + $0x88] sm:$0xff] %v1989_v50  ;;  %v2452_v51 = vpop.f32.mrb[20].mxu1 }
 0x2ee   : > { %v1927_v52 = vadd.f32 %v3126_v54, %v2452_v51  ;;  %v1613_v15 = vpop.f32.mrb[21].mxu1 }
 0x2ef   : > { %v1919_v16 = vadd.f32 %v3128_v55, %v1613_v15  ;;  %v2453_v17 = vpop.f32.mrb[22].mxu1 }
 0x2f0   : > { %v1994_v53 = vadd.f32 %v3153_v3, %v1927_v52  ;;  %v1930_v18 = vadd.f32 %v3130_v56, %v2453_v17  ;;  %v1616_v19 = vpop.f32.mrb[23].mxu1 }
 0x2f1   : > { %v1992_v20 = vadd.f32 %v3153_v3, %v1919_v16  ;;  %v1922_v21 = vadd.f32 %v3132_v57, %v1616_v19 }
 0x2f2   : > { %2026 = vst [vmem:[%s2958_s0 + $0xb0] sm:$0xff] %v1994_v53  ;;  %v1995_v22 = vadd.f32 %v3153_v3, %v1930_v18 }
 0x2f3   : > { %2024 = vst [vmem:[%s2958_s0 + $0xa0] sm:$0xff] %v1992_v20  ;;  %v1993_v54 = vadd.f32 %v3153_v3, %v1922_v21 }
 0x2f4   : > { %2027 = vst [vmem:[%s2958_s0 + $0xb8] sm:$0xff] %v1995_v22 }
 0x2f5   : > { %2025 = vst [vmem:[%s2958_s0 + $0xa8] sm:$0xff] %v1993_v54  ;;  %v2456_v55 = vpop.f32.mrb[24].mxu1 }
 0x2f6   : > { %v1943_v56 = vadd.f32 %v3134_v58, %v2456_v55  ;;  %v1629_v23 = vpop.f32.mrb[25].mxu1 }
 0x2f7   : > { %v1935_v24 = vadd.f32 %v3136_v59, %v1629_v23  ;;  %v2457_v25 = vpop.f32.mrb[26].mxu1 }
 0x2f8   : > { %v1998_v57 = vadd.f32 %v3153_v3, %v1943_v56  ;;  %v1946_v26 = vadd.f32 %v3138_v60, %v2457_v25  ;;  %v1632_v27 = vpop.f32.mrb[27].mxu1 }
 0x2f9   : > { %v1996_v28 = vadd.f32 %v3153_v3, %v1935_v24  ;;  %v1938_v29 = vadd.f32 %v3140_v61, %v1632_v27 }
 0x2fa   : > { %2030 = vst [vmem:[%s2958_s0 + $0xd0] sm:$0xff] %v1998_v57  ;;  %v1999_v30 = vadd.f32 %v3153_v3, %v1946_v26 }
 0x2fb   : > { %2028 = vst [vmem:[%s2958_s0 + $0xc0] sm:$0xff] %v1996_v28  ;;  %v1997_v58 = vadd.f32 %v3153_v3, %v1938_v29 }
 0x2fc   : > { %2031 = vst [vmem:[%s2958_s0 + $0xd8] sm:$0xff] %v1999_v30 }
 0x2fd   : > { %2029 = vst [vmem:[%s2958_s0 + $0xc8] sm:$0xff] %v1997_v58  ;;  %v2460_v59 = vpop.f32.mrb[28].mxu1 }
 0x2fe   : > { %v1959_v60 = vadd.f32 %v3142_v62, %v2460_v59  ;;  %v1645_v31 = vpop.f32.mrb[29].mxu1 }
 0x2ff   : > { %v1951_v32 = vadd.f32 %v3144_v63, %v1645_v31  ;;  %v2461_v33 = vpop.f32.mrb[30].mxu1 }
 0x300   : > { %v2002_v61 = vadd.f32 %v3153_v3, %v1959_v60  ;;  %v1962_v34 = vadd.f32 %v3146_v0, %v2461_v33  ;;  %v1648_v35 = vpop.f32.mrb[31].mxu1 }
 0x301   : > { %v2000_v36 = vadd.f32 %v3153_v3, %v1951_v32  ;;  %v1954_v37 = vadd.f32 %v3148_v1, %v1648_v35 }
 0x302   : > { %2034 = vst [vmem:[%s2958_s0 + $0xf0] sm:$0xff] %v2002_v61  ;;  %v2003_v38 = vadd.f32 %v3153_v3, %v1962_v34 }
 0x303   : > { %2032 = vst [vmem:[%s2958_s0 + $0xe0] sm:$0xff] %v2000_v36  ;;  %v2001_v39 = vadd.f32 %v3153_v3, %v1954_v37 }
 0x304   : > { %2035 = vst [vmem:[%s2958_s0 + $0xf8] sm:$0xff] %v2003_v38 }
 0x305   : > { %2033 = vst [vmem:[%s2958_s0 + $0xe8] sm:$0xff] %v2001_v39 }
 0x306 PF: > { %s16_s27 = sadd.s32 1, %s2768_s27   ;;  %s3270_s21 = smov %s2748_s22 }
 0x307   : > { %p13_p0 = scmp.ge.s32.totalorder %s16_s27, 6   ;;  %s3271_s22 = smov %s2858_s10 }
 0x308   : > { %s3272_s23 = smov %s2760_s25  ;;  %s3273_s24 = smov %s2764_s26 }
 0x309   : > { %s3274_s25 = smov %s3277_s28  ;;  %s3275_s26 = smov %s3281_s29 }
 0x30a   :  { %15 = sbr.rel (!%p13_p0) target bundleno = 6 (0x6), region = 134 }

// kernel: sage_forward_pallas.4
= control target key start
LH: loop header
LB: loop body
LE: loop exit
PB: predicated region body
PF: predicated region fallthrough
CT: control target
= control target key end

     0   :  { %s3573_s0 = inlined_call_operand.vmem [shape: bf16[512,512], index: 0, kind: input, shape index: {}]   ;;  %s3574_s1 = inlined_call_operand.vmem [shape: bf16[512,128], index: 1, kind: input, shape index: {}, may-alias: {1,2}]   ;;  %s3575_s2 = inlined_call_operand.vmem [shape: bf16[512,128], index: 2, kind: input, shape index: {}, may-alias: {1,2}]   ;;  %s3576_s3 = inlined_call_operand.vmem [shape: f32[512,1], index: 3, kind: input, shape index: {}]   ;;  %s3577_s4 = inlined_call_operand.vmem [shape: bf16[256,128], index: 4, kind: input, shape index: {}]   ;;  %s3578_s5 = inlined_call_operand.vmem [shape: f32[1,128], index: 5, kind: input, shape index: {}]   ;;  %s3579_s6 = inlined_call_operand.vmem [shape: bf16[512,128], index: 6, kind: output, shape index: {}]  }
   0x1   :  { %3580 = sst [smem:[#allocation4_spill]] %s3573_s0 }
   0x2   :  { %s3126_s21 = smov 0   ;;  %s3128_s22 = smov 0  }
   0x3   :  { %s3130_s23 = smov 0   ;;  %s3132_s24 = smov 0  }
   0x4   :  { %s3134_s25 = smov 0   ;;  %s3136_s26 = smov 0  }
   0x5   :  { %s3138_s27 = smov 0  }
   0x6 LB: > { %s25_s28 = sadd.s32 1, %s3079_s25  ;;  %s28_s29 = sadd.s32 1, %s3083_s26  ;;  %s3087_s27 = sphi %s3138_s27, %s16_s27   ;;  %s3083_s26 = sphi %s3136_s26, %s3587_s26   ;;  %s3079_s25 = sphi %s3134_s25, %s3586_s25   ;;  %s3075_s24 = sphi %s3132_s24, %s3585_s24   ;;  %s3071_s23 = sphi %s3130_s23, %s3584_s23   ;;  %s3067_s22 = sphi %s3128_s22, %s3583_s22   ;;  %s3063_s21 = sphi %s3126_s21, %s3582_s21  }
   0x7   : > { %p26_p0 = scmp.ge.s32.totalorder %s25_s28, 2  ;;  %p44_p1 = scmp.ne.s32.totalorder %s3067_s22, %s3063_s21 }
   0x8   : > { %p45_p2 = scmp.eq.s32.totalorder %s3087_s27, 0  ;;  %s37_s9 = sadd.s32 1, %s3067_s22 }
   0x9   : > { %s3589_s28 = smov (%p26_p0, %s25_s28), 0  ;;  %s3591_s29 = smov (!%p26_p0, %s28_s29), %s3083_s26 }
   0xa   : > { %p46_p3 = por %p45_p2, %p44_p1  ;;  %p30_p4 = scmp.ge.s32.totalorder %s3591_s29, 2 }
   0xb   : > { %s33_s30 = ssub.s32 %s3079_s25, %s3589_s28  ;;  %p2312_p6 = scmp.ge.s32.totalorder %s3087_s27, 4 }
   0xc   : > { %s3593_s29 = smov (%p30_p4, %s3591_s29), 0 }
   0xd   : > { %s32_s7 = ssub.s32 %s3083_s26, %s3593_s29  ;;  %222 = sbr.rel (%p2312_p6) target bundleno = 46 (0x2e), region = 24 }
   0xe   : > { %s34_s8 = sor.u32 %s33_s30, %s32_s7 }
   0xf   : > { %p35_p5 = scmp.eq.s32.totalorder %s34_s8, 0 }
  0x11   : > { %s3177_s10 = scalar_select %p35_p5, %s3067_s22, %s37_s9  }
  0x14   : > { %225 = sbr.rel (!%p46_p3) target bundleno = 46 (0x2e), region = 28  ;;  %s227_s11 = sand.u32 (%p46_p3), 1, %s3067_s22  }
  0x15   : > { %s2315_s12 = sshll.u32 (%p46_p3), %s3079_s25, 1  ;;  %s2313_s13 = sshll.u32 (%p46_p3), %s227_s11, 8 }
  0x16   : > { %s2445_s14 = sshll.u32 (%p46_p3), %s3083_s26, 7  ;;  %s3581_s0 = sld [smem:[#allocation4_spill]] (%p46_p3) }
  0x17   : > { %s233_s15 = sadd.s32 (%p46_p3), %s2445_s14, %s2315_s12  ;;  %s3191_s20 = scalar_lea.vmem (%p46_p3), [#allocation3], %s2313_s13 }
  0x18   : > { %s2317_s16 = sshll.u32 (%p46_p3), %s233_s15, 2 }
  0x1c   : > { %s3186_s19 = scalar_lea.vmem %s3581_s0, %s2317_s16 }
  0x1d   : > { %v325_v0 = vld [vmem:[%s3186_s19] sm:$0xff]  ;;  %v327_v1 = vld [vmem:[%s3186_s19 + $0x10] sm:$0xff] }
  0x1e   : > { %v329_v2 = vld [vmem:[%s3186_s19 + $0x20] sm:$0xff]  ;;  %326 = vst [vmem:[%s3191_s20] sm:$0xff] %v325_v0  ;;  %328 = vst [vmem:[%s3191_s20 + $0x8] sm:$0xff] %v327_v1  ;;  %v331_v3 = vld [vmem:[%s3186_s19 + $0x30] sm:$0xff] }
  0x1f   : > { %330 = vst [vmem:[%s3191_s20 + $0x10] sm:$0xff] %v329_v2  ;;  %v333_v4 = vld [vmem:[%s3186_s19 + $0x40] sm:$0xff]  ;;  %v335_v5 = vld [vmem:[%s3186_s19 + $0x50] sm:$0xff]  ;;  %332 = vst [vmem:[%s3191_s20 + $0x18] sm:$0xff] %v331_v3 }
  0x20   : > { %334 = vst [vmem:[%s3191_s20 + $0x20] sm:$0xff] %v333_v4  ;;  %336 = vst [vmem:[%s3191_s20 + $0x28] sm:$0xff] %v335_v5  ;;  %v337_v6 = vld [vmem:[%s3186_s19 + $0x60] sm:$0xff]  ;;  %v339_v7 = vld [vmem:[%s3186_s19 + $0x70] sm:$0xff] }
  0x21   : > { %v341_v8 = vld [vmem:[%s3186_s19 + $0x80] sm:$0xff]  ;;  %338 = vst [vmem:[%s3191_s20 + $0x30] sm:$0xff] %v337_v6  ;;  %340 = vst [vmem:[%s3191_s20 + $0x38] sm:$0xff] %v339_v7  ;;  %v343_v9 = vld [vmem:[%s3186_s19 + $0x90] sm:$0xff] }
  0x22   : > { %342 = vst [vmem:[%s3191_s20 + $0x40] sm:$0xff] %v341_v8  ;;  %v345_v10 = vld [vmem:[%s3186_s19 + $0xa0] sm:$0xff]  ;;  %v347_v11 = vld [vmem:[%s3186_s19 + $0xb0] sm:$0xff]  ;;  %344 = vst [vmem:[%s3191_s20 + $0x48] sm:$0xff] %v343_v9 }
  0x23   : > { %346 = vst [vmem:[%s3191_s20 + $0x50] sm:$0xff] %v345_v10  ;;  %348 = vst [vmem:[%s3191_s20 + $0x58] sm:$0xff] %v347_v11  ;;  %v349_v12 = vld [vmem:[%s3186_s19 + $0xc0] sm:$0xff]  ;;  %v351_v13 = vld [vmem:[%s3186_s19 + $0xd0] sm:$0xff] }
  0x24   : > { %v353_v14 = vld [vmem:[%s3186_s19 + $0xe0] sm:$0xff]  ;;  %350 = vst [vmem:[%s3191_s20 + $0x60] sm:$0xff] %v349_v12  ;;  %352 = vst [vmem:[%s3191_s20 + $0x68] sm:$0xff] %v351_v13  ;;  %v355_v15 = vld [vmem:[%s3186_s19 + $0xf0] sm:$0xff] }
  0x25   : > { %354 = vst [vmem:[%s3191_s20 + $0x70] sm:$0xff] %v353_v14  ;;  %v357_v16 = vld [vmem:[%s3186_s19 + $0x100] sm:$0xff]  ;;  %v359_v17 = vld [vmem:[%s3186_s19 + $0x110] sm:$0xff]  ;;  %356 = vst [vmem:[%s3191_s20 + $0x78] sm:$0xff] %v355_v15 }
  0x26   : > { %358 = vst [vmem:[%s3191_s20 + $0x80] sm:$0xff] %v357_v16  ;;  %360 = vst [vmem:[%s3191_s20 + $0x88] sm:$0xff] %v359_v17  ;;  %v361_v18 = vld [vmem:[%s3186_s19 + $0x120] sm:$0xff]  ;;  %v363_v19 = vld [vmem:[%s3186_s19 + $0x130] sm:$0xff] }
  0x27   : > { %v365_v20 = vld [vmem:[%s3186_s19 + $0x140] sm:$0xff]  ;;  %362 = vst [vmem:[%s3191_s20 + $0x90] sm:$0xff] %v361_v18  ;;  %364 = vst [vmem:[%s3191_s20 + $0x98] sm:$0xff] %v363_v19  ;;  %v367_v21 = vld [vmem:[%s3186_s19 + $0x150] sm:$0xff] }
  0x28   : > { %366 = vst [vmem:[%s3191_s20 + $0xa0] sm:$0xff] %v365_v20  ;;  %v369_v22 = vld [vmem:[%s3186_s19 + $0x160] sm:$0xff]  ;;  %v371_v23 = vld [vmem:[%s3186_s19 + $0x170] sm:$0xff]  ;;  %368 = vst [vmem:[%s3191_s20 + $0xa8] sm:$0xff] %v367_v21 }
  0x29   : > { %370 = vst [vmem:[%s3191_s20 + $0xb0] sm:$0xff] %v369_v22  ;;  %372 = vst [vmem:[%s3191_s20 + $0xb8] sm:$0xff] %v371_v23  ;;  %v373_v24 = vld [vmem:[%s3186_s19 + $0x180] sm:$0xff]  ;;  %v375_v25 = vld [vmem:[%s3186_s19 + $0x190] sm:$0xff] }
  0x2a   : > { %v377_v26 = vld [vmem:[%s3186_s19 + $0x1a0] sm:$0xff]  ;;  %374 = vst [vmem:[%s3191_s20 + $0xc0] sm:$0xff] %v373_v24  ;;  %376 = vst [vmem:[%s3191_s20 + $0xc8] sm:$0xff] %v375_v25  ;;  %v379_v27 = vld [vmem:[%s3186_s19 + $0x1b0] sm:$0xff] }
  0x2b   : > { %378 = vst [vmem:[%s3191_s20 + $0xd0] sm:$0xff] %v377_v26  ;;  %v381_v28 = vld [vmem:[%s3186_s19 + $0x1c0] sm:$0xff]  ;;  %v383_v29 = vld [vmem:[%s3186_s19 + $0x1d0] sm:$0xff]  ;;  %380 = vst [vmem:[%s3191_s20 + $0xd8] sm:$0xff] %v379_v27 }
  0x2c   : > { %382 = vst [vmem:[%s3191_s20 + $0xe0] sm:$0xff] %v381_v28  ;;  %384 = vst [vmem:[%s3191_s20 + $0xe8] sm:$0xff] %v383_v29  ;;  %v385_v30 = vld [vmem:[%s3186_s19 + $0x1e0] sm:$0xff]  ;;  %v387_v31 = vld [vmem:[%s3186_s19 + $0x1f0] sm:$0xff] }
  0x2d   : > { %386 = vst [vmem:[%s3191_s20 + $0xf0] sm:$0xff] %v385_v30  ;;  %388 = vst [vmem:[%s3191_s20 + $0xf8] sm:$0xff] %v387_v31 }
  0x2e PF: > { %p2318_p7 = scmp.ge.s32.totalorder %s3087_s27, 1  ;;  %p420_p8 = scmp.lt.s32.totalorder %s3087_s27, 5 }
  0x30   : > { %p421_p9 = pnand %p2318_p7, %p420_p8 }
  0x31   : > { %s427_s30 = sand.u32 (!%p421_p9), 1, %s3063_s21   ;;  %s2320_s7 = sshll.u32 (!%p421_p9), %s3071_s23, 5 }
  0x32   : > { %424 = sbr.rel (%p421_p9) target bundleno = 778 (0x30a), region = 78  ;;  %s2319_s8 = sshll.u32 (!%p421_p9), %s427_s30, 8 }
  0x33   : > { %p474_p10 = scmp.lt.s32.totalorder (!%p421_p9), %s2320_s7, 63  ;;  %s2322_s9 = sshll.u32 (!%p421_p9), %s3075_s24, 5 }
  0x34   : > { %p480_p11 = scmp.lt.s32.totalorder (!%p421_p9), %s2322_s9, 63  ;;  %p2328_p12 = scmp.ne.s32.totalorder (!%p421_p9), %s3071_s23, 0 }
  0x39   : > { %s3595_s7 = smov (!%p474_p10, %s2320_s7), 63  ;;  %s3597_s9 = smov (!%p480_p11, %s2322_s9), 63 }
  0x3a   : > { %s2321_s11 = sshll.u32 %s3595_s7, 2  ;;  %s2323_s15 = sshll.u32 %s3597_s9, 2  ;;  %v3089_v32 = vmov (!%p2328_p12), 0.0  }
  0x3b   : > { %s3262_s14 = scalar_lea.vmem %s3574_s1, %s2321_s11  ;;  %s2325_s16 = sshll.u32 %s3597_s9, 3  ;;  %502 = vst [vmem:[#allocation2] sm:$0xff] (!%p2328_p12), %v3089_v32  ;;  %503 = vst [vmem:[#allocation2 + $0x8] sm:$0xff] (!%p2328_p12), %v3089_v32 }
  0x3c   : > { %s3267_s19 = scalar_lea.vmem %s3575_s2, %s2323_s15  ;;  %s3272_s24 = scalar_lea.vmem %s3576_s3, %s2325_s16  ;;  %504 = vst [vmem:[#allocation2 + $0x10] sm:$0xff] (!%p2328_p12), %v3089_v32  ;;  %505 = vst [vmem:[#allocation2 + $0x18] sm:$0xff] (!%p2328_p12), %v3089_v32 }
  0x3d   : > { %s3277_s0 = scalar_lea.vmem %s3579_s6, %s2323_s15  ;;  %s3279_s11 = scalar_lea.vmem [#allocation3], %s2319_s8  ;;  %506 = vst [vmem:[#allocation2 + $0x20] sm:$0xff] (!%p2328_p12), %v3089_v32  ;;  %507 = vst [vmem:[#allocation2 + $0x28] sm:$0xff] (!%p2328_p12), %v3089_v32 }
  0x3e   : > { %501 = sbr.rel (%p2328_p12) target bundleno = 75 (0x4b), region = 86  ;;  %508 = vst [vmem:[#allocation2 + $0x30] sm:$0xff] (!%p2328_p12), %v3089_v32  ;;  %509 = vst [vmem:[#allocation2 + $0x38] sm:$0xff] (!%p2328_p12), %v3089_v32 }
  0x3f   : > { %510 = vst [vmem:[#allocation2 + $0x40] sm:$0xff] (!%p2328_p12), %v3089_v32  ;;  %511 = vst [vmem:[#allocation2 + $0x48] sm:$0xff] (!%p2328_p12), %v3089_v32 }
  0x40   : > { %512 = vst [vmem:[#allocation2 + $0x50] sm:$0xff] (!%p2328_p12), %v3089_v32  ;;  %513 = vst [vmem:[#allocation2 + $0x58] sm:$0xff] (!%p2328_p12), %v3089_v32 }
  0x41   : > { %514 = vst [vmem:[#allocation2 + $0x60] sm:$0xff] (!%p2328_p12), %v3089_v32  ;;  %515 = vst [vmem:[#allocation2 + $0x68] sm:$0xff] (!%p2328_p12), %v3089_v32 }
  0x42   : > { %516 = vst [vmem:[#allocation2 + $0x70] sm:$0xff] (!%p2328_p12), %v3089_v32  ;;  %517 = vst [vmem:[#allocation2 + $0x78] sm:$0xff] (!%p2328_p12), %v3089_v32 }
  0x43   : > { %518 = vst [vmem:[#allocation2 + $0x80] sm:$0xff] (!%p2328_p12), %v3089_v32  ;;  %519 = vst [vmem:[#allocation2 + $0x88] sm:$0xff] (!%p2328_p12), %v3089_v32 }
  0x44   : > { %520 = vst [vmem:[#allocation2 + $0x90] sm:$0xff] (!%p2328_p12), %v3089_v32  ;;  %521 = vst [vmem:[#allocation2 + $0x98] sm:$0xff] (!%p2328_p12), %v3089_v32 }
  0x45   : > { %522 = vst [vmem:[#allocation2 + $0xa0] sm:$0xff] %v3089_v32  ;;  %523 = vst [vmem:[#allocation2 + $0xa8] sm:$0xff] %v3089_v32 }
  0x46   : > { %524 = vst [vmem:[#allocation2 + $0xb0] sm:$0xff] %v3089_v32  ;;  %525 = vst [vmem:[#allocation2 + $0xb8] sm:$0xff] %v3089_v32 }
  0x47   : > { %526 = vst [vmem:[#allocation2 + $0xc0] sm:$0xff] %v3089_v32  ;;  %527 = vst [vmem:[#allocation2 + $0xc8] sm:$0xff] %v3089_v32 }
  0x48   : > { %528 = vst [vmem:[#allocation2 + $0xd0] sm:$0xff] %v3089_v32  ;;  %529 = vst [vmem:[#allocation2 + $0xd8] sm:$0xff] %v3089_v32 }
  0x49   : > { %530 = vst [vmem:[#allocation2 + $0xe0] sm:$0xff] %v3089_v32  ;;  %531 = vst [vmem:[#allocation2 + $0xe8] sm:$0xff] %v3089_v32 }
  0x4a   : > { %532 = vst [vmem:[#allocation2 + $0xf0] sm:$0xff] %v3089_v32  ;;  %533 = vst [vmem:[#allocation2 + $0xf8] sm:$0xff] %v3089_v32 }
  0x4b PF: > { %v2935_v33 = vld [vmem:[%s3262_s14 + $0x40] sm:$0xff]   ;;  %v2937_v35 = vld [vmem:[%s3262_s14 + $0x48] sm:$0xff]   ;;  %v2939_v37 = vld [vmem:[%s3262_s14 + $0x50] sm:$0xff]   ;;  %p2377_p13 = scmp.ne.s32.totalorder %s3071_s23, 1 }
  0x4c   : > { %v2936_v34 = vld [vmem:[%s3262_s14] sm:$0xff]   ;;  %2573 = vmatprep.subr.bf16.mxu0 %v2935_v33  ;;  %2829 = vmatprep.subr.bf16.mxu1 %v2935_v33  ;;  %v2938_v36 = vld [vmem:[%s3262_s14 + $0x8] sm:$0xff]   ;;  %v2940_v38 = vld [vmem:[%s3262_s14 + $0x10] sm:$0xff]  }
  0x4d   : > { %2574 = vmatpush3.bf16.msra.mxu0 %v2936_v34  ;;  %2837 = vmatpush3.bf16.msra.mxu1 %v2936_v34  ;;  %v2941_v39 = vld [vmem:[%s3262_s14 + $0x58] sm:$0xff]   ;;  %v2943_v41 = vld [vmem:[%s3262_s14 + $0x60] sm:$0xff]   ;;  %v2945_v43 = vld [vmem:[%s3262_s14 + $0x68] sm:$0xff]  }
  0x4e   : > { %2575 = vmatprep.subr.bf16.mxu0 %v2937_v35  ;;  %2830 = vmatprep.subr.bf16.mxu1 %v2937_v35  ;;  %v2942_v40 = vld [vmem:[%s3262_s14 + $0x18] sm:$0xff]   ;;  %v2944_v42 = vld [vmem:[%s3262_s14 + $0x20] sm:$0xff]   ;;  %v2946_v46 = vld [vmem:[%s3262_s14 + $0x28] sm:$0xff]  }
  0x4f   : > { %v2953_v44 = vld [vmem:[%s3279_s11 + $0x4] ss:$8 sps:$4 sm:$0xff]   ;;  %v2947_v47 = vld [vmem:[%s3262_s14 + $0x70] sm:$0xff]   ;;  %v2949_v49 = vld [vmem:[%s3262_s14 + $0x78] sm:$0xff]  }
  0x50   : > { %v2956_v45 = vld [vmem:[%s3279_s11 + $0x84] ss:$8 sps:$4 sm:$0xff]   ;;  %918 = vmatprep.mubr.bf16.mxu0 %v2953_v44  ;;  %v2948_v48 = vld [vmem:[%s3262_s14 + $0x30] sm:$0xff]   ;;  %v2950_v50 = vld [vmem:[%s3262_s14 + $0x38] sm:$0xff]  }
  0x51   : > { %2576 = vmatpush3.bf16.msra.mxu0 %v2938_v36  ;;  %2838 = vmatpush3.bf16.msra.mxu1 %v2938_v36  ;;  %v2951_v51 = vld [vmem:[%s3279_s11] ss:$8 sps:$4 sm:$0xff]   ;;  %v2957_v53 = vld [vmem:[%s3279_s11 + $0x14] ss:$8 sps:$4 sm:$0xff]   ;;  %v2961_v55 = vld [vmem:[%s3279_s11 + $0x10] ss:$8 sps:$4 sm:$0xff]  }
  0x52   : > { %2577 = vmatprep.subr.bf16.mxu0 %v2939_v37  ;;  %2831 = vmatprep.subr.bf16.mxu1 %v2939_v37  ;;  %v2954_v52 = vld [vmem:[%s3279_s11 + $0x80] ss:$8 sps:$4 sm:$0xff]   ;;  %v2959_v54 = vld [vmem:[%s3279_s11 + $0x94] ss:$8 sps:$4 sm:$0xff]   ;;  %v2962_v56 = vld [vmem:[%s3279_s11 + $0x90] ss:$8 sps:$4 sm:$0xff]  }
  0x53   : > { %982 = vmatprep.mubr.bf16.mxu1 %v2956_v45  ;;  %v2963_v57 = vld [vmem:[%s3279_s11 + $0x24] ss:$8 sps:$4 sm:$0xff]   ;;  %v2967_v59 = vld [vmem:[%s3279_s11 + $0x20] ss:$8 sps:$4 sm:$0xff]   ;;  %v2969_v61 = vld [vmem:[%s3279_s11 + $0x34] ss:$8 sps:$4 sm:$0xff]  }
  0x54   : > { %v2965_v58 = vld [vmem:[%s3279_s11 + $0xa4] ss:$8 sps:$4 sm:$0xff]   ;;  %v2968_v60 = vld [vmem:[%s3279_s11 + $0xa0] ss:$8 sps:$4 sm:$0xff]   ;;  %v2971_v62 = vld [vmem:[%s3279_s11 + $0xb4] ss:$8 sps:$4 sm:$0xff]  }
  0x55   : > { %2578 = vmatpush3.bf16.msra.mxu0 %v2940_v38  ;;  %2839 = vmatpush3.bf16.msra.mxu1 %v2940_v38  ;;  %v2973_v63 = vld [vmem:[%s3279_s11 + $0x30] ss:$8 sps:$4 sm:$0xff]   ;;  %v2975_v1 = vld [vmem:[%s3279_s11 + $0x44] ss:$8 sps:$4 sm:$0xff]   ;;  %v2979_v3 = vld [vmem:[%s3279_s11 + $0x40] ss:$8 sps:$4 sm:$0xff]  }
  0x56   : > { %2579 = vmatprep.subr.bf16.mxu0 %v2941_v39  ;;  %2832 = vmatprep.subr.bf16.mxu1 %v2941_v39  ;;  %v2974_v0 = vld [vmem:[%s3279_s11 + $0xb0] ss:$8 sps:$4 sm:$0xff]   ;;  %v2977_v2 = vld [vmem:[%s3279_s11 + $0xc4] ss:$8 sps:$4 sm:$0xff]   ;;  %v2980_v4 = vld [vmem:[%s3279_s11 + $0xc0] ss:$8 sps:$4 sm:$0xff]  }
  0x57   : > { %v2981_v5 = vld [vmem:[%s3279_s11 + $0x54] ss:$8 sps:$4 sm:$0xff]   ;;  %v2985_v7 = vld [vmem:[%s3279_s11 + $0x50] ss:$8 sps:$4 sm:$0xff]   ;;  %v2987_v9 = vld [vmem:[%s3279_s11 + $0x64] ss:$8 sps:$4 sm:$0xff]  }
  0x58   : > { %v2983_v6 = vld [vmem:[%s3279_s11 + $0xd4] ss:$8 sps:$4 sm:$0xff]   ;;  %v2986_v8 = vld [vmem:[%s3279_s11 + $0xd0] ss:$8 sps:$4 sm:$0xff]   ;;  %v2989_v10 = vld [vmem:[%s3279_s11 + $0xe4] ss:$8 sps:$4 sm:$0xff]  }
  0x59   : > { %2580 = vmatpush3.bf16.msra.mxu0 %v2942_v40  ;;  %2840 = vmatpush3.bf16.msra.mxu1 %v2942_v40  ;;  %v2991_v11 = vld [vmem:[%s3279_s11 + $0x60] ss:$8 sps:$4 sm:$0xff]   ;;  %v2993_v13 = vld [vmem:[%s3279_s11 + $0x74] ss:$8 sps:$4 sm:$0xff]   ;;  %v2997_v15 = vld [vmem:[%s3279_s11 + $0x70] ss:$8 sps:$4 sm:$0xff]  }
  0x5a   : > { %2581 = vmatprep.subr.bf16.mxu0 %v2943_v41  ;;  %2833 = vmatprep.subr.bf16.mxu1 %v2943_v41  ;;  %v2992_v12 = vld [vmem:[%s3279_s11 + $0xe0] ss:$8 sps:$4 sm:$0xff]   ;;  %v2995_v14 = vld [vmem:[%s3279_s11 + $0xf4] ss:$8 sps:$4 sm:$0xff]   ;;  %v2998_v16 = vld [vmem:[%s3279_s11 + $0xf0] ss:$8 sps:$4 sm:$0xff]  }
  0x5b   : > { %v534_v19 = vld [vmem:[#allocation2] sm:$0xff]  ;;  %v535_v27 = vld [vmem:[#allocation2 + $0x8] sm:$0xff]  ;;  %v536_v39 = vld [vmem:[#allocation2 + $0x10] sm:$0xff] }
  0x5c   : > { %v550_v21 = vld [vmem:[#allocation2 + $0x80] sm:$0xff]  ;;  %v551_v29 = vld [vmem:[#allocation2 + $0x88] sm:$0xff]  ;;  %v552_v41 = vld [vmem:[#allocation2 + $0x90] sm:$0xff] }
  0x5d   : > { %2582 = vmatpush3.bf16.msra.mxu0 %v2944_v42  ;;  %2841 = vmatpush3.bf16.msra.mxu1 %v2944_v42 }
  0x5e   : > { %2583 = vmatprep.subr.bf16.mxu0 %v2945_v43  ;;  %2834 = vmatprep.subr.bf16.mxu1 %v2945_v43 }
  0x61   : > { %2584 = vmatpush3.bf16.msra.mxu0 %v2946_v46  ;;  %2842 = vmatpush3.bf16.msra.mxu1 %v2946_v46 }
  0x62   : > { %2585 = vmatprep.subr.bf16.mxu0 %v2947_v47  ;;  %2835 = vmatprep.subr.bf16.mxu1 %v2947_v47  ;;  %v537_v47 = vld [vmem:[#allocation2 + $0x18] sm:$0xff] }
  0x65   : > { %2586 = vmatpush3.bf16.msra.mxu0 %v2948_v48  ;;  %2843 = vmatpush3.bf16.msra.mxu1 %v2948_v48 }
  0x66   : > { %2587 = vmatprep.subr.bf16.mxu0 %v2949_v49  ;;  %2836 = vmatprep.subr.bf16.mxu1 %v2949_v49  ;;  %v553_v49 = vld [vmem:[#allocation2 + $0x98] sm:$0xff] }
  0x69   : > { %2588 = vmatpush3.bf16.msra.mxu0 %v2950_v50  ;;  %2844 = vmatpush3.bf16.msra.mxu1 %v2950_v50 }
  0x6c   : > { %919 = vmatmul.mubr.bf16.vlgmr.msra.gmra.mrb[0].mxu0 %v2951_v51  ;;  %983 = vmatmul.mubr.bf16.vlgmr.msra.gmra.mrb[0].mxu1 %v2954_v52 }
  0x6d   : > { %926 = vmatprep.mubr.bf16.mxu0 %v2957_v53  ;;  %990 = vmatprep.mubr.bf16.mxu1 %v2959_v54 }
  0x74   : > { %927 = vmatmul.mubr.bf16.gmra.mrb[4].mxu0 %v2961_v55  ;;  %991 = vmatmul.mubr.bf16.gmra.mrb[4].mxu1 %v2962_v56 }
  0x75   : > { %934 = vmatprep.mubr.bf16.mxu0 %v2963_v57  ;;  %998 = vmatprep.mubr.bf16.mxu1 %v2965_v58 }
  0x7c   : > { %935 = vmatmul.mubr.bf16.gmra.mrb[8].mxu0 %v2967_v59  ;;  %999 = vmatmul.mubr.bf16.gmra.mrb[8].mxu1 %v2968_v60  ;;  %v538_v59 = vld [vmem:[#allocation2 + $0x20] sm:$0xff] }
  0x7d   : > { %942 = vmatprep.mubr.bf16.mxu0 %v2969_v61  ;;  %1006 = vmatprep.mubr.bf16.mxu1 %v2971_v62  ;;  %v554_v61 = vld [vmem:[#allocation2 + $0xa0] sm:$0xff] }
  0x84   : > { %943 = vmatmul.mubr.bf16.gmra.mrb[12].mxu0 %v2973_v63  ;;  %1007 = vmatmul.mubr.bf16.gmra.mrb[12].mxu1 %v2974_v0 }
  0x85   : > { %950 = vmatprep.mubr.bf16.mxu0 %v2975_v1  ;;  %1014 = vmatprep.mubr.bf16.mxu1 %v2977_v2 }
  0x8c   : > { %951 = vmatmul.mubr.bf16.gmra.mrb[16].mxu0 %v2979_v3  ;;  %1015 = vmatmul.mubr.bf16.gmra.mrb[16].mxu1 %v2980_v4  ;;  %v539_v3 = vld [vmem:[#allocation2 + $0x28] sm:$0xff] }
  0x8d   : > { %958 = vmatprep.mubr.bf16.mxu0 %v2981_v5  ;;  %1022 = vmatprep.mubr.bf16.mxu1 %v2983_v6  ;;  %v555_v5 = vld [vmem:[#allocation2 + $0xa8] sm:$0xff] }
  0x94   : > { %959 = vmatmul.mubr.bf16.gmra.mrb[20].mxu0 %v2985_v7  ;;  %1023 = vmatmul.mubr.bf16.gmra.mrb[20].mxu1 %v2986_v8 }
  0x95   : > { %966 = vmatprep.mubr.bf16.mxu0 %v2987_v9  ;;  %1030 = vmatprep.mubr.bf16.mxu1 %v2989_v10 }
  0x9c   : > { %967 = vmatmul.mubr.bf16.gmra.mrb[24].mxu0 %v2991_v11  ;;  %1031 = vmatmul.mubr.bf16.gmra.mrb[24].mxu1 %v2992_v12 }
  0x9d   : > { %974 = vmatprep.mubr.bf16.mxu0 %v2993_v13  ;;  %1038 = vmatprep.mubr.bf16.mxu1 %v2995_v14 }
  0xa4   : > { %975 = vmatmul.mubr.bf16.gmra.mrb[28].mxu0 %v2997_v15  ;;  %1039 = vmatmul.mubr.bf16.gmra.mrb[28].mxu1 %v2998_v16  ;;  %v540_v15 = vld [vmem:[#allocation2 + $0x30] sm:$0xff] }
 0x13f   : > { %v2589_v17 = vpop.f32.mrb[0].mxu0  ;;  %v2637_v18 = vpop.f32.mrb[0].mxu1 }
 0x140   : > { %v2590_v20 = vpop.f32.mrb[1].mxu0  ;;  %v2638_v22 = vpop.f32.mrb[1].mxu1 }
 0x141   : > { %v2591_v23 = vadd.f32 %v2590_v20, %v2589_v17  ;;  %v2639_v24 = vadd.f32 %v2638_v22, %v2637_v18  ;;  %v2592_v25 = vpop.f32.mrb[2].mxu0  ;;  %v2640_v26 = vpop.f32.mrb[2].mxu1  ;;  %v556_v17 = vld [vmem:[#allocation2 + $0xb0] sm:$0xff] }
 0x142   : > { %v2593_v28 = vpop.f32.mrb[3].mxu0  ;;  %v2641_v30 = vpop.f32.mrb[3].mxu1 }
 0x143   : > { %v1047_v31 = vadd.f32 %v2591_v23, %v534_v19  ;;  %v1063_v32 = vadd.f32 %v2639_v24, %v550_v21  ;;  %v2594_v33 = vadd.f32 %v2593_v28, %v2592_v25  ;;  %v2642_v34 = vadd.f32 %v2641_v30, %v2640_v26  ;;  %v541_v23 = vld [vmem:[#allocation2 + $0x38] sm:$0xff] }
 0x144   : > { %v557_v25 = vld [vmem:[#allocation2 + $0xb8] sm:$0xff] }
 0x145   : > { %1079 = vst [vmem:[#allocation2] sm:$0xff] %v1047_v31  ;;  %1095 = vst [vmem:[#allocation2 + $0x80] sm:$0xff] %v1063_v32  ;;  %v1048_v35 = vadd.f32 %v2594_v33, %v535_v27  ;;  %v1064_v36 = vadd.f32 %v2642_v34, %v551_v29 }
 0x147   : > { %1080 = vst [vmem:[#allocation2 + $0x8] sm:$0xff] %v1048_v35  ;;  %1096 = vst [vmem:[#allocation2 + $0x88] sm:$0xff] %v1064_v36  ;;  %v2595_v37 = vpop.f32.mrb[4].mxu0  ;;  %v2643_v38 = vpop.f32.mrb[4].mxu1  ;;  %v542_v35 = vld [vmem:[#allocation2 + $0x40] sm:$0xff] }
 0x148   : > { %v2596_v40 = vpop.f32.mrb[5].mxu0  ;;  %v2644_v42 = vpop.f32.mrb[5].mxu1 }
 0x149   : > { %v2597_v43 = vadd.f32 %v2596_v40, %v2595_v37  ;;  %v2645_v44 = vadd.f32 %v2644_v42, %v2643_v38  ;;  %v2598_v45 = vpop.f32.mrb[6].mxu0  ;;  %v2646_v46 = vpop.f32.mrb[6].mxu1  ;;  %v558_v37 = vld [vmem:[#allocation2 + $0xc0] sm:$0xff] }
 0x14a   : > { %v2599_v48 = vpop.f32.mrb[7].mxu0  ;;  %v2647_v50 = vpop.f32.mrb[7].mxu1 }
 0x14b   : > { %v1049_v51 = vadd.f32 %v2597_v43, %v536_v39  ;;  %v1065_v52 = vadd.f32 %v2645_v44, %v552_v41  ;;  %v2600_v53 = vadd.f32 %v2599_v48, %v2598_v45  ;;  %v2648_v54 = vadd.f32 %v2647_v50, %v2646_v46  ;;  %v543_v43 = vld [vmem:[#allocation2 + $0x48] sm:$0xff] }
 0x14c   : > { %v559_v45 = vld [vmem:[#allocation2 + $0xc8] sm:$0xff] }
 0x14d   : > { %1081 = vst [vmem:[#allocation2 + $0x10] sm:$0xff] %v1049_v51  ;;  %1097 = vst [vmem:[#allocation2 + $0x90] sm:$0xff] %v1065_v52  ;;  %v1050_v55 = vadd.f32 %v2600_v53, %v537_v47  ;;  %v1066_v56 = vadd.f32 %v2648_v54, %v553_v49 }
 0x14f   : > { %1082 = vst [vmem:[#allocation2 + $0x18] sm:$0xff] %v1050_v55  ;;  %1098 = vst [vmem:[#allocation2 + $0x98] sm:$0xff] %v1066_v56  ;;  %v2601_v57 = vpop.f32.mrb[8].mxu0  ;;  %v2649_v58 = vpop.f32.mrb[8].mxu1  ;;  %v544_v55 = vld [vmem:[#allocation2 + $0x50] sm:$0xff] }
 0x150   : > { %v2602_v60 = vpop.f32.mrb[9].mxu0  ;;  %v2650_v62 = vpop.f32.mrb[9].mxu1 }
 0x151   : > { %v2603_v63 = vadd.f32 %v2602_v60, %v2601_v57  ;;  %v2651_v0 = vadd.f32 %v2650_v62, %v2649_v58  ;;  %v2604_v1 = vpop.f32.mrb[10].mxu0  ;;  %v2652_v2 = vpop.f32.mrb[10].mxu1  ;;  %v560_v57 = vld [vmem:[#allocation2 + $0xd0] sm:$0xff] }
 0x152   : > { %v2605_v4 = vpop.f32.mrb[11].mxu0  ;;  %v2653_v6 = vpop.f32.mrb[11].mxu1 }
 0x153   : > { %v1051_v7 = vadd.f32 %v2603_v63, %v538_v59  ;;  %v1067_v8 = vadd.f32 %v2651_v0, %v554_v61  ;;  %v2606_v9 = vadd.f32 %v2605_v4, %v2604_v1  ;;  %v2654_v10 = vadd.f32 %v2653_v6, %v2652_v2  ;;  %v545_v63 = vld [vmem:[#allocation2 + $0x58] sm:$0xff] }
 0x154   : > { %v561_v1 = vld [vmem:[#allocation2 + $0xd8] sm:$0xff] }
 0x155   : > { %1083 = vst [vmem:[#allocation2 + $0x20] sm:$0xff] %v1051_v7  ;;  %1099 = vst [vmem:[#allocation2 + $0xa0] sm:$0xff] %v1067_v8  ;;  %v1052_v11 = vadd.f32 %v2606_v9, %v539_v3  ;;  %v1068_v12 = vadd.f32 %v2654_v10, %v555_v5 }
 0x157   : > { %1084 = vst [vmem:[#allocation2 + $0x28] sm:$0xff] %v1052_v11  ;;  %1100 = vst [vmem:[#allocation2 + $0xa8] sm:$0xff] %v1068_v12  ;;  %v2607_v13 = vpop.f32.mrb[12].mxu0  ;;  %v2655_v14 = vpop.f32.mrb[12].mxu1  ;;  %v546_v11 = vld [vmem:[#allocation2 + $0x60] sm:$0xff] }
 0x158   : > { %v2608_v16 = vpop.f32.mrb[13].mxu0  ;;  %v2656_v18 = vpop.f32.mrb[13].mxu1 }
 0x159   : > { %v2609_v19 = vadd.f32 %v2608_v16, %v2607_v13  ;;  %v2657_v20 = vadd.f32 %v2656_v18, %v2655_v14  ;;  %v2610_v21 = vpop.f32.mrb[14].mxu0  ;;  %v2658_v22 = vpop.f32.mrb[14].mxu1  ;;  %v562_v13 = vld [vmem:[#allocation2 + $0xe0] sm:$0xff] }
 0x15a   : > { %v2611_v24 = vpop.f32.mrb[15].mxu0  ;;  %v2659_v26 = vpop.f32.mrb[15].mxu1 }
 0x15b   : > { %v1053_v27 = vadd.f32 %v2609_v19, %v540_v15  ;;  %v1069_v28 = vadd.f32 %v2657_v20, %v556_v17  ;;  %v2612_v29 = vadd.f32 %v2611_v24, %v2610_v21  ;;  %v2660_v30 = vadd.f32 %v2659_v26, %v2658_v22  ;;  %v547_v19 = vld [vmem:[#allocation2 + $0x68] sm:$0xff] }
 0x15c   : > { %v563_v21 = vld [vmem:[#allocation2 + $0xe8] sm:$0xff] }
 0x15d   : > { %1085 = vst [vmem:[#allocation2 + $0x30] sm:$0xff] %v1053_v27  ;;  %1101 = vst [vmem:[#allocation2 + $0xb0] sm:$0xff] %v1069_v28  ;;  %v1054_v31 = vadd.f32 %v2612_v29, %v541_v23  ;;  %v1070_v32 = vadd.f32 %v2660_v30, %v557_v25 }
 0x15f   : > { %1086 = vst [vmem:[#allocation2 + $0x38] sm:$0xff] %v1054_v31  ;;  %1102 = vst [vmem:[#allocation2 + $0xb8] sm:$0xff] %v1070_v32  ;;  %v2613_v33 = vpop.f32.mrb[16].mxu0  ;;  %v2661_v34 = vpop.f32.mrb[16].mxu1  ;;  %v548_v31 = vld [vmem:[#allocation2 + $0x70] sm:$0xff] }
 0x160   : > { %v2614_v36 = vpop.f32.mrb[17].mxu0  ;;  %v2662_v38 = vpop.f32.mrb[17].mxu1 }
 0x161   : > { %v2615_v39 = vadd.f32 %v2614_v36, %v2613_v33  ;;  %v2663_v40 = vadd.f32 %v2662_v38, %v2661_v34  ;;  %v2616_v41 = vpop.f32.mrb[18].mxu0  ;;  %v2664_v42 = vpop.f32.mrb[18].mxu1  ;;  %v564_v33 = vld [vmem:[#allocation2 + $0xf0] sm:$0xff] }
 0x162   : > { %v2617_v44 = vpop.f32.mrb[19].mxu0  ;;  %v2665_v46 = vpop.f32.mrb[19].mxu1 }
 0x163   : > { %v1055_v47 = vadd.f32 %v2615_v39, %v542_v35  ;;  %v1071_v48 = vadd.f32 %v2663_v40, %v558_v37  ;;  %v2618_v49 = vadd.f32 %v2617_v44, %v2616_v41  ;;  %v2666_v50 = vadd.f32 %v2665_v46, %v2664_v42  ;;  %v549_v39 = vld [vmem:[#allocation2 + $0x78] sm:$0xff] }
 0x164   : > { %v565_v41 = vld [vmem:[#allocation2 + $0xf8] sm:$0xff] }
 0x165   : > { %1087 = vst [vmem:[#allocation2 + $0x40] sm:$0xff] %v1055_v47  ;;  %1103 = vst [vmem:[#allocation2 + $0xc0] sm:$0xff] %v1071_v48  ;;  %v1056_v51 = vadd.f32 %v2618_v49, %v543_v43  ;;  %v1072_v52 = vadd.f32 %v2666_v50, %v559_v45  ;;  %v1149_v49 = vld [vmem:[%s3272_s24 + $0x10] sm:$0xff] (!%p2377_p13)  ;;  %v1147_v50 = vld [vmem:[%s3272_s24] sm:$0xff] (!%p2377_p13) }
 0x167   : > { %1088 = vst [vmem:[#allocation2 + $0x48] sm:$0xff] %v1056_v51  ;;  %1104 = vst [vmem:[#allocation2 + $0xc8] sm:$0xff] %v1072_v52  ;;  %v2619_v53 = vpop.f32.mrb[20].mxu0  ;;  %v2667_v54 = vpop.f32.mrb[20].mxu1  ;;  %v3090_v51 = vmov (!%p2377_p13), 0   ;;  %v1150_v52 = vld [vmem:[%s3272_s24 + $0x18] sm:$0xff] (!%p2377_p13) }
 0x168   : > { %v2620_v56 = vpop.f32.mrb[21].mxu0  ;;  %v2668_v58 = vpop.f32.mrb[21].mxu1  ;;  %3000 = vset.pattern.permute.xlu1 (!%p2377_p13), %v3090_v51  ;;  %2999 = vset.pattern.permute.xlu0 (!%p2377_p13), %v3090_v51 }
 0x169   : > { %v2621_v59 = vadd.f32 %v2620_v56, %v2619_v53  ;;  %v2669_v60 = vadd.f32 %v2668_v58, %v2667_v54  ;;  %v2622_v61 = vpop.f32.mrb[22].mxu0  ;;  %v2670_v62 = vpop.f32.mrb[22].mxu1  ;;  %1191 = vperm.xlu1 (!%p2377_p13), %3000, %v1149_v49   ;;  %1181 = vperm.xlu0 (!%p2377_p13), %2999, %v1147_v50   ;;  %v1148_v53 = vld [vmem:[%s3272_s24 + $0x8] sm:$0xff] (!%p2377_p13)  ;;  %v1154_v56 = vld [vmem:[%s3272_s24 + $0x38] sm:$0xff] (!%p2377_p13)  ;;  %v3001_v58 = vld [vmem:[%s3577_s4] sm:$0xff] (!%p2377_p13)  }
 0x16a   : > { %v2623_v0 = vpop.f32.mrb[23].mxu0  ;;  %v2671_v2 = vpop.f32.mrb[23].mxu1  ;;  %v1152_v54 = vld [vmem:[%s3272_s24 + $0x28] sm:$0xff] (!%p2377_p13)  ;;  %2781 = vmatprep.subr.bf16.mxu0 (!%p2377_p13), %v3001_v58  ;;  %v3032_v49 = vld [vmem:[%s3267_s19 + $0x78] sm:$0xff] (!%p2377_p13)  }
 0x16b   : > { %v1057_v3 = vadd.f32 %v2621_v59, %v544_v55  ;;  %v1073_v4 = vadd.f32 %v2669_v60, %v560_v57  ;;  %v2624_v5 = vadd.f32 %v2623_v0, %v2622_v61  ;;  %v2672_v6 = vadd.f32 %v2671_v2, %v2670_v62  ;;  %v1151_v55 = vld [vmem:[%s3272_s24 + $0x20] sm:$0xff] (!%p2377_p13)  ;;  %v1153_v57 = vld [vmem:[%s3272_s24 + $0x30] sm:$0xff] (!%p2377_p13)  ;;  %v1156_v60 = vld [vmem:[%s3272_s24 + $0x48] sm:$0xff] (!%p2377_p13)  ;;  %2782 = vmatpush3.bf16.msra.mxu0 (!%p2377_p13), %v3001_v58 }
 0x16c   : > { %v3002_v59 = vld [vmem:[%s3577_s4 + $0x40] sm:$0xff] (!%p2377_p13)   ;;  %v3003_v61 = vld [vmem:[%s3577_s4 + $0x8] sm:$0xff] (!%p2377_p13)   ;;  %v3005_v0 = vld [vmem:[%s3577_s4 + $0x10] sm:$0xff] (!%p2377_p13)  }
 0x16d   : > { %1089 = vst [vmem:[#allocation2 + $0x50] sm:$0xff] %v1057_v3  ;;  %1105 = vst [vmem:[#allocation2 + $0xd0] sm:$0xff] %v1073_v4  ;;  %v1058_v7 = vadd.f32 %v2624_v5, %v545_v63  ;;  %v1074_v8 = vadd.f32 %v2672_v6, %v561_v1  ;;  %1196 = vperm.xlu1 (!%p2377_p13), %3000, %v1150_v52   ;;  %1186 = vperm.xlu0 (!%p2377_p13), %2999, %v1148_v53   ;;  %v3004_v62 = vld [vmem:[%s3577_s4 + $0x48] sm:$0xff] (!%p2377_p13)   ;;  %v1155_v63 = vld [vmem:[%s3272_s24 + $0x40] sm:$0xff] (!%p2377_p13) }
 0x16e   : > { %2733 = vmatprep.subr.bf16.mxu1 (!%p2377_p13), %v3002_v59  ;;  %2783 = vmatprep.subr.bf16.mxu0 (!%p2377_p13), %v3003_v61  ;;  %v3006_v1 = vld [vmem:[%s3577_s4 + $0x50] sm:$0xff] (!%p2377_p13)   ;;  %v1158_v2 = vld [vmem:[%s3272_s24 + $0x58] sm:$0xff] (!%p2377_p13)  ;;  %v1160_v6 = vld [vmem:[%s3272_s24 + $0x68] sm:$0xff] (!%p2377_p13) }
 0x16f   : > { %1090 = vst [vmem:[#allocation2 + $0x58] sm:$0xff] %v1058_v7  ;;  %1106 = vst [vmem:[#allocation2 + $0xd8] sm:$0xff] %v1074_v8  ;;  %v2625_v9 = vpop.f32.mrb[24].mxu0  ;;  %v2673_v10 = vpop.f32.mrb[24].mxu1  ;;  %2734 = vmatpush3.bf16.msra.mxu1 (!%p2377_p13), %v3002_v59  ;;  %v1157_v3 = vld [vmem:[%s3272_s24 + $0x50] sm:$0xff] (!%p2377_p13)  ;;  %2784 = vmatpush3.bf16.msra.mxu0 (!%p2377_p13), %v3003_v61  ;;  %v3007_v4 = vld [vmem:[%s3577_s4 + $0x18] sm:$0xff] (!%p2377_p13)  }
 0x170   : > { %v2626_v12 = vpop.f32.mrb[25].mxu0  ;;  %v2674_v14 = vpop.f32.mrb[25].mxu1  ;;  %2735 = vmatprep.subr.bf16.mxu1 (!%p2377_p13), %v3004_v62  ;;  %2785 = vmatprep.subr.bf16.mxu0 (!%p2377_p13), %v3005_v0  ;;  %v3008_v5 = vld [vmem:[%s3577_s4 + $0x58] sm:$0xff] (!%p2377_p13)   ;;  %v1159_v7 = vld [vmem:[%s3272_s24 + $0x60] sm:$0xff] (!%p2377_p13)  ;;  %v1117_v52 = vld [vmem:[#allocation2 + $0x10] sm:$0xff] (!%p2377_p13) }
 0x171   : > { %v2627_v15 = vadd.f32 %v2626_v12, %v2625_v9  ;;  %v2675_v16 = vadd.f32 %v2674_v14, %v2673_v10  ;;  %v2628_v17 = vpop.f32.mrb[26].mxu0  ;;  %v2676_v18 = vpop.f32.mrb[26].mxu1  ;;  %1206 = vperm.xlu1 (!%p2377_p13), %3000, %v1152_v54   ;;  %1201 = vperm.xlu0 (!%p2377_p13), %2999, %v1151_v55   ;;  %v3009_v8 = vld [vmem:[%s3577_s4 + $0x20] sm:$0xff] (!%p2377_p13)   ;;  %v1162_v10 = vld [vmem:[%s3272_s24 + $0x78] sm:$0xff] (!%p2377_p13)  ;;  %v3011_v12 = vld [vmem:[%s3577_s4 + $0x28] sm:$0xff] (!%p2377_p13)  }
 0x172   : > { %v2629_v20 = vpop.f32.mrb[27].mxu0  ;;  %v2677_v22 = vpop.f32.mrb[27].mxu1  ;;  %v3010_v9 = vld [vmem:[%s3577_s4 + $0x60] sm:$0xff] (!%p2377_p13)   ;;  %v3012_v14 = vld [vmem:[%s3577_s4 + $0x68] sm:$0xff] (!%p2377_p13)   ;;  %v1118_v54 = vld [vmem:[#allocation2 + $0x18] sm:$0xff] (!%p2377_p13) }
 0x173   : > { %v1059_v23 = vadd.f32 %v2627_v15, %v546_v11  ;;  %v1075_v24 = vadd.f32 %v2675_v16, %v562_v13  ;;  %v2630_v25 = vadd.f32 %v2629_v20, %v2628_v17  ;;  %v2678_v26 = vadd.f32 %v2677_v22, %v2676_v18  ;;  %2736 = vmatpush3.bf16.msra.mxu1 (!%p2377_p13), %v3004_v62  ;;  %v1161_v11 = vld [vmem:[%s3272_s24 + $0x70] sm:$0xff] (!%p2377_p13)  ;;  %v3017_v13 = vld [vmem:[%s3267_s19] sm:$0xff] (!%p2377_p13)   ;;  %v1164_v15 = vld [vmem:[%s3272_s24 + $0x88] sm:$0xff] (!%p2377_p13) }
 0x174   : > { %2737 = vmatprep.subr.bf16.mxu1 (!%p2377_p13), %v3006_v1  ;;  %2786 = vmatpush3.bf16.msra.mxu0 (!%p2377_p13), %v3005_v0  ;;  %v1163_v16 = vld [vmem:[%s3272_s24 + $0x80] sm:$0xff] (!%p2377_p13)  ;;  %v3013_v17 = vld [vmem:[%s3577_s4 + $0x30] sm:$0xff] (!%p2377_p13)   ;;  %v3016_v22 = vld [vmem:[%s3577_s4 + $0x78] sm:$0xff] (!%p2377_p13)  }
 0x175   : > { %1091 = vst [vmem:[#allocation2 + $0x60] sm:$0xff] %v1059_v23  ;;  %1107 = vst [vmem:[#allocation2 + $0xe0] sm:$0xff] %v1075_v24  ;;  %v1060_v27 = vadd.f32 %v2630_v25, %v547_v19  ;;  %v1076_v28 = vadd.f32 %v2678_v26, %v563_v21  ;;  %1216 = vperm.xlu1 (!%p2377_p13), %3000, %v1154_v56   ;;  %1211 = vperm.xlu0 (!%p2377_p13), %2999, %v1153_v57   ;;  %v3014_v18 = vld [vmem:[%s3577_s4 + $0x70] sm:$0xff] (!%p2377_p13)   ;;  %v1166_v19 = vld [vmem:[%s3272_s24 + $0x98] sm:$0xff] (!%p2377_p13) }
 0x176   : > { %2787 = vmatprep.subr.bf16.mxu0 (!%p2377_p13), %v3007_v4  ;;  %2797 = vmatprep.mubr.bf16.mxu0 (!%p2377_p13), %v3017_v13  ;;  %v1165_v20 = vld [vmem:[%s3272_s24 + $0x90] sm:$0xff] (!%p2377_p13)  ;;  %v3015_v21 = vld [vmem:[%s3577_s4 + $0x38] sm:$0xff] (!%p2377_p13)   ;;  %v1168_v23 = vld [vmem:[%s3272_s24 + $0xa8] sm:$0xff] (!%p2377_p13) }
 0x177   : > { %1092 = vst [vmem:[#allocation2 + $0x68] sm:$0xff] %v1060_v27  ;;  %1108 = vst [vmem:[#allocation2 + $0xe8] sm:$0xff] %v1076_v28  ;;  %v2631_v29 = vpop.f32.mrb[28].mxu0  ;;  %v2679_v30 = vpop.f32.mrb[28].mxu1  ;;  %2738 = vmatpush3.bf16.msra.mxu1 (!%p2377_p13), %v3006_v1  ;;  %v1167_v24 = vld [vmem:[%s3272_s24 + $0xa0] sm:$0xff] (!%p2377_p13)  ;;  %v1170_v25 = vld [vmem:[%s3272_s24 + $0xb8] sm:$0xff] (!%p2377_p13) }
 0x178   : > { %v2632_v32 = vpop.f32.mrb[29].mxu0  ;;  %v2680_v34 = vpop.f32.mrb[29].mxu1  ;;  %2739 = vmatprep.subr.bf16.mxu1 (!%p2377_p13), %v3008_v5  ;;  %2788 = vmatpush3.bf16.msra.mxu0 (!%p2377_p13), %v3007_v4  ;;  %v1169_v26 = vld [vmem:[%s3272_s24 + $0xb0] sm:$0xff] (!%p2377_p13)  ;;  %v3018_v27 = vld [vmem:[%s3267_s19 + $0x8] sm:$0xff] (!%p2377_p13)   ;;  %v1115_v53 = vld [vmem:[#allocation2] sm:$0xff] (!%p2377_p13) }
 0x179   : > { %v2633_v35 = vadd.f32 %v2632_v32, %v2631_v29  ;;  %v2681_v36 = vadd.f32 %v2680_v34, %v2679_v30  ;;  %v2634_v37 = vpop.f32.mrb[30].mxu0  ;;  %v2682_v38 = vpop.f32.mrb[30].mxu1  ;;  %1114 = sbr.rel (%p2377_p13) target bundleno = 778 (0x30a), region = 90  ;;  %1226 = vperm.xlu1 (!%p2377_p13), %3000, %v1156_v60   ;;  %1221 = vperm.xlu0 (!%p2377_p13), %2999, %v1155_v63   ;;  %v3019_v28 = vld [vmem:[%s3267_s19 + $0x10] sm:$0xff] (!%p2377_p13)   ;;  %v1172_v29 = vld [vmem:[%s3272_s24 + $0xc8] sm:$0xff] (!%p2377_p13)  ;;  %v1171_v30 = vld [vmem:[%s3272_s24 + $0xc0] sm:$0xff] (!%p2377_p13) }
 0x17a   : > { %v2635_v40 = vpop.f32.mrb[31].mxu0  ;;  %v2683_v42 = vpop.f32.mrb[31].mxu1  ;;  %2789 = vmatprep.subr.bf16.mxu0 (!%p2377_p13), %v3009_v8  ;;  %v1173_v32 = vld [vmem:[%s3272_s24 + $0xd0] sm:$0xff] (!%p2377_p13)  ;;  %v3021_v34 = vld [vmem:[%s3267_s19 + $0x20] sm:$0xff] (!%p2377_p13)   ;;  %v1116_v55 = vld [vmem:[#allocation2 + $0x8] sm:$0xff] (!%p2377_p13) }
 0x17b   : > { %v1061_v43 = vadd.f32 %v2633_v35, %v548_v31  ;;  %v1077_v44 = vadd.f32 %v2681_v36, %v564_v33  ;;  %v2636_v45 = vadd.f32 %v2635_v40, %v2634_v37  ;;  %v2684_v46 = vadd.f32 %v2683_v42, %v2682_v38  ;;  %2740 = vmatpush3.bf16.msra.mxu1 (!%p2377_p13), %v3008_v5  ;;  %v1174_v31 = vld [vmem:[%s3272_s24 + $0xd8] sm:$0xff] (!%p2377_p13)  ;;  %v1176_v35 = vld [vmem:[%s3272_s24 + $0xe8] sm:$0xff] (!%p2377_p13)  ;;  %v1175_v36 = vld [vmem:[%s3272_s24 + $0xe0] sm:$0xff] (!%p2377_p13) }
 0x17c   : > { %2741 = vmatprep.subr.bf16.mxu1 (!%p2377_p13), %v3010_v9  ;;  %2790 = vmatpush3.bf16.msra.mxu0 (!%p2377_p13), %v3009_v8  ;;  %v3020_v33 = vld [vmem:[%s3267_s19 + $0x18] sm:$0xff] (!%p2377_p13)   ;;  %v1177_v38 = vld [vmem:[%s3272_s24 + $0xf0] sm:$0xff] (!%p2377_p13)  ;;  %v3025_v42 = vld [vmem:[%s3267_s19 + $0x40] sm:$0xff] (!%p2377_p13)  }
 0x17d   : > { %1093 = vst [vmem:[#allocation2 + $0x70] sm:$0xff] %v1061_v43  ;;  %1109 = vst [vmem:[#allocation2 + $0xf0] sm:$0xff] %v1077_v44  ;;  %v1062_v47 = vadd.f32 %v2636_v45, %v549_v39  ;;  %v1078_v48 = vadd.f32 %v2684_v46, %v565_v41  ;;  %1236 = vperm.xlu1 (!%p2377_p13), %3000, %v1158_v2   ;;  %1231 = vperm.xlu0 (!%p2377_p13), %2999, %v1157_v3   ;;  %v1178_v37 = vld [vmem:[%s3272_s24 + $0xf8] sm:$0xff] (!%p2377_p13)  ;;  %v3022_v39 = vld [vmem:[%s3267_s19 + $0x28] sm:$0xff] (!%p2377_p13)  }
 0x17e   : > { %2791 = vmatprep.subr.bf16.mxu0 (!%p2377_p13), %v3011_v12  ;;  %v3023_v40 = vld [vmem:[%s3267_s19 + $0x30] sm:$0xff] (!%p2377_p13)   ;;  %v3024_v41 = vld [vmem:[%s3267_s19 + $0x38] sm:$0xff] (!%p2377_p13)   ;;  %v3026_v43 = vld [vmem:[%s3267_s19 + $0x48] sm:$0xff] (!%p2377_p13)  }
 0x17f   : > { %1094 = vst [vmem:[#allocation2 + $0x78] sm:$0xff] %v1062_v47  ;;  %1110 = vst [vmem:[#allocation2 + $0xf8] sm:$0xff] %v1078_v48  ;;  %2742 = vmatpush3.bf16.msra.mxu1 (!%p2377_p13), %v3010_v9  ;;  %v3027_v44 = vld [vmem:[%s3267_s19 + $0x50] sm:$0xff] (!%p2377_p13)   ;;  %v3028_v45 = vld [vmem:[%s3267_s19 + $0x58] sm:$0xff] (!%p2377_p13)  }
 0x180   : > { %2743 = vmatprep.subr.bf16.mxu1 %v3012_v14  ;;  %2792 = vmatpush3.bf16.msra.mxu0 %v3011_v12  ;;  %v3029_v46 = vld [vmem:[%s3267_s19 + $0x60] sm:$0xff]   ;;  %v3030_v47 = vld [vmem:[%s3267_s19 + $0x68] sm:$0xff]   ;;  %v3031_v48 = vld [vmem:[%s3267_s19 + $0x70] sm:$0xff]  }
 0x181   : > { %1246 = vperm.xlu1 %3000, %v1160_v6   ;;  %1241 = vperm.xlu0 %2999, %v1159_v7   ;;  %v1120_v62 = vld [vmem:[#allocation2 + $0x28] sm:$0xff]  ;;  %v1119_v63 = vld [vmem:[#allocation2 + $0x20] sm:$0xff]  ;;  %v1122_v6 = vld [vmem:[#allocation2 + $0x38] sm:$0xff] }
 0x182   : > { %2793 = vmatprep.subr.bf16.mxu0 %v3013_v17  ;;  %v1121_v7 = vld [vmem:[#allocation2 + $0x30] sm:$0xff]  ;;  %v1124_v13 = vld [vmem:[#allocation2 + $0x48] sm:$0xff] }
 0x183   : > { %2744 = vmatpush3.bf16.msra.mxu1 %v3012_v14  ;;  %v1123_v14 = vld [vmem:[#allocation2 + $0x40] sm:$0xff] }
 0x184   : > { %2745 = vmatprep.subr.bf16.mxu1 %v3014_v18  ;;  %2794 = vmatpush3.bf16.msra.mxu0 %v3013_v17 }
 0x185   : > { %1256 = vperm.xlu1 %3000, %v1162_v10   ;;  %1251 = vperm.xlu0 %2999, %v1161_v11  }
 0x186   : > { %2795 = vmatprep.subr.bf16.mxu0 %v3015_v21 }
 0x187   : > { %2746 = vmatpush3.bf16.msra.mxu1 %v3014_v18 }
 0x188   : > { %2747 = vmatprep.subr.bf16.mxu1 %v3016_v22  ;;  %2796 = vmatpush3.bf16.msra.mxu0 %v3015_v21  ;;  %v1125_v21 = vld [vmem:[#allocation2 + $0x50] sm:$0xff] }
 0x189   : > { %1266 = vperm.xlu1 %3000, %v1164_v15   ;;  %1261 = vperm.xlu0 %2999, %v1163_v16  }
 0x18b   : > { %2748 = vmatpush3.bf16.msra.mxu1 %v3016_v22  ;;  %2798 = vmatmul.mubr.bf16.vlgmr.msra.gmra.mrb[0].mxu0 %v3018_v27  ;;  %v1128_v27 = vld [vmem:[#allocation2 + $0x68] sm:$0xff] }
 0x18c   : > { %2801 = vmatprep.mubr.bf16.mxu0 %v3019_v28  ;;  %v1127_v28 = vld [vmem:[#allocation2 + $0x60] sm:$0xff] }
 0x18d   : > { %1276 = vperm.xlu1 %3000, %v1166_v19   ;;  %1271 = vperm.xlu0 %2999, %v1165_v20   ;;  %v1126_v20 = vld [vmem:[#allocation2 + $0x58] sm:$0xff] }
 0x191   : > { %1286 = vperm.xlu1 %3000, %v1168_v23   ;;  %1281 = vperm.xlu0 %2999, %v1167_v24  }
 0x193   : > { %2802 = vmatmul.mubr.bf16.gmra.mrb[4].mxu0 %v3020_v33 }
 0x194   : > { %2805 = vmatprep.mubr.bf16.mxu0 %v3021_v34  ;;  %v1130_v34 = vld [vmem:[#allocation2 + $0x78] sm:$0xff] }
 0x195   : > { %1296 = vperm.xlu1 %3000, %v1170_v25   ;;  %1291 = vperm.xlu0 %2999, %v1169_v26  }
 0x199   : > { %1306 = vperm.xlu1 %3000, %v1172_v29   ;;  %1301 = vperm.xlu0 %2999, %v1171_v30  }
 0x19b   : > { %2806 = vmatmul.mubr.bf16.gmra.mrb[8].mxu0 %v3022_v39 }
 0x19c   : > { %2809 = vmatprep.mubr.bf16.mxu0 %v3023_v40 }
 0x19d   : > { %1316 = vperm.xlu1 %3000, %v1174_v31   ;;  %1311 = vperm.xlu0 %2999, %v1173_v32  }
 0x1a1   : > { %1326 = vperm.xlu1 %3000, %v1176_v35   ;;  %1321 = vperm.xlu0 %2999, %v1175_v36   ;;  %v1129_v35 = vld [vmem:[#allocation2 + $0x70] sm:$0xff] }
 0x1a3   : > { %2810 = vmatmul.mubr.bf16.gmra.mrb[12].mxu0 %v3024_v41  ;;  %v1132_v41 = vld [vmem:[#allocation2 + $0x88] sm:$0xff] }
 0x1a4   : > { %2813 = vmatprep.mubr.bf16.mxu0 %v3025_v42  ;;  %v1131_v42 = vld [vmem:[#allocation2 + $0x80] sm:$0xff] }
 0x1a5   : > { %1336 = vperm.xlu1 %3000, %v1178_v37   ;;  %1331 = vperm.xlu0 %2999, %v1177_v38  }
 0x1ab   : > { %2814 = vmatmul.mubr.bf16.gmra.mrb[16].mxu0 %v3026_v43 }
 0x1ac   : > { %2817 = vmatprep.mubr.bf16.mxu0 %v3027_v44 }
 0x1b3   : > { %2818 = vmatmul.mubr.bf16.gmra.mrb[20].mxu0 %v3028_v45 }
 0x1b4   : > { %2821 = vmatprep.mubr.bf16.mxu0 %v3029_v46 }
 0x1bb   : > { %2822 = vmatmul.mubr.bf16.gmra.mrb[24].mxu0 %v3030_v47 }
 0x1bc   : > { %2825 = vmatprep.mubr.bf16.mxu0 %v3031_v48  ;;  %v1134_v48 = vld [vmem:[#allocation2 + $0x98] sm:$0xff] }
 0x1c3   : > { %2826 = vmatmul.mubr.bf16.gmra.mrb[28].mxu0 %v3032_v49  ;;  %v1133_v49 = vld [vmem:[#allocation2 + $0x90] sm:$0xff] }
 0x1e8   : > { %v1192_v50 = vpop.permute.xlu1 %1191  ;;  %v1182_v51 = vpop.permute.xlu0 %1181 }
 0x1e9   : > { %v1341_v58 = vmul.f32 %v1192_v50, %v1117_v52  ;;  %v1339_v59 = vmul.f32 %v1182_v51, %v1115_v53 }
 0x1ec   : > { %v1197_v56 = vpop.permute.xlu1 %1196  ;;  %v1187_v57 = vpop.permute.xlu0 %1186 }
 0x1ed   : > { %v1342_v60 = vmul.f32 %v1197_v56, %v1118_v54  ;;  %v1340_v61 = vmul.f32 %v1187_v57, %v1116_v55  ;;  %v1136_v55 = vld [vmem:[#allocation2 + $0xa8] sm:$0xff]  ;;  %v1135_v56 = vld [vmem:[#allocation2 + $0xa0] sm:$0xff] }
 0x1ef   : > { %v1372_v0 = vpack.c.bf16 %v1342_v60, %v1341_v58  ;;  %v1371_v1 = vpack.c.bf16 %v1340_v61, %v1339_v59 }
 0x1f0   : > { %v1207_v2 = vpop.permute.xlu1 %1206  ;;  %v1202_v3 = vpop.permute.xlu0 %1201 }
 0x1f1   : > { %v1344_v4 = vmul.f32 %v1207_v2, %v1120_v62  ;;  %v1343_v5 = vmul.f32 %v1202_v3, %v1119_v63  ;;  %2749 = vmatprep.mubr.bf16.mxu1 %v1371_v1  ;;  %v1138_v62 = vld [vmem:[#allocation2 + $0xb8] sm:$0xff]  ;;  %v1137_v63 = vld [vmem:[#allocation2 + $0xb0] sm:$0xff] }
 0x1f2   : > { %2750 = vmatmul.mubr.bf16.vlgmr.msra.gmra.mrb[0].mxu1 %v1372_v0 }
 0x1f3   : > { %v1373_v8 = vpack.c.bf16 %v1344_v4, %v1343_v5  ;;  %v1140_v5 = vld [vmem:[#allocation2 + $0xc8] sm:$0xff] }
 0x1f4   : > { %v1217_v9 = vpop.permute.xlu1 %1216  ;;  %v1212_v10 = vpop.permute.xlu0 %1211 }
 0x1f5   : > { %v1346_v11 = vmul.f32 %v1217_v9, %v1122_v6  ;;  %v1345_v12 = vmul.f32 %v1212_v10, %v1121_v7  ;;  %2753 = vmatprep.mubr.bf16.mxu1 %v1373_v8  ;;  %v1139_v6 = vld [vmem:[#allocation2 + $0xc0] sm:$0xff] }
 0x1f7   : > { %v1374_v15 = vpack.c.bf16 %v1346_v11, %v1345_v12  ;;  %v1142_v12 = vld [vmem:[#allocation2 + $0xd8] sm:$0xff] }
 0x1f8   : > { %v1227_v16 = vpop.permute.xlu1 %1226  ;;  %v1222_v17 = vpop.permute.xlu0 %1221 }
 0x1f9   : > { %v1348_v18 = vmul.f32 %v1227_v16, %v1124_v13  ;;  %v1347_v19 = vmul.f32 %v1222_v17, %v1123_v14  ;;  %v1141_v13 = vld [vmem:[#allocation2 + $0xd0] sm:$0xff] }
 0x1fa   : > { %2754 = vmatmul.mubr.bf16.gmra.mrb[4].mxu1 %v1374_v15 }
 0x1fb   : > { %v1375_v22 = vpack.c.bf16 %v1348_v18, %v1347_v19  ;;  %v1144_v19 = vld [vmem:[#allocation2 + $0xe8] sm:$0xff] }
 0x1fc   : > { %v1237_v23 = vpop.permute.xlu1 %1236  ;;  %v1232_v24 = vpop.permute.xlu0 %1231 }
 0x1fd   : > { %v1350_v25 = vmul.f32 %v1237_v23, %v1126_v20  ;;  %v1349_v26 = vmul.f32 %v1232_v24, %v1125_v21  ;;  %2757 = vmatprep.mubr.bf16.mxu1 %v1375_v22  ;;  %v1143_v20 = vld [vmem:[#allocation2 + $0xe0] sm:$0xff] }
 0x1ff   : > { %v1376_v29 = vpack.c.bf16 %v1350_v25, %v1349_v26  ;;  %v1146_v26 = vld [vmem:[#allocation2 + $0xf8] sm:$0xff] }
 0x200   : > { %v1247_v30 = vpop.permute.xlu1 %1246  ;;  %v1242_v31 = vpop.permute.xlu0 %1241 }
 0x201   : > { %v1352_v32 = vmul.f32 %v1247_v30, %v1128_v27  ;;  %v1351_v33 = vmul.f32 %v1242_v31, %v1127_v28  ;;  %v1145_v27 = vld [vmem:[#allocation2 + $0xf0] sm:$0xff] }
 0x202   : > { %2758 = vmatmul.mubr.bf16.gmra.mrb[8].mxu1 %v1376_v29 }
 0x203   : > { %v1377_v36 = vpack.c.bf16 %v1352_v32, %v1351_v33 }
 0x204   : > { %v1257_v37 = vpop.permute.xlu1 %1256  ;;  %v1252_v38 = vpop.permute.xlu0 %1251 }
 0x205   : > { %v1354_v39 = vmul.f32 %v1257_v37, %v1130_v34  ;;  %v1353_v40 = vmul.f32 %v1252_v38, %v1129_v35  ;;  %2761 = vmatprep.mubr.bf16.mxu1 %v1377_v36 }
 0x207   : > { %v1378_v43 = vpack.c.bf16 %v1354_v39, %v1353_v40 }
 0x208   : > { %v1267_v44 = vpop.permute.xlu1 %1266  ;;  %v1262_v45 = vpop.permute.xlu0 %1261 }
 0x209   : > { %v1356_v46 = vmul.f32 %v1267_v44, %v1132_v41  ;;  %v1355_v47 = vmul.f32 %v1262_v45, %v1131_v42 }
 0x20a   : > { %2762 = vmatmul.mubr.bf16.gmra.mrb[12].mxu1 %v1378_v43 }
 0x20b   : > { %v1379_v50 = vpack.c.bf16 %v1356_v46, %v1355_v47 }
 0x20c   : > { %v1277_v51 = vpop.permute.xlu1 %1276  ;;  %v1272_v52 = vpop.permute.xlu0 %1271 }
 0x20d   : > { %v1358_v53 = vmul.f32 %v1277_v51, %v1134_v48  ;;  %v1357_v54 = vmul.f32 %v1272_v52, %v1133_v49  ;;  %2765 = vmatprep.mubr.bf16.mxu1 %v1379_v50 }
 0x20f   : > { %v1380_v57 = vpack.c.bf16 %v1358_v53, %v1357_v54 }
 0x210   : > { %v1287_v58 = vpop.permute.xlu1 %1286  ;;  %v1282_v59 = vpop.permute.xlu0 %1281 }
 0x211   : > { %v1360_v60 = vmul.f32 %v1287_v58, %v1136_v55  ;;  %v1359_v61 = vmul.f32 %v1282_v59, %v1135_v56 }
 0x212   : > { %2766 = vmatmul.mubr.bf16.gmra.mrb[16].mxu1 %v1380_v57 }
 0x213   : > { %v1381_v0 = vpack.c.bf16 %v1360_v60, %v1359_v61 }
 0x214   : > { %v1297_v1 = vpop.permute.xlu1 %1296  ;;  %v1292_v2 = vpop.permute.xlu0 %1291 }
 0x215   : > { %v1362_v3 = vmul.f32 %v1297_v1, %v1138_v62  ;;  %v1361_v4 = vmul.f32 %v1292_v2, %v1137_v63  ;;  %2769 = vmatprep.mubr.bf16.mxu1 %v1381_v0 }
 0x217   : > { %v1382_v7 = vpack.c.bf16 %v1362_v3, %v1361_v4  ;;  %v3478_v3 = vld [vmem:[%s3578_s5] ss:$0 sm:$0xff] }
 0x218   : > { %v1307_v8 = vpop.permute.xlu1 %1306  ;;  %v1302_v9 = vpop.permute.xlu0 %1301 }
 0x219   : > { %v1364_v10 = vmul.f32 %v1307_v8, %v1140_v5  ;;  %v1363_v11 = vmul.f32 %v1302_v9, %v1139_v6 }
 0x21a   : > { %2770 = vmatmul.mubr.bf16.gmra.mrb[20].mxu1 %v1382_v7 }
 0x21b   : > { %v1383_v14 = vpack.c.bf16 %v1364_v10, %v1363_v11 }
 0x21c   : > { %v1317_v15 = vpop.permute.xlu1 %1316  ;;  %v1312_v16 = vpop.permute.xlu0 %1311 }
 0x21d   : > { %v1366_v17 = vmul.f32 %v1317_v15, %v1142_v12  ;;  %v1365_v18 = vmul.f32 %v1312_v16, %v1141_v13  ;;  %2773 = vmatprep.mubr.bf16.mxu1 %v1383_v14 }
 0x21f   : > { %v1384_v21 = vpack.c.bf16 %v1366_v17, %v1365_v18 }
 0x220   : > { %v1327_v22 = vpop.permute.xlu1 %1326  ;;  %v1322_v23 = vpop.permute.xlu0 %1321 }
 0x221   : > { %v1368_v24 = vmul.f32 %v1327_v22, %v1144_v19  ;;  %v1367_v25 = vmul.f32 %v1322_v23, %v1143_v20 }
 0x222   : > { %2774 = vmatmul.mubr.bf16.gmra.mrb[24].mxu1 %v1384_v21 }
 0x223   : > { %v1385_v28 = vpack.c.bf16 %v1368_v24, %v1367_v25 }
 0x224   : > { %v1337_v29 = vpop.permute.xlu1 %1336  ;;  %v1332_v30 = vpop.permute.xlu0 %1331 }
 0x225   : > { %v1370_v31 = vmul.f32 %v1337_v29, %v1146_v26  ;;  %v1369_v32 = vmul.f32 %v1332_v30, %v1145_v27  ;;  %2777 = vmatprep.mubr.bf16.mxu1 %v1385_v28 }
 0x227   : > { %v1386_v33 = vpack.c.bf16 %v1370_v31, %v1369_v32 }
 0x22a   : > { %2778 = vmatmul.mubr.bf16.gmra.mrb[28].mxu1 %v1386_v33 }
 0x25e   : > { %v2799_v34 = vpop.f32.mrb[0].mxu0 }
 0x25f   : > { %v1838_v35 = vpop.f32.mrb[1].mxu0 }
 0x260   : > { %v2800_v36 = vpop.f32.mrb[2].mxu0 }
 0x261   : > { %v1841_v37 = vpop.f32.mrb[3].mxu0 }
 0x266   : > { %v2803_v38 = vpop.f32.mrb[4].mxu0 }
 0x267   : > { %v1854_v39 = vpop.f32.mrb[5].mxu0 }
 0x268   : > { %v2804_v40 = vpop.f32.mrb[6].mxu0 }
 0x269   : > { %v1857_v41 = vpop.f32.mrb[7].mxu0 }
 0x26e   : > { %v3427_v42 = vpop.f32.mrb[8].mxu0 }
 0x26f   : > { %v3429_v43 = vpop.f32.mrb[9].mxu0 }
 0x270   : > { %v3431_v44 = vpop.f32.mrb[10].mxu0 }
 0x271   : > { %v3433_v45 = vpop.f32.mrb[11].mxu0 }
 0x276   : > { %v3435_v46 = vpop.f32.mrb[12].mxu0 }
 0x277   : > { %v3437_v47 = vpop.f32.mrb[13].mxu0 }
 0x278   : > { %v3439_v48 = vpop.f32.mrb[14].mxu0 }
 0x279   : > { %v3441_v49 = vpop.f32.mrb[15].mxu0 }
 0x27e   : > { %v3443_v50 = vpop.f32.mrb[16].mxu0 }
 0x27f   : > { %v3445_v51 = vpop.f32.mrb[17].mxu0 }
 0x280   : > { %v3447_v52 = vpop.f32.mrb[18].mxu0 }
 0x281   : > { %v3449_v53 = vpop.f32.mrb[19].mxu0 }
 0x286   : > { %v3451_v54 = vpop.f32.mrb[20].mxu0 }
 0x287   : > { %v3453_v55 = vpop.f32.mrb[21].mxu0 }
 0x288   : > { %v3455_v56 = vpop.f32.mrb[22].mxu0 }
 0x289   : > { %v3457_v57 = vpop.f32.mrb[23].mxu0 }
 0x28e   : > { %v3459_v58 = vpop.f32.mrb[24].mxu0 }
 0x28f   : > { %v3461_v59 = vpop.f32.mrb[25].mxu0 }
 0x290   : > { %v3463_v60 = vpop.f32.mrb[26].mxu0 }
 0x291   : > { %v3465_v61 = vpop.f32.mrb[27].mxu0 }
 0x296   : > { %v3467_v62 = vpop.f32.mrb[28].mxu0 }
 0x297   : > { %v3469_v63 = vpop.f32.mrb[29].mxu0 }
 0x298   : > { %v3471_v0 = vpop.f32.mrb[30].mxu0 }
 0x299   : > { %v3473_v1 = vpop.f32.mrb[31].mxu0 }
 0x2c5   : > { %v2751_v2 = vpop.f32.mrb[0].mxu1 }
 0x2c6   : > { %v1847_v4 = vadd.f32 %v2799_v34, %v2751_v2  ;;  %v1533_v5 = vpop.f32.mrb[1].mxu1 }
 0x2c7   : > { %v1839_v6 = vadd.f32 %v1838_v35, %v1533_v5  ;;  %v2752_v7 = vpop.f32.mrb[2].mxu1 }
 0x2c8   : > { %v1974_v8 = vadd.f32 %v3478_v3, %v1847_v4  ;;  %v1850_v9 = vadd.f32 %v2800_v36, %v2752_v7  ;;  %v1536_v10 = vpop.f32.mrb[3].mxu1 }
 0x2c9   : > { %v1972_v11 = vadd.f32 %v3478_v3, %v1839_v6  ;;  %v1842_v12 = vadd.f32 %v1841_v37, %v1536_v10 }
 0x2ca   : > { %v1975_v13 = vadd.f32 %v3478_v3, %v1850_v9  ;;  %v2006_v15 = vmax.f32 %v1974_v8, 0.0 }
 0x2cb   : > { %v1973_v14 = vadd.f32 %v3478_v3, %v1842_v12  ;;  %v2004_v17 = vmax.f32 %v1972_v11, 0.0 }
 0x2cc   : > { %v2007_v16 = vmax.f32 %v1975_v13, 0.0 }
 0x2cd   : > { %v2005_v18 = vmax.f32 %v1973_v14, 0.0  ;;  %v2755_v19 = vpop.f32.mrb[4].mxu1 }
 0x2ce   : > { %v2486_v20 = vpack.c.bf16 %v2007_v16, %v2006_v15  ;;  %v1863_v21 = vadd.f32 %v2803_v38, %v2755_v19  ;;  %v1549_v22 = vpop.f32.mrb[5].mxu1 }
 0x2cf   : > { %v2481_v23 = vpack.c.bf16 %v2005_v18, %v2004_v17  ;;  %v1855_v24 = vadd.f32 %v1854_v39, %v1549_v22  ;;  %v2756_v25 = vpop.f32.mrb[6].mxu1 }
 0x2d0   : > { %2558 = vst [vmem:[%s3277_s0 + $0x8] sm:$0xff] %v2486_v20   ;;  %v1978_v26 = vadd.f32 %v3478_v3, %v1863_v21  ;;  %v1866_v27 = vadd.f32 %v2804_v40, %v2756_v25  ;;  %v1552_v28 = vpop.f32.mrb[7].mxu1 }
 0x2d1   : > { %2482 = vst [vmem:[%s3277_s0] sm:$0xff] %v2481_v23   ;;  %v1976_v29 = vadd.f32 %v3478_v3, %v1855_v24  ;;  %v1858_v30 = vadd.f32 %v1857_v41, %v1552_v28 }
 0x2d2   : > { %v1979_v31 = vadd.f32 %v3478_v3, %v1866_v27  ;;  %v2010_v33 = vmax.f32 %v1978_v26, 0.0 }
 0x2d3   : > { %v1977_v32 = vadd.f32 %v3478_v3, %v1858_v30  ;;  %v2008_v35 = vmax.f32 %v1976_v29, 0.0 }
 0x2d4   : > { %v2011_v34 = vmax.f32 %v1979_v31, 0.0 }
 0x2d5   : > { %v2009_v36 = vmax.f32 %v1977_v32, 0.0  ;;  %v2759_v37 = vpop.f32.mrb[8].mxu1 }
 0x2d6   : > { %v2496_v38 = vpack.c.bf16 %v2011_v34, %v2010_v33  ;;  %v1879_v39 = vadd.f32 %v3427_v42, %v2759_v37  ;;  %v1565_v40 = vpop.f32.mrb[9].mxu1 }
 0x2d7   : > { %v2491_v2 = vpack.c.bf16 %v2009_v36, %v2008_v35  ;;  %v1871_v4 = vadd.f32 %v3429_v43, %v1565_v40  ;;  %v2760_v5 = vpop.f32.mrb[10].mxu1 }
 0x2d8   : > { %2560 = vst [vmem:[%s3277_s0 + $0x18] sm:$0xff] %v2496_v38   ;;  %v1982_v41 = vadd.f32 %v3478_v3, %v1879_v39  ;;  %v1882_v6 = vadd.f32 %v3431_v44, %v2760_v5  ;;  %v1568_v7 = vpop.f32.mrb[11].mxu1 }
 0x2d9   : > { %2559 = vst [vmem:[%s3277_s0 + $0x10] sm:$0xff] %v2491_v2   ;;  %v1980_v8 = vadd.f32 %v3478_v3, %v1871_v4  ;;  %v1874_v9 = vadd.f32 %v3433_v45, %v1568_v7 }
 0x2da   : > { %v1983_v10 = vadd.f32 %v3478_v3, %v1882_v6  ;;  %v2014_v11 = vmax.f32 %v1982_v41, 0.0 }
 0x2db   : > { %v1981_v42 = vadd.f32 %v3478_v3, %v1874_v9  ;;  %v2012_v12 = vmax.f32 %v1980_v8, 0.0 }
 0x2dc   : > { %v2015_v43 = vmax.f32 %v1983_v10, 0.0 }
 0x2dd   : > { %v2013_v13 = vmax.f32 %v1981_v42, 0.0  ;;  %v2763_v14 = vpop.f32.mrb[12].mxu1 }
 0x2de   : > { %v2506_v15 = vpack.c.bf16 %v2015_v43, %v2014_v11  ;;  %v1895_v44 = vadd.f32 %v3435_v46, %v2763_v14  ;;  %v1581_v16 = vpop.f32.mrb[13].mxu1 }
 0x2df   : > { %v2501_v17 = vpack.c.bf16 %v2013_v13, %v2012_v12  ;;  %v1887_v18 = vadd.f32 %v3437_v47, %v1581_v16  ;;  %v2764_v19 = vpop.f32.mrb[14].mxu1 }
 0x2e0   : > { %2562 = vst [vmem:[%s3277_s0 + $0x28] sm:$0xff] %v2506_v15   ;;  %v1986_v45 = vadd.f32 %v3478_v3, %v1895_v44  ;;  %v1898_v20 = vadd.f32 %v3439_v48, %v2764_v19  ;;  %v1584_v21 = vpop.f32.mrb[15].mxu1 }
 0x2e1   : > { %2561 = vst [vmem:[%s3277_s0 + $0x20] sm:$0xff] %v2501_v17   ;;  %v1984_v22 = vadd.f32 %v3478_v3, %v1887_v18  ;;  %v1890_v23 = vadd.f32 %v3441_v49, %v1584_v21 }
 0x2e2   : > { %v1987_v24 = vadd.f32 %v3478_v3, %v1898_v20  ;;  %v2018_v25 = vmax.f32 %v1986_v45, 0.0 }
 0x2e3   : > { %v1985_v46 = vadd.f32 %v3478_v3, %v1890_v23  ;;  %v2016_v26 = vmax.f32 %v1984_v22, 0.0 }
 0x2e4   : > { %v2019_v47 = vmax.f32 %v1987_v24, 0.0 }
 0x2e5   : > { %v2017_v27 = vmax.f32 %v1985_v46, 0.0  ;;  %v2767_v28 = vpop.f32.mrb[16].mxu1 }
 0x2e6   : > { %v2516_v29 = vpack.c.bf16 %v2019_v47, %v2018_v25  ;;  %v1911_v48 = vadd.f32 %v3443_v50, %v2767_v28  ;;  %v1597_v30 = vpop.f32.mrb[17].mxu1 }
 0x2e7   : > { %v2511_v31 = vpack.c.bf16 %v2017_v27, %v2016_v26  ;;  %v1903_v32 = vadd.f32 %v3445_v51, %v1597_v30  ;;  %v2768_v33 = vpop.f32.mrb[18].mxu1 }
 0x2e8   : > { %2564 = vst [vmem:[%s3277_s0 + $0x38] sm:$0xff] %v2516_v29   ;;  %v1990_v49 = vadd.f32 %v3478_v3, %v1911_v48  ;;  %v1914_v34 = vadd.f32 %v3447_v52, %v2768_v33  ;;  %v1600_v35 = vpop.f32.mrb[19].mxu1 }
 0x2e9   : > { %2563 = vst [vmem:[%s3277_s0 + $0x30] sm:$0xff] %v2511_v31   ;;  %v1988_v36 = vadd.f32 %v3478_v3, %v1903_v32  ;;  %v1906_v37 = vadd.f32 %v3449_v53, %v1600_v35 }
 0x2ea   : > { %v1991_v38 = vadd.f32 %v3478_v3, %v1914_v34  ;;  %v2022_v39 = vmax.f32 %v1990_v49, 0.0 }
 0x2eb   : > { %v1989_v50 = vadd.f32 %v3478_v3, %v1906_v37  ;;  %v2020_v40 = vmax.f32 %v1988_v36, 0.0 }
 0x2ec   : > { %v2023_v51 = vmax.f32 %v1991_v38, 0.0 }
 0x2ed   : > { %v2021_v2 = vmax.f32 %v1989_v50, 0.0  ;;  %v2771_v4 = vpop.f32.mrb[20].mxu1 }
 0x2ee   : > { %v2526_v5 = vpack.c.bf16 %v2023_v51, %v2022_v39  ;;  %v1927_v52 = vadd.f32 %v3451_v54, %v2771_v4  ;;  %v1613_v41 = vpop.f32.mrb[21].mxu1 }
 0x2ef   : > { %v2521_v6 = vpack.c.bf16 %v2021_v2, %v2020_v40  ;;  %v1919_v7 = vadd.f32 %v3453_v55, %v1613_v41  ;;  %v2772_v8 = vpop.f32.mrb[22].mxu1 }
 0x2f0   : > { %2566 = vst [vmem:[%s3277_s0 + $0x48] sm:$0xff] %v2526_v5   ;;  %v1994_v53 = vadd.f32 %v3478_v3, %v1927_v52  ;;  %v1930_v9 = vadd.f32 %v3455_v56, %v2772_v8  ;;  %v1616_v10 = vpop.f32.mrb[23].mxu1 }
 0x2f1   : > { %2565 = vst [vmem:[%s3277_s0 + $0x40] sm:$0xff] %v2521_v6   ;;  %v1992_v42 = vadd.f32 %v3478_v3, %v1919_v7  ;;  %v1922_v11 = vadd.f32 %v3457_v57, %v1616_v10 }
 0x2f2   : > { %v1995_v43 = vadd.f32 %v3478_v3, %v1930_v9  ;;  %v2026_v12 = vmax.f32 %v1994_v53, 0.0 }
 0x2f3   : > { %v1993_v54 = vadd.f32 %v3478_v3, %v1922_v11  ;;  %v2024_v13 = vmax.f32 %v1992_v42, 0.0 }
 0x2f4   : > { %v2027_v55 = vmax.f32 %v1995_v43, 0.0 }
 0x2f5   : > { %v2025_v14 = vmax.f32 %v1993_v54, 0.0  ;;  %v2775_v15 = vpop.f32.mrb[24].mxu1 }
 0x2f6   : > { %v2536_v44 = vpack.c.bf16 %v2027_v55, %v2026_v12  ;;  %v1943_v56 = vadd.f32 %v3459_v58, %v2775_v15  ;;  %v1629_v16 = vpop.f32.mrb[25].mxu1 }
 0x2f7   : > { %v2531_v17 = vpack.c.bf16 %v2025_v14, %v2024_v13  ;;  %v1935_v18 = vadd.f32 %v3461_v59, %v1629_v16  ;;  %v2776_v19 = vpop.f32.mrb[26].mxu1 }
 0x2f8   : > { %2568 = vst [vmem:[%s3277_s0 + $0x58] sm:$0xff] %v2536_v44   ;;  %v1998_v57 = vadd.f32 %v3478_v3, %v1943_v56  ;;  %v1946_v45 = vadd.f32 %v3463_v60, %v2776_v19  ;;  %v1632_v20 = vpop.f32.mrb[27].mxu1 }
 0x2f9   : > { %2567 = vst [vmem:[%s3277_s0 + $0x50] sm:$0xff] %v2531_v17   ;;  %v1996_v21 = vadd.f32 %v3478_v3, %v1935_v18  ;;  %v1938_v22 = vadd.f32 %v3465_v61, %v1632_v20 }
 0x2fa   : > { %v1999_v23 = vadd.f32 %v3478_v3, %v1946_v45  ;;  %v2030_v24 = vmax.f32 %v1998_v57, 0.0 }
 0x2fb   : > { %v1997_v58 = vadd.f32 %v3478_v3, %v1938_v22  ;;  %v2028_v46 = vmax.f32 %v1996_v21, 0.0 }
 0x2fc   : > { %v2031_v59 = vmax.f32 %v1999_v23, 0.0 }
 0x2fd   : > { %v2029_v25 = vmax.f32 %v1997_v58, 0.0  ;;  %v2779_v47 = vpop.f32.mrb[28].mxu1 }
 0x2fe   : > { %v2546_v26 = vpack.c.bf16 %v2031_v59, %v2030_v24  ;;  %v1959_v60 = vadd.f32 %v3467_v62, %v2779_v47  ;;  %v1645_v27 = vpop.f32.mrb[29].mxu1 }
 0x2ff   : > { %v2541_v28 = vpack.c.bf16 %v2029_v25, %v2028_v46  ;;  %v1951_v29 = vadd.f32 %v3469_v63, %v1645_v27  ;;  %v2780_v48 = vpop.f32.mrb[30].mxu1 }
 0x300   : > { %2570 = vst [vmem:[%s3277_s0 + $0x68] sm:$0xff] %v2546_v26   ;;  %v2002_v61 = vadd.f32 %v3478_v3, %v1959_v60  ;;  %v1962_v30 = vadd.f32 %v3471_v0, %v2780_v48  ;;  %v1648_v31 = vpop.f32.mrb[31].mxu1 }
 0x301   : > { %2569 = vst [vmem:[%s3277_s0 + $0x60] sm:$0xff] %v2541_v28   ;;  %v2000_v32 = vadd.f32 %v3478_v3, %v1951_v29  ;;  %v1954_v33 = vadd.f32 %v3473_v1, %v1648_v31 }
 0x302   : > { %v2003_v62 = vadd.f32 %v3478_v3, %v1962_v30  ;;  %v2034_v34 = vmax.f32 %v2002_v61, 0.0 }
 0x303   : > { %v2001_v49 = vadd.f32 %v3478_v3, %v1954_v33  ;;  %v2032_v35 = vmax.f32 %v2000_v32, 0.0 }
 0x304   : > { %v2035_v63 = vmax.f32 %v2003_v62, 0.0 }
 0x305   : > { %v2033_v36 = vmax.f32 %v2001_v49, 0.0 }
 0x306   : > { %v2556_v37 = vpack.c.bf16 %v2035_v63, %v2034_v34 }
 0x307   : > { %v2551_v38 = vpack.c.bf16 %v2033_v36, %v2032_v35 }
 0x308   : > { %2572 = vst [vmem:[%s3277_s0 + $0x78] sm:$0xff] %v2556_v37  }
 0x309   : > { %2571 = vst [vmem:[%s3277_s0 + $0x70] sm:$0xff] %v2551_v38  }
 0x30a PF: > { %s16_s27 = sadd.s32 1, %s3087_s27   ;;  %s3582_s21 = smov %s3067_s22 }
 0x30b   : > { %p13_p0 = scmp.ge.s32.totalorder %s16_s27, 6   ;;  %s3583_s22 = smov %s3177_s10 }
 0x30c   : > { %s3584_s23 = smov %s3079_s25  ;;  %s3585_s24 = smov %s3083_s26 }
 0x30d   : > { %s3586_s25 = smov %s3589_s28  ;;  %s3587_s26 = smov %s3593_s29 }
 0x30e   :  { %15 = sbr.rel (!%p13_p0) target bundleno = 6 (0x6), region = 134 }

// kernel: sage_forward_pallas.3
= control target key start
LH: loop header
LB: loop body
LE: loop exit
PB: predicated region body
PF: predicated region fallthrough
CT: control target
= control target key end

     0   :  { %s3495_s0 = inlined_call_operand.hbm [shape: bf16[512,512], index: 0, kind: input, shape index: {}]   ;;  %s3496_s1 = inlined_call_operand.vmem [shape: bf16[512,128], index: 1, kind: input, shape index: {}, may-alias: {1,2}]   ;;  %s3497_s2 = inlined_call_operand.vmem [shape: bf16[512,128], index: 2, kind: input, shape index: {}, may-alias: {1,2}]   ;;  %s3498_s3 = inlined_call_operand.vmem [shape: f32[512,1], index: 3, kind: input, shape index: {}]   ;;  %s3499_s4 = inlined_call_operand.vmem [shape: bf16[256,128], index: 4, kind: input, shape index: {}]   ;;  %s3500_s5 = inlined_call_operand.vmem [shape: f32[1,128], index: 5, kind: input, shape index: {}]   ;;  %s3501_s6 = inlined_call_operand.vmem [shape: bf16[512,128], index: 6, kind: output, shape index: {}]  }
   0x1   :  { %3504 = sst [smem:[#allocation7_spill]] %s3499_s4 }
   0x2   :  { %3505 = sst [smem:[#allocation8_spill]] %s3500_s5 }
   0x3   :  { %11 = vsyncpa [#allocation4], 0 }
   0x4   :  { %13 = vsyncpa [#allocation4 + $0x1], 0  ;;  %s3056_s21 = smov 0   ;;  %s3058_s22 = smov 0  }
   0x5   :  { %s3060_s23 = smov 0   ;;  %s3062_s24 = smov 0  }
   0x6   :  { %s3064_s25 = smov 0   ;;  %s3066_s26 = smov 0  }
   0x7   :  { %s3068_s27 = smov 0   ;;  %s3070_s28 = smov 0  }
   0x8 LB: > { %s2175_s29 = sadd.s32 4294967295, %s3013_s28   ;;  %s28_s30 = sadd.s32 1, %s3005_s26  ;;  %s3013_s28 = sphi %s3070_s28, %s19_s28   ;;  %s3009_s27 = sphi %s3068_s27, %s3519_s27   ;;  %s3005_s26 = sphi %s3066_s26, %s3518_s26   ;;  %s3001_s25 = sphi %s3064_s25, %s3517_s25   ;;  %s2997_s24 = sphi %s3062_s24, %s3516_s24   ;;  %s2993_s23 = sphi %s3060_s23, %s3515_s23   ;;  %s2989_s22 = sphi %s3058_s22, %s3514_s22   ;;  %s2985_s21 = sphi %s3056_s21, %s3513_s21  }
   0x9   : > { %p29_p0 = scmp.ge.s32.totalorder %s28_s30, 2  ;;  %s31_s7 = sadd.s32 1, %s3009_s27 }
   0xa   : > { %s40_s8 = sadd.s32 1, %s2993_s23  ;;  %p47_p1 = scmp.ne.s32.totalorder %s2993_s23, %s2989_s22 }
   0xb   : > { %s3521_s30 = smov (%p29_p0, %s28_s30), 0  ;;  %s3523_s7 = smov (!%p29_p0, %s31_s7), %s3009_s27 }
   0xc   : > { %3506 = sst [smem:[#allocation6_spill]] %s3521_s30  ;;  %s36_s9 = ssub.s32 %s3005_s26, %s3521_s30 }
   0xd   : > { %p48_p2 = scmp.eq.s32.totalorder %s3013_s28, 0  ;;  %p33_p3 = scmp.ge.s32.totalorder %s3523_s7, 2 }
   0xe   : > { %p53_p4 = scmp.ne.s32.totalorder %s2989_s22, %s2985_s21  ;;  %p54_p6 = scmp.eq.s32.totalorder %s2175_s29, 0 }
   0xf   : > { %p3107_p5 = por %p48_p2, %p47_p1  ;;  %s3525_s7 = smov (%p33_p3, %s3523_s7), 0 }
  0x10   : > { %p3113_p7 = por %p54_p6, %p53_p4  ;;  %s35_s12 = ssub.s32 %s3009_s27, %s3525_s7 }
  0x11   : > { %p2749_p8 = scmp.lt.s32.totalorder %s3013_s28, 4  ;;  %s37_s13 = sor.u32 %s36_s9, %s35_s12 }
  0x12   : > { %s229_s14 = sand.u32 1, %s2993_s23   ;;  %p38_p9 = scmp.eq.s32.totalorder %s37_s13, 0 }
  0x13   : > { %s2179_s15 = sshll.u32 %s229_s14, 8  ;;  %s2181_s16 = sshll.u32 %s3005_s26, 1 }
  0x14   : > { %s3123_s17 = scalar_select %p38_p9, %s2993_s23, %s40_s8  }
  0x15   : > { %s2311_s18 = sshll.u32 %s3009_s27, 7  ;;  %s233_s20 = scalar_lea.vmem [#allocation3], %s2179_s15 }
  0x16   : > { %s240_s19 = sadd.s32 %s2311_s18, %s2181_s16  ;;  %s243_s21 = sshll.u32 %s233_s20, 4  ;;  %s3126_s21 = int_to_ptr.vmem [resolvable:$true] %s243_s21 }
  0x17   : > { %s2183_s29 = sshll.u32 %s240_s19, 6  ;;  %p3137_p10 = pnand %p2749_p8, %p3107_p5 }
  0x18   : > { %s3131_s4 = scalar_lea.hbm %s3495_s0, %s2183_s29  ;;  %s3141_s9 = scalar_lea.sflag [#allocation4], %s229_s14 }
  0x19   : > { %s2917_s12 = scalar_lea.hbm %s3131_s4, 4096  ;;  %p2919_p12 = pneg %p3137_p10 }
  0x1a   : > { %p2918_p11 = scmp.ne.s32.totalorder %s3131_s4, %s2917_s12  ;;  %s2922_s10 = scalar_lea.hbm %s3495_s0, 16384 }
  0x1b   : > { %p2923_p1 = scmp.lt.u32.totalorder %s3131_s4, %s3495_s0  ;;  %p2924_p2 = scmp.lt.u32.totalorder %s2922_s10, %s2917_s12 }
  0x1c   : > { %p2920_p13 = pnand %p2919_p12, %p2918_p11  ;;  %p2926_p4 = scmp.lt.u32.totalorder %s2917_s12, %s3131_s4 }
  0x1d   : > { %p2925_p3 = por %p2924_p2, %p2923_p1 }
  0x1e   : > { %p2921_p0 = pneg %p2920_p13 }
  0x1f   : > { %p2927_p5 = por %p2926_p4, %p2925_p3 }
  0x21   : > { %p2928_p6 = pnand %p2927_p5, %p2921_p0 }
  0x23   : > { %2931 = shalt.err (!%p2928_p6)
}
  0x24   : > { %s2932_s14 = scalar_lea.vmem %s3126_s21, 4096  ;;  %s3015_s16 = smov [#allocation3]  }
  0x25   : > { %p2933_p8 = scmp.ne.s32.totalorder %s3126_s21, %s2932_s14  ;;  %s2937_s18 = sshll.u32 %s3015_s16, 4  ;;  %s2938_s18 = int_to_ptr.vmem [resolvable:$false] %s2937_s18 }
  0x26   : > { %s2939_s19 = scalar_lea.vmem %s2938_s18, 8192  ;;  %p2940_p13 = scmp.lt.s32.totalorder %s3126_s21, %s2938_s18 }
  0x27   : > { %p2935_p9 = pnand %p2933_p8, %p2919_p12  ;;  %p2941_p1 = scmp.lt.s32.totalorder %s2939_s19, %s2932_s14 }
  0x29   : > { %p2936_p11 = pneg %p2935_p9  ;;  %p2942_p2 = por %p2941_p1, %p2940_p13 }
  0x2b   : > { %p2943_p3 = pnand %p2942_p2, %p2936_p11 }
  0x2d   : > { %2946 = shalt.err (!%p2943_p3)
}
  0x2e   : > { %s3016_s20 = smov 256   ;;  %s3017_s29 = smov 128  }
  0x2f   : > { %s3018_s12 = smov 8   ;;  %p2184_p12 = scmp.ge.s32.totalorder %s3013_s28, 1 }
  0x30   : > { %2748 = dma.hbm_to_vmem [thread:$0]  (!%p3137_p10), %s3131_s4, 4096, %s3126_s21, %s3141_s9, %s3016_s20, %s3017_s29, %s3018_s12  }
  0x31   : > { %p278_p0 = scmp.lt.s32.totalorder %s3013_s28, 5 }
  0x33   : > { %p279_p4 = pnand %p2184_p12, %p278_p0 }
  0x34   : > { %s284_s5 = sand.u32 (!%p279_p4), 1, %s2989_s22  }
  0x35   : > { %282 = sbr.rel (%p279_p4) target bundleno = 785 (0x311), region = 44  ;;  %s2185_s30 = sshll.u32 (!%p279_p4), %s284_s5, 8 }
  0x36   : > { %s285_s10 = scalar_lea.sflag (!%p279_p4), [#allocation4], %s284_s5  ;;  %s3172_s13 = scalar_lea.vmem (!%p279_p4), [#allocation3], %s2185_s30 }
  0x3c   : > { %2980 = dma.done.wait (%p3113_p7), %s285_s10, 4096  }
  0x3d   : > { %2982 = vsyncadd (%p3113_p7), %s285_s10, 4294963200  ;;  %s2186_s8 = sshll.u32 %s2997_s24, 5  ;;  %s2188_s4 = sshll.u32 %s3001_s25, 5 }
  0x3e   : > { %p335_p10 = scmp.lt.s32.totalorder %s2186_s8, 63  ;;  %p341_p5 = scmp.lt.s32.totalorder %s2188_s4, 63 }
  0x3f   : > { %p2194_p7 = scmp.ne.s32.totalorder %s2997_s24, 0 }
  0x40   : > { %s3527_s8 = smov (!%p335_p10, %s2186_s8), 63  ;;  %s3529_s4 = smov (!%p341_p5, %s2188_s4), 63 }
  0x41   : > { %s2187_s21 = sshll.u32 %s3527_s8, 2  ;;  %s2189_s16 = sshll.u32 %s3529_s4, 2  ;;  %v3019_v0 = vmov (!%p2194_p7), 0.0  }
  0x42   : > { %s3183_s14 = scalar_lea.vmem %s3496_s1, %s2187_s21  ;;  %s3188_s11 = scalar_lea.vmem %s3497_s2, %s2189_s16  ;;  %363 = vst [vmem:[#allocation2] sm:$0xff] (!%p2194_p7), %v3019_v0  ;;  %364 = vst [vmem:[#allocation2 + $0x8] sm:$0xff] (!%p2194_p7), %v3019_v0 }
  0x43   : > { %s2191_s20 = sshll.u32 %s3529_s4, 3  ;;  %s3198_s10 = scalar_lea.vmem %s3501_s6, %s2189_s16  ;;  %365 = vst [vmem:[#allocation2 + $0x10] sm:$0xff] (!%p2194_p7), %v3019_v0  ;;  %366 = vst [vmem:[#allocation2 + $0x18] sm:$0xff] (!%p2194_p7), %v3019_v0 }
  0x44   : > { %s3193_s25 = scalar_lea.vmem %s3498_s3, %s2191_s20  ;;  %362 = sbr.rel (%p2194_p7) target bundleno = 82 (0x52), region = 52  ;;  %367 = vst [vmem:[#allocation2 + $0x20] sm:$0xff] (!%p2194_p7), %v3019_v0  ;;  %368 = vst [vmem:[#allocation2 + $0x28] sm:$0xff] (!%p2194_p7), %v3019_v0 }
  0x45   : > { %369 = vst [vmem:[#allocation2 + $0x30] sm:$0xff] (!%p2194_p7), %v3019_v0  ;;  %370 = vst [vmem:[#allocation2 + $0x38] sm:$0xff] (!%p2194_p7), %v3019_v0 }
  0x46   : > { %371 = vst [vmem:[#allocation2 + $0x40] sm:$0xff] (!%p2194_p7), %v3019_v0  ;;  %372 = vst [vmem:[#allocation2 + $0x48] sm:$0xff] (!%p2194_p7), %v3019_v0 }
  0x47   : > { %373 = vst [vmem:[#allocation2 + $0x50] sm:$0xff] (!%p2194_p7), %v3019_v0  ;;  %374 = vst [vmem:[#allocation2 + $0x58] sm:$0xff] (!%p2194_p7), %v3019_v0 }
  0x48   : > { %375 = vst [vmem:[#allocation2 + $0x60] sm:$0xff] (!%p2194_p7), %v3019_v0  ;;  %376 = vst [vmem:[#allocation2 + $0x68] sm:$0xff] (!%p2194_p7), %v3019_v0 }
  0x49   : > { %377 = vst [vmem:[#allocation2 + $0x70] sm:$0xff] (!%p2194_p7), %v3019_v0  ;;  %378 = vst [vmem:[#allocation2 + $0x78] sm:$0xff] (!%p2194_p7), %v3019_v0 }
  0x4a   : > { %379 = vst [vmem:[#allocation2 + $0x80] sm:$0xff] (!%p2194_p7), %v3019_v0  ;;  %380 = vst [vmem:[#allocation2 + $0x88] sm:$0xff] (!%p2194_p7), %v3019_v0 }
  0x4b   : > { %381 = vst [vmem:[#allocation2 + $0x90] sm:$0xff] %v3019_v0  ;;  %382 = vst [vmem:[#allocation2 + $0x98] sm:$0xff] %v3019_v0 }
  0x4c   : > { %383 = vst [vmem:[#allocation2 + $0xa0] sm:$0xff] %v3019_v0  ;;  %384 = vst [vmem:[#allocation2 + $0xa8] sm:$0xff] %v3019_v0 }
  0x4d   : > { %385 = vst [vmem:[#allocation2 + $0xb0] sm:$0xff] %v3019_v0  ;;  %386 = vst [vmem:[#allocation2 + $0xb8] sm:$0xff] %v3019_v0 }
  0x4e   : > { %387 = vst [vmem:[#allocation2 + $0xc0] sm:$0xff] %v3019_v0  ;;  %388 = vst [vmem:[#allocation2 + $0xc8] sm:$0xff] %v3019_v0 }
  0x4f   : > { %389 = vst [vmem:[#allocation2 + $0xd0] sm:$0xff] %v3019_v0  ;;  %390 = vst [vmem:[#allocation2 + $0xd8] sm:$0xff] %v3019_v0 }
  0x50   : > { %391 = vst [vmem:[#allocation2 + $0xe0] sm:$0xff] %v3019_v0  ;;  %392 = vst [vmem:[#allocation2 + $0xe8] sm:$0xff] %v3019_v0 }
  0x51   : > { %393 = vst [vmem:[#allocation2 + $0xf0] sm:$0xff] %v3019_v0  ;;  %394 = vst [vmem:[#allocation2 + $0xf8] sm:$0xff] %v3019_v0 }
  0x52 PF: > { %v2819_v1 = vld [vmem:[%s3183_s14 + $0x40] sm:$0xff]   ;;  %v2821_v3 = vld [vmem:[%s3183_s14 + $0x48] sm:$0xff]   ;;  %v2823_v5 = vld [vmem:[%s3183_s14 + $0x50] sm:$0xff]   ;;  %p2243_p6 = scmp.ne.s32.totalorder %s2997_s24, 1 }
  0x53   : > { %v2820_v2 = vld [vmem:[%s3183_s14] sm:$0xff]   ;;  %2439 = vmatprep.subr.bf16.mxu0 %v2819_v1  ;;  %2695 = vmatprep.subr.bf16.mxu1 %v2819_v1  ;;  %v2822_v4 = vld [vmem:[%s3183_s14 + $0x8] sm:$0xff]   ;;  %v2824_v6 = vld [vmem:[%s3183_s14 + $0x10] sm:$0xff]   ;;  %s3510_s8 = sld [smem:[#allocation7_spill]] (!%p2243_p6)  ;;  %s3511_s4 = sld [smem:[#allocation8_spill]] (!%p2243_p6) }
  0x54   : > { %2440 = vmatpush3.bf16.msra.mxu0 %v2820_v2  ;;  %2703 = vmatpush3.bf16.msra.mxu1 %v2820_v2  ;;  %v2825_v7 = vld [vmem:[%s3183_s14 + $0x58] sm:$0xff]   ;;  %v2827_v9 = vld [vmem:[%s3183_s14 + $0x60] sm:$0xff]   ;;  %v2829_v11 = vld [vmem:[%s3183_s14 + $0x68] sm:$0xff]  }
  0x55   : > { %2441 = vmatprep.subr.bf16.mxu0 %v2821_v3  ;;  %2696 = vmatprep.subr.bf16.mxu1 %v2821_v3  ;;  %v2826_v8 = vld [vmem:[%s3183_s14 + $0x18] sm:$0xff]   ;;  %v2828_v10 = vld [vmem:[%s3183_s14 + $0x20] sm:$0xff]   ;;  %v2830_v14 = vld [vmem:[%s3183_s14 + $0x28] sm:$0xff]  }
  0x56   : > { %v2837_v12 = vld [vmem:[%s3172_s13 + $0x4] ss:$8 sps:$4 sm:$0xff]   ;;  %v2831_v15 = vld [vmem:[%s3183_s14 + $0x70] sm:$0xff]   ;;  %v2833_v17 = vld [vmem:[%s3183_s14 + $0x78] sm:$0xff]  }
  0x57   : > { %v2840_v13 = vld [vmem:[%s3172_s13 + $0x84] ss:$8 sps:$4 sm:$0xff]   ;;  %779 = vmatprep.mubr.bf16.mxu0 %v2837_v12  ;;  %v2832_v16 = vld [vmem:[%s3183_s14 + $0x30] sm:$0xff]   ;;  %v2834_v18 = vld [vmem:[%s3183_s14 + $0x38] sm:$0xff]  }
  0x58   : > { %2442 = vmatpush3.bf16.msra.mxu0 %v2822_v4  ;;  %2704 = vmatpush3.bf16.msra.mxu1 %v2822_v4  ;;  %v2835_v19 = vld [vmem:[%s3172_s13] ss:$8 sps:$4 sm:$0xff]   ;;  %v2841_v21 = vld [vmem:[%s3172_s13 + $0x14] ss:$8 sps:$4 sm:$0xff]   ;;  %v2845_v23 = vld [vmem:[%s3172_s13 + $0x10] ss:$8 sps:$4 sm:$0xff]  }
  0x59   : > { %2443 = vmatprep.subr.bf16.mxu0 %v2823_v5  ;;  %2697 = vmatprep.subr.bf16.mxu1 %v2823_v5  ;;  %v2838_v20 = vld [vmem:[%s3172_s13 + $0x80] ss:$8 sps:$4 sm:$0xff]   ;;  %v2843_v22 = vld [vmem:[%s3172_s13 + $0x94] ss:$8 sps:$4 sm:$0xff]   ;;  %v2846_v24 = vld [vmem:[%s3172_s13 + $0x90] ss:$8 sps:$4 sm:$0xff]  }
  0x5a   : > { %843 = vmatprep.mubr.bf16.mxu1 %v2840_v13  ;;  %v2847_v25 = vld [vmem:[%s3172_s13 + $0x24] ss:$8 sps:$4 sm:$0xff]   ;;  %v2851_v27 = vld [vmem:[%s3172_s13 + $0x20] ss:$8 sps:$4 sm:$0xff]   ;;  %v2853_v29 = vld [vmem:[%s3172_s13 + $0x34] ss:$8 sps:$4 sm:$0xff]  }
  0x5b   : > { %v2849_v26 = vld [vmem:[%s3172_s13 + $0xa4] ss:$8 sps:$4 sm:$0xff]   ;;  %v2852_v28 = vld [vmem:[%s3172_s13 + $0xa0] ss:$8 sps:$4 sm:$0xff]   ;;  %v2855_v30 = vld [vmem:[%s3172_s13 + $0xb4] ss:$8 sps:$4 sm:$0xff]  }
  0x5c   : > { %2444 = vmatpush3.bf16.msra.mxu0 %v2824_v6  ;;  %2705 = vmatpush3.bf16.msra.mxu1 %v2824_v6  ;;  %v2857_v31 = vld [vmem:[%s3172_s13 + $0x30] ss:$8 sps:$4 sm:$0xff]   ;;  %v2859_v33 = vld [vmem:[%s3172_s13 + $0x44] ss:$8 sps:$4 sm:$0xff]   ;;  %v2863_v35 = vld [vmem:[%s3172_s13 + $0x40] ss:$8 sps:$4 sm:$0xff]  }
  0x5d   : > { %2445 = vmatprep.subr.bf16.mxu0 %v2825_v7  ;;  %2698 = vmatprep.subr.bf16.mxu1 %v2825_v7  ;;  %v2858_v32 = vld [vmem:[%s3172_s13 + $0xb0] ss:$8 sps:$4 sm:$0xff]   ;;  %v2861_v34 = vld [vmem:[%s3172_s13 + $0xc4] ss:$8 sps:$4 sm:$0xff]   ;;  %v2864_v36 = vld [vmem:[%s3172_s13 + $0xc0] ss:$8 sps:$4 sm:$0xff]  }
  0x5e   : > { %v2865_v37 = vld [vmem:[%s3172_s13 + $0x54] ss:$8 sps:$4 sm:$0xff]   ;;  %v2869_v39 = vld [vmem:[%s3172_s13 + $0x50] ss:$8 sps:$4 sm:$0xff]   ;;  %v2871_v41 = vld [vmem:[%s3172_s13 + $0x64] ss:$8 sps:$4 sm:$0xff]  }
  0x5f   : > { %v2867_v38 = vld [vmem:[%s3172_s13 + $0xd4] ss:$8 sps:$4 sm:$0xff]   ;;  %v2870_v40 = vld [vmem:[%s3172_s13 + $0xd0] ss:$8 sps:$4 sm:$0xff]   ;;  %v2873_v42 = vld [vmem:[%s3172_s13 + $0xe4] ss:$8 sps:$4 sm:$0xff]  }
  0x60   : > { %2446 = vmatpush3.bf16.msra.mxu0 %v2826_v8  ;;  %2706 = vmatpush3.bf16.msra.mxu1 %v2826_v8  ;;  %v2875_v43 = vld [vmem:[%s3172_s13 + $0x60] ss:$8 sps:$4 sm:$0xff]   ;;  %v2877_v45 = vld [vmem:[%s3172_s13 + $0x74] ss:$8 sps:$4 sm:$0xff]   ;;  %v2881_v47 = vld [vmem:[%s3172_s13 + $0x70] ss:$8 sps:$4 sm:$0xff]  }
  0x61   : > { %2447 = vmatprep.subr.bf16.mxu0 %v2827_v9  ;;  %2699 = vmatprep.subr.bf16.mxu1 %v2827_v9  ;;  %v2876_v44 = vld [vmem:[%s3172_s13 + $0xe0] ss:$8 sps:$4 sm:$0xff]   ;;  %v2879_v46 = vld [vmem:[%s3172_s13 + $0xf4] ss:$8 sps:$4 sm:$0xff]   ;;  %v2882_v48 = vld [vmem:[%s3172_s13 + $0xf0] ss:$8 sps:$4 sm:$0xff]  }
  0x62   : > { %v395_v51 = vld [vmem:[#allocation2] sm:$0xff]  ;;  %v396_v59 = vld [vmem:[#allocation2 + $0x8] sm:$0xff]  ;;  %v397_v7 = vld [vmem:[#allocation2 + $0x10] sm:$0xff] }
  0x63   : > { %v411_v53 = vld [vmem:[#allocation2 + $0x80] sm:$0xff]  ;;  %v412_v61 = vld [vmem:[#allocation2 + $0x88] sm:$0xff]  ;;  %v413_v9 = vld [vmem:[#allocation2 + $0x90] sm:$0xff] }
  0x64   : > { %2448 = vmatpush3.bf16.msra.mxu0 %v2828_v10  ;;  %2707 = vmatpush3.bf16.msra.mxu1 %v2828_v10 }
  0x65   : > { %2449 = vmatprep.subr.bf16.mxu0 %v2829_v11  ;;  %2700 = vmatprep.subr.bf16.mxu1 %v2829_v11 }
  0x68   : > { %2450 = vmatpush3.bf16.msra.mxu0 %v2830_v14  ;;  %2708 = vmatpush3.bf16.msra.mxu1 %v2830_v14 }
  0x69   : > { %2451 = vmatprep.subr.bf16.mxu0 %v2831_v15  ;;  %2701 = vmatprep.subr.bf16.mxu1 %v2831_v15  ;;  %v398_v15 = vld [vmem:[#allocation2 + $0x18] sm:$0xff] }
  0x6c   : > { %2452 = vmatpush3.bf16.msra.mxu0 %v2832_v16  ;;  %2709 = vmatpush3.bf16.msra.mxu1 %v2832_v16 }
  0x6d   : > { %2453 = vmatprep.subr.bf16.mxu0 %v2833_v17  ;;  %2702 = vmatprep.subr.bf16.mxu1 %v2833_v17  ;;  %v414_v17 = vld [vmem:[#allocation2 + $0x98] sm:$0xff] }
  0x70   : > { %2454 = vmatpush3.bf16.msra.mxu0 %v2834_v18  ;;  %2710 = vmatpush3.bf16.msra.mxu1 %v2834_v18 }
  0x73   : > { %780 = vmatmul.mubr.bf16.vlgmr.msra.gmra.mrb[0].mxu0 %v2835_v19  ;;  %844 = vmatmul.mubr.bf16.vlgmr.msra.gmra.mrb[0].mxu1 %v2838_v20 }
  0x74   : > { %787 = vmatprep.mubr.bf16.mxu0 %v2841_v21  ;;  %851 = vmatprep.mubr.bf16.mxu1 %v2843_v22 }
  0x7b   : > { %788 = vmatmul.mubr.bf16.gmra.mrb[4].mxu0 %v2845_v23  ;;  %852 = vmatmul.mubr.bf16.gmra.mrb[4].mxu1 %v2846_v24 }
  0x7c   : > { %795 = vmatprep.mubr.bf16.mxu0 %v2847_v25  ;;  %859 = vmatprep.mubr.bf16.mxu1 %v2849_v26 }
  0x83   : > { %796 = vmatmul.mubr.bf16.gmra.mrb[8].mxu0 %v2851_v27  ;;  %860 = vmatmul.mubr.bf16.gmra.mrb[8].mxu1 %v2852_v28  ;;  %v399_v27 = vld [vmem:[#allocation2 + $0x20] sm:$0xff] }
  0x84   : > { %803 = vmatprep.mubr.bf16.mxu0 %v2853_v29  ;;  %867 = vmatprep.mubr.bf16.mxu1 %v2855_v30  ;;  %v415_v29 = vld [vmem:[#allocation2 + $0xa0] sm:$0xff] }
  0x8b   : > { %804 = vmatmul.mubr.bf16.gmra.mrb[12].mxu0 %v2857_v31  ;;  %868 = vmatmul.mubr.bf16.gmra.mrb[12].mxu1 %v2858_v32 }
  0x8c   : > { %811 = vmatprep.mubr.bf16.mxu0 %v2859_v33  ;;  %875 = vmatprep.mubr.bf16.mxu1 %v2861_v34 }
  0x93   : > { %812 = vmatmul.mubr.bf16.gmra.mrb[16].mxu0 %v2863_v35  ;;  %876 = vmatmul.mubr.bf16.gmra.mrb[16].mxu1 %v2864_v36  ;;  %v400_v35 = vld [vmem:[#allocation2 + $0x28] sm:$0xff] }
  0x94   : > { %819 = vmatprep.mubr.bf16.mxu0 %v2865_v37  ;;  %883 = vmatprep.mubr.bf16.mxu1 %v2867_v38  ;;  %v416_v37 = vld [vmem:[#allocation2 + $0xa8] sm:$0xff] }
  0x9b   : > { %820 = vmatmul.mubr.bf16.gmra.mrb[20].mxu0 %v2869_v39  ;;  %884 = vmatmul.mubr.bf16.gmra.mrb[20].mxu1 %v2870_v40 }
  0x9c   : > { %827 = vmatprep.mubr.bf16.mxu0 %v2871_v41  ;;  %891 = vmatprep.mubr.bf16.mxu1 %v2873_v42 }
  0xa3   : > { %828 = vmatmul.mubr.bf16.gmra.mrb[24].mxu0 %v2875_v43  ;;  %892 = vmatmul.mubr.bf16.gmra.mrb[24].mxu1 %v2876_v44 }
  0xa4   : > { %835 = vmatprep.mubr.bf16.mxu0 %v2877_v45  ;;  %899 = vmatprep.mubr.bf16.mxu1 %v2879_v46 }
  0xab   : > { %836 = vmatmul.mubr.bf16.gmra.mrb[28].mxu0 %v2881_v47  ;;  %900 = vmatmul.mubr.bf16.gmra.mrb[28].mxu1 %v2882_v48  ;;  %v401_v47 = vld [vmem:[#allocation2 + $0x30] sm:$0xff] }
 0x146   : > { %v2455_v49 = vpop.f32.mrb[0].mxu0  ;;  %v2503_v50 = vpop.f32.mrb[0].mxu1 }
 0x147   : > { %v2456_v52 = vpop.f32.mrb[1].mxu0  ;;  %v2504_v54 = vpop.f32.mrb[1].mxu1 }
 0x148   : > { %v2457_v55 = vadd.f32 %v2456_v52, %v2455_v49  ;;  %v2505_v56 = vadd.f32 %v2504_v54, %v2503_v50  ;;  %v2458_v57 = vpop.f32.mrb[2].mxu0  ;;  %v2506_v58 = vpop.f32.mrb[2].mxu1  ;;  %v417_v49 = vld [vmem:[#allocation2 + $0xb0] sm:$0xff] }
 0x149   : > { %v2459_v60 = vpop.f32.mrb[3].mxu0  ;;  %v2507_v62 = vpop.f32.mrb[3].mxu1 }
 0x14a   : > { %v908_v63 = vadd.f32 %v2457_v55, %v395_v51  ;;  %v924_v0 = vadd.f32 %v2505_v56, %v411_v53  ;;  %v2460_v1 = vadd.f32 %v2459_v60, %v2458_v57  ;;  %v2508_v2 = vadd.f32 %v2507_v62, %v2506_v58  ;;  %v402_v55 = vld [vmem:[#allocation2 + $0x38] sm:$0xff] }
 0x14b   : > { %v418_v57 = vld [vmem:[#allocation2 + $0xb8] sm:$0xff] }
 0x14c   : > { %940 = vst [vmem:[#allocation2] sm:$0xff] %v908_v63  ;;  %956 = vst [vmem:[#allocation2 + $0x80] sm:$0xff] %v924_v0  ;;  %v909_v3 = vadd.f32 %v2460_v1, %v396_v59  ;;  %v925_v4 = vadd.f32 %v2508_v2, %v412_v61 }
 0x14e   : > { %941 = vst [vmem:[#allocation2 + $0x8] sm:$0xff] %v909_v3  ;;  %957 = vst [vmem:[#allocation2 + $0x88] sm:$0xff] %v925_v4  ;;  %v2461_v5 = vpop.f32.mrb[4].mxu0  ;;  %v2509_v6 = vpop.f32.mrb[4].mxu1  ;;  %v403_v3 = vld [vmem:[#allocation2 + $0x40] sm:$0xff] }
 0x14f   : > { %v2462_v8 = vpop.f32.mrb[5].mxu0  ;;  %v2510_v10 = vpop.f32.mrb[5].mxu1 }
 0x150   : > { %v2463_v11 = vadd.f32 %v2462_v8, %v2461_v5  ;;  %v2511_v12 = vadd.f32 %v2510_v10, %v2509_v6  ;;  %v2464_v13 = vpop.f32.mrb[6].mxu0  ;;  %v2512_v14 = vpop.f32.mrb[6].mxu1  ;;  %v419_v5 = vld [vmem:[#allocation2 + $0xc0] sm:$0xff] }
 0x151   : > { %v2465_v16 = vpop.f32.mrb[7].mxu0  ;;  %v2513_v18 = vpop.f32.mrb[7].mxu1 }
 0x152   : > { %v910_v19 = vadd.f32 %v2463_v11, %v397_v7  ;;  %v926_v20 = vadd.f32 %v2511_v12, %v413_v9  ;;  %v2466_v21 = vadd.f32 %v2465_v16, %v2464_v13  ;;  %v2514_v22 = vadd.f32 %v2513_v18, %v2512_v14  ;;  %v404_v11 = vld [vmem:[#allocation2 + $0x48] sm:$0xff] }
 0x153   : > { %v420_v13 = vld [vmem:[#allocation2 + $0xc8] sm:$0xff] }
 0x154   : > { %942 = vst [vmem:[#allocation2 + $0x10] sm:$0xff] %v910_v19  ;;  %958 = vst [vmem:[#allocation2 + $0x90] sm:$0xff] %v926_v20  ;;  %v911_v23 = vadd.f32 %v2466_v21, %v398_v15  ;;  %v927_v24 = vadd.f32 %v2514_v22, %v414_v17 }
 0x156   : > { %943 = vst [vmem:[#allocation2 + $0x18] sm:$0xff] %v911_v23  ;;  %959 = vst [vmem:[#allocation2 + $0x98] sm:$0xff] %v927_v24  ;;  %v2467_v25 = vpop.f32.mrb[8].mxu0  ;;  %v2515_v26 = vpop.f32.mrb[8].mxu1  ;;  %v405_v23 = vld [vmem:[#allocation2 + $0x50] sm:$0xff] }
 0x157   : > { %v2468_v28 = vpop.f32.mrb[9].mxu0  ;;  %v2516_v30 = vpop.f32.mrb[9].mxu1 }
 0x158   : > { %v2469_v31 = vadd.f32 %v2468_v28, %v2467_v25  ;;  %v2517_v32 = vadd.f32 %v2516_v30, %v2515_v26  ;;  %v2470_v33 = vpop.f32.mrb[10].mxu0  ;;  %v2518_v34 = vpop.f32.mrb[10].mxu1  ;;  %v421_v25 = vld [vmem:[#allocation2 + $0xd0] sm:$0xff] }
 0x159   : > { %v2471_v36 = vpop.f32.mrb[11].mxu0  ;;  %v2519_v38 = vpop.f32.mrb[11].mxu1 }
 0x15a   : > { %v912_v39 = vadd.f32 %v2469_v31, %v399_v27  ;;  %v928_v40 = vadd.f32 %v2517_v32, %v415_v29  ;;  %v2472_v41 = vadd.f32 %v2471_v36, %v2470_v33  ;;  %v2520_v42 = vadd.f32 %v2519_v38, %v2518_v34  ;;  %v406_v31 = vld [vmem:[#allocation2 + $0x58] sm:$0xff] }
 0x15b   : > { %v422_v33 = vld [vmem:[#allocation2 + $0xd8] sm:$0xff] }
 0x15c   : > { %944 = vst [vmem:[#allocation2 + $0x20] sm:$0xff] %v912_v39  ;;  %960 = vst [vmem:[#allocation2 + $0xa0] sm:$0xff] %v928_v40  ;;  %v913_v43 = vadd.f32 %v2472_v41, %v400_v35  ;;  %v929_v44 = vadd.f32 %v2520_v42, %v416_v37 }
 0x15e   : > { %945 = vst [vmem:[#allocation2 + $0x28] sm:$0xff] %v913_v43  ;;  %961 = vst [vmem:[#allocation2 + $0xa8] sm:$0xff] %v929_v44  ;;  %v2473_v45 = vpop.f32.mrb[12].mxu0  ;;  %v2521_v46 = vpop.f32.mrb[12].mxu1  ;;  %v407_v43 = vld [vmem:[#allocation2 + $0x60] sm:$0xff] }
 0x15f   : > { %v2474_v48 = vpop.f32.mrb[13].mxu0  ;;  %v2522_v50 = vpop.f32.mrb[13].mxu1 }
 0x160   : > { %v2475_v51 = vadd.f32 %v2474_v48, %v2473_v45  ;;  %v2523_v52 = vadd.f32 %v2522_v50, %v2521_v46  ;;  %v2476_v53 = vpop.f32.mrb[14].mxu0  ;;  %v2524_v54 = vpop.f32.mrb[14].mxu1  ;;  %v423_v45 = vld [vmem:[#allocation2 + $0xe0] sm:$0xff] }
 0x161   : > { %v2477_v56 = vpop.f32.mrb[15].mxu0  ;;  %v2525_v58 = vpop.f32.mrb[15].mxu1 }
 0x162   : > { %v914_v59 = vadd.f32 %v2475_v51, %v401_v47  ;;  %v930_v60 = vadd.f32 %v2523_v52, %v417_v49  ;;  %v2478_v61 = vadd.f32 %v2477_v56, %v2476_v53  ;;  %v2526_v62 = vadd.f32 %v2525_v58, %v2524_v54  ;;  %v408_v51 = vld [vmem:[#allocation2 + $0x68] sm:$0xff] }
 0x163   : > { %v424_v53 = vld [vmem:[#allocation2 + $0xe8] sm:$0xff] }
 0x164   : > { %946 = vst [vmem:[#allocation2 + $0x30] sm:$0xff] %v914_v59  ;;  %962 = vst [vmem:[#allocation2 + $0xb0] sm:$0xff] %v930_v60  ;;  %v915_v63 = vadd.f32 %v2478_v61, %v402_v55  ;;  %v931_v0 = vadd.f32 %v2526_v62, %v418_v57 }
 0x166   : > { %947 = vst [vmem:[#allocation2 + $0x38] sm:$0xff] %v915_v63  ;;  %963 = vst [vmem:[#allocation2 + $0xb8] sm:$0xff] %v931_v0  ;;  %v2479_v1 = vpop.f32.mrb[16].mxu0  ;;  %v2527_v2 = vpop.f32.mrb[16].mxu1  ;;  %v409_v63 = vld [vmem:[#allocation2 + $0x70] sm:$0xff] }
 0x167   : > { %v2480_v4 = vpop.f32.mrb[17].mxu0  ;;  %v2528_v6 = vpop.f32.mrb[17].mxu1 }
 0x168   : > { %v2481_v7 = vadd.f32 %v2480_v4, %v2479_v1  ;;  %v2529_v8 = vadd.f32 %v2528_v6, %v2527_v2  ;;  %v2482_v9 = vpop.f32.mrb[18].mxu0  ;;  %v2530_v10 = vpop.f32.mrb[18].mxu1  ;;  %v425_v1 = vld [vmem:[#allocation2 + $0xf0] sm:$0xff] }
 0x169   : > { %v2483_v12 = vpop.f32.mrb[19].mxu0  ;;  %v2531_v14 = vpop.f32.mrb[19].mxu1 }
 0x16a   : > { %v916_v15 = vadd.f32 %v2481_v7, %v403_v3  ;;  %v932_v16 = vadd.f32 %v2529_v8, %v419_v5  ;;  %v2484_v17 = vadd.f32 %v2483_v12, %v2482_v9  ;;  %v2532_v18 = vadd.f32 %v2531_v14, %v2530_v10  ;;  %v410_v7 = vld [vmem:[#allocation2 + $0x78] sm:$0xff] }
 0x16b   : > { %v426_v9 = vld [vmem:[#allocation2 + $0xf8] sm:$0xff] }
 0x16c   : > { %948 = vst [vmem:[#allocation2 + $0x40] sm:$0xff] %v916_v15  ;;  %964 = vst [vmem:[#allocation2 + $0xc0] sm:$0xff] %v932_v16  ;;  %v917_v19 = vadd.f32 %v2484_v17, %v404_v11  ;;  %v933_v20 = vadd.f32 %v2532_v18, %v420_v13  ;;  %v1010_v17 = vld [vmem:[%s3193_s25 + $0x10] sm:$0xff] (!%p2243_p6)  ;;  %v1008_v18 = vld [vmem:[%s3193_s25] sm:$0xff] (!%p2243_p6) }
 0x16e   : > { %949 = vst [vmem:[#allocation2 + $0x48] sm:$0xff] %v917_v19  ;;  %965 = vst [vmem:[#allocation2 + $0xc8] sm:$0xff] %v933_v20  ;;  %v2485_v21 = vpop.f32.mrb[20].mxu0  ;;  %v2533_v22 = vpop.f32.mrb[20].mxu1  ;;  %v3020_v19 = vmov (!%p2243_p6), 0   ;;  %v1011_v20 = vld [vmem:[%s3193_s25 + $0x18] sm:$0xff] (!%p2243_p6) }
 0x16f   : > { %v2486_v24 = vpop.f32.mrb[21].mxu0  ;;  %v2534_v26 = vpop.f32.mrb[21].mxu1  ;;  %2884 = vset.pattern.permute.xlu1 (!%p2243_p6), %v3020_v19  ;;  %2883 = vset.pattern.permute.xlu0 (!%p2243_p6), %v3020_v19 }
 0x170   : > { %v2487_v27 = vadd.f32 %v2486_v24, %v2485_v21  ;;  %v2535_v28 = vadd.f32 %v2534_v26, %v2533_v22  ;;  %v2488_v29 = vpop.f32.mrb[22].mxu0  ;;  %v2536_v30 = vpop.f32.mrb[22].mxu1  ;;  %1052 = vperm.xlu1 (!%p2243_p6), %2884, %v1010_v17   ;;  %1042 = vperm.xlu0 (!%p2243_p6), %2883, %v1008_v18   ;;  %v1009_v21 = vld [vmem:[%s3193_s25 + $0x8] sm:$0xff] (!%p2243_p6)  ;;  %v1015_v24 = vld [vmem:[%s3193_s25 + $0x38] sm:$0xff] (!%p2243_p6)  ;;  %v2885_v26 = vld [vmem:[%s3510_s8] sm:$0xff] (!%p2243_p6)  }
 0x171   : > { %v2489_v32 = vpop.f32.mrb[23].mxu0  ;;  %v2537_v34 = vpop.f32.mrb[23].mxu1  ;;  %v1013_v22 = vld [vmem:[%s3193_s25 + $0x28] sm:$0xff] (!%p2243_p6)  ;;  %2647 = vmatprep.subr.bf16.mxu0 (!%p2243_p6), %v2885_v26  ;;  %v2916_v17 = vld [vmem:[%s3188_s11 + $0x78] sm:$0xff] (!%p2243_p6)  }
 0x172   : > { %v918_v35 = vadd.f32 %v2487_v27, %v405_v23  ;;  %v934_v36 = vadd.f32 %v2535_v28, %v421_v25  ;;  %v2490_v37 = vadd.f32 %v2489_v32, %v2488_v29  ;;  %v2538_v38 = vadd.f32 %v2537_v34, %v2536_v30  ;;  %v1012_v23 = vld [vmem:[%s3193_s25 + $0x20] sm:$0xff] (!%p2243_p6)  ;;  %v1014_v25 = vld [vmem:[%s3193_s25 + $0x30] sm:$0xff] (!%p2243_p6)  ;;  %v1017_v28 = vld [vmem:[%s3193_s25 + $0x48] sm:$0xff] (!%p2243_p6)  ;;  %2648 = vmatpush3.bf16.msra.mxu0 (!%p2243_p6), %v2885_v26 }
 0x173   : > { %v2886_v27 = vld [vmem:[%s3510_s8 + $0x40] sm:$0xff] (!%p2243_p6)   ;;  %v2887_v29 = vld [vmem:[%s3510_s8 + $0x8] sm:$0xff] (!%p2243_p6)   ;;  %v2889_v32 = vld [vmem:[%s3510_s8 + $0x10] sm:$0xff] (!%p2243_p6)  }
 0x174   : > { %950 = vst [vmem:[#allocation2 + $0x50] sm:$0xff] %v918_v35  ;;  %966 = vst [vmem:[#allocation2 + $0xd0] sm:$0xff] %v934_v36  ;;  %v919_v39 = vadd.f32 %v2490_v37, %v406_v31  ;;  %v935_v40 = vadd.f32 %v2538_v38, %v422_v33  ;;  %1057 = vperm.xlu1 (!%p2243_p6), %2884, %v1011_v20   ;;  %1047 = vperm.xlu0 (!%p2243_p6), %2883, %v1009_v21   ;;  %v2888_v30 = vld [vmem:[%s3510_s8 + $0x48] sm:$0xff] (!%p2243_p6)   ;;  %v1016_v31 = vld [vmem:[%s3193_s25 + $0x40] sm:$0xff] (!%p2243_p6) }
 0x175   : > { %2599 = vmatprep.subr.bf16.mxu1 (!%p2243_p6), %v2886_v27  ;;  %2649 = vmatprep.subr.bf16.mxu0 (!%p2243_p6), %v2887_v29  ;;  %v2890_v33 = vld [vmem:[%s3510_s8 + $0x50] sm:$0xff] (!%p2243_p6)   ;;  %v1019_v34 = vld [vmem:[%s3193_s25 + $0x58] sm:$0xff] (!%p2243_p6)  ;;  %v1021_v38 = vld [vmem:[%s3193_s25 + $0x68] sm:$0xff] (!%p2243_p6) }
 0x176   : > { %951 = vst [vmem:[#allocation2 + $0x58] sm:$0xff] %v919_v39  ;;  %967 = vst [vmem:[#allocation2 + $0xd8] sm:$0xff] %v935_v40  ;;  %v2491_v41 = vpop.f32.mrb[24].mxu0  ;;  %v2539_v42 = vpop.f32.mrb[24].mxu1  ;;  %2600 = vmatpush3.bf16.msra.mxu1 (!%p2243_p6), %v2886_v27  ;;  %v1018_v35 = vld [vmem:[%s3193_s25 + $0x50] sm:$0xff] (!%p2243_p6)  ;;  %2650 = vmatpush3.bf16.msra.mxu0 (!%p2243_p6), %v2887_v29  ;;  %v2891_v36 = vld [vmem:[%s3510_s8 + $0x18] sm:$0xff] (!%p2243_p6)  }
 0x177   : > { %v2492_v44 = vpop.f32.mrb[25].mxu0  ;;  %v2540_v46 = vpop.f32.mrb[25].mxu1  ;;  %2601 = vmatprep.subr.bf16.mxu1 (!%p2243_p6), %v2888_v30  ;;  %2651 = vmatprep.subr.bf16.mxu0 (!%p2243_p6), %v2889_v32  ;;  %v2892_v37 = vld [vmem:[%s3510_s8 + $0x58] sm:$0xff] (!%p2243_p6)   ;;  %v1020_v39 = vld [vmem:[%s3193_s25 + $0x60] sm:$0xff] (!%p2243_p6)  ;;  %v978_v20 = vld [vmem:[#allocation2 + $0x10] sm:$0xff] (!%p2243_p6) }
 0x178   : > { %v2493_v47 = vadd.f32 %v2492_v44, %v2491_v41  ;;  %v2541_v48 = vadd.f32 %v2540_v46, %v2539_v42  ;;  %v2494_v49 = vpop.f32.mrb[26].mxu0  ;;  %v2542_v50 = vpop.f32.mrb[26].mxu1  ;;  %1067 = vperm.xlu1 (!%p2243_p6), %2884, %v1013_v22   ;;  %1062 = vperm.xlu0 (!%p2243_p6), %2883, %v1012_v23   ;;  %v2893_v40 = vld [vmem:[%s3510_s8 + $0x20] sm:$0xff] (!%p2243_p6)   ;;  %v1023_v42 = vld [vmem:[%s3193_s25 + $0x78] sm:$0xff] (!%p2243_p6)  ;;  %v2895_v44 = vld [vmem:[%s3510_s8 + $0x28] sm:$0xff] (!%p2243_p6)  }
 0x179   : > { %v2495_v52 = vpop.f32.mrb[27].mxu0  ;;  %v2543_v54 = vpop.f32.mrb[27].mxu1  ;;  %v2894_v41 = vld [vmem:[%s3510_s8 + $0x60] sm:$0xff] (!%p2243_p6)   ;;  %v2896_v46 = vld [vmem:[%s3510_s8 + $0x68] sm:$0xff] (!%p2243_p6)   ;;  %v979_v22 = vld [vmem:[#allocation2 + $0x18] sm:$0xff] (!%p2243_p6) }
 0x17a   : > { %v920_v55 = vadd.f32 %v2493_v47, %v407_v43  ;;  %v936_v56 = vadd.f32 %v2541_v48, %v423_v45  ;;  %v2496_v57 = vadd.f32 %v2495_v52, %v2494_v49  ;;  %v2544_v58 = vadd.f32 %v2543_v54, %v2542_v50  ;;  %2602 = vmatpush3.bf16.msra.mxu1 (!%p2243_p6), %v2888_v30  ;;  %v1022_v43 = vld [vmem:[%s3193_s25 + $0x70] sm:$0xff] (!%p2243_p6)  ;;  %v2901_v45 = vld [vmem:[%s3188_s11] sm:$0xff] (!%p2243_p6)   ;;  %v1025_v47 = vld [vmem:[%s3193_s25 + $0x88] sm:$0xff] (!%p2243_p6) }
 0x17b   : > { %2603 = vmatprep.subr.bf16.mxu1 (!%p2243_p6), %v2890_v33  ;;  %2652 = vmatpush3.bf16.msra.mxu0 (!%p2243_p6), %v2889_v32  ;;  %v1024_v48 = vld [vmem:[%s3193_s25 + $0x80] sm:$0xff] (!%p2243_p6)  ;;  %v2897_v49 = vld [vmem:[%s3510_s8 + $0x30] sm:$0xff] (!%p2243_p6)   ;;  %v2900_v54 = vld [vmem:[%s3510_s8 + $0x78] sm:$0xff] (!%p2243_p6)  }
 0x17c   : > { %952 = vst [vmem:[#allocation2 + $0x60] sm:$0xff] %v920_v55  ;;  %968 = vst [vmem:[#allocation2 + $0xe0] sm:$0xff] %v936_v56  ;;  %v921_v59 = vadd.f32 %v2496_v57, %v408_v51  ;;  %v937_v60 = vadd.f32 %v2544_v58, %v424_v53  ;;  %1077 = vperm.xlu1 (!%p2243_p6), %2884, %v1015_v24   ;;  %1072 = vperm.xlu0 (!%p2243_p6), %2883, %v1014_v25   ;;  %v2898_v50 = vld [vmem:[%s3510_s8 + $0x70] sm:$0xff] (!%p2243_p6)   ;;  %v1027_v51 = vld [vmem:[%s3193_s25 + $0x98] sm:$0xff] (!%p2243_p6) }
 0x17d   : > { %2653 = vmatprep.subr.bf16.mxu0 (!%p2243_p6), %v2891_v36  ;;  %2663 = vmatprep.mubr.bf16.mxu0 (!%p2243_p6), %v2901_v45  ;;  %v1026_v52 = vld [vmem:[%s3193_s25 + $0x90] sm:$0xff] (!%p2243_p6)  ;;  %v2899_v53 = vld [vmem:[%s3510_s8 + $0x38] sm:$0xff] (!%p2243_p6)   ;;  %v1029_v55 = vld [vmem:[%s3193_s25 + $0xa8] sm:$0xff] (!%p2243_p6) }
 0x17e   : > { %953 = vst [vmem:[#allocation2 + $0x68] sm:$0xff] %v921_v59  ;;  %969 = vst [vmem:[#allocation2 + $0xe8] sm:$0xff] %v937_v60  ;;  %v2497_v61 = vpop.f32.mrb[28].mxu0  ;;  %v2545_v62 = vpop.f32.mrb[28].mxu1  ;;  %2604 = vmatpush3.bf16.msra.mxu1 (!%p2243_p6), %v2890_v33  ;;  %v1028_v56 = vld [vmem:[%s3193_s25 + $0xa0] sm:$0xff] (!%p2243_p6)  ;;  %v1031_v57 = vld [vmem:[%s3193_s25 + $0xb8] sm:$0xff] (!%p2243_p6) }
 0x17f   : > { %v2498_v0 = vpop.f32.mrb[29].mxu0  ;;  %v2546_v2 = vpop.f32.mrb[29].mxu1  ;;  %2605 = vmatprep.subr.bf16.mxu1 (!%p2243_p6), %v2892_v37  ;;  %2654 = vmatpush3.bf16.msra.mxu0 (!%p2243_p6), %v2891_v36  ;;  %v1030_v58 = vld [vmem:[%s3193_s25 + $0xb0] sm:$0xff] (!%p2243_p6)  ;;  %v2902_v59 = vld [vmem:[%s3188_s11 + $0x8] sm:$0xff] (!%p2243_p6)   ;;  %v976_v21 = vld [vmem:[#allocation2] sm:$0xff] (!%p2243_p6) }
 0x180   : > { %v2499_v3 = vadd.f32 %v2498_v0, %v2497_v61  ;;  %v2547_v4 = vadd.f32 %v2546_v2, %v2545_v62  ;;  %v2500_v5 = vpop.f32.mrb[30].mxu0  ;;  %v2548_v6 = vpop.f32.mrb[30].mxu1  ;;  %975 = sbr.rel (%p2243_p6) target bundleno = 785 (0x311), region = 56  ;;  %1087 = vperm.xlu1 (!%p2243_p6), %2884, %v1017_v28   ;;  %1082 = vperm.xlu0 (!%p2243_p6), %2883, %v1016_v31   ;;  %v2903_v60 = vld [vmem:[%s3188_s11 + $0x10] sm:$0xff] (!%p2243_p6)   ;;  %v1033_v61 = vld [vmem:[%s3193_s25 + $0xc8] sm:$0xff] (!%p2243_p6)  ;;  %v1032_v62 = vld [vmem:[%s3193_s25 + $0xc0] sm:$0xff] (!%p2243_p6) }
 0x181   : > { %v2501_v8 = vpop.f32.mrb[31].mxu0  ;;  %v2549_v10 = vpop.f32.mrb[31].mxu1  ;;  %2655 = vmatprep.subr.bf16.mxu0 (!%p2243_p6), %v2893_v40  ;;  %v1034_v0 = vld [vmem:[%s3193_s25 + $0xd0] sm:$0xff] (!%p2243_p6)  ;;  %v2905_v2 = vld [vmem:[%s3188_s11 + $0x20] sm:$0xff] (!%p2243_p6)   ;;  %v977_v23 = vld [vmem:[#allocation2 + $0x8] sm:$0xff] (!%p2243_p6) }
 0x182   : > { %v922_v11 = vadd.f32 %v2499_v3, %v409_v63  ;;  %v938_v12 = vadd.f32 %v2547_v4, %v425_v1  ;;  %v2502_v13 = vadd.f32 %v2501_v8, %v2500_v5  ;;  %v2550_v14 = vadd.f32 %v2549_v10, %v2548_v6  ;;  %2606 = vmatpush3.bf16.msra.mxu1 (!%p2243_p6), %v2892_v37  ;;  %v1035_v63 = vld [vmem:[%s3193_s25 + $0xd8] sm:$0xff] (!%p2243_p6)  ;;  %v1037_v3 = vld [vmem:[%s3193_s25 + $0xe8] sm:$0xff] (!%p2243_p6)  ;;  %v1036_v4 = vld [vmem:[%s3193_s25 + $0xe0] sm:$0xff] (!%p2243_p6) }
 0x183   : > { %2607 = vmatprep.subr.bf16.mxu1 (!%p2243_p6), %v2894_v41  ;;  %2656 = vmatpush3.bf16.msra.mxu0 (!%p2243_p6), %v2893_v40  ;;  %v2904_v1 = vld [vmem:[%s3188_s11 + $0x18] sm:$0xff] (!%p2243_p6)   ;;  %v1038_v6 = vld [vmem:[%s3193_s25 + $0xf0] sm:$0xff] (!%p2243_p6)  ;;  %v2909_v10 = vld [vmem:[%s3188_s11 + $0x40] sm:$0xff] (!%p2243_p6)  }
 0x184   : > { %954 = vst [vmem:[#allocation2 + $0x70] sm:$0xff] %v922_v11  ;;  %970 = vst [vmem:[#allocation2 + $0xf0] sm:$0xff] %v938_v12  ;;  %v923_v15 = vadd.f32 %v2502_v13, %v410_v7  ;;  %v939_v16 = vadd.f32 %v2550_v14, %v426_v9  ;;  %1097 = vperm.xlu1 (!%p2243_p6), %2884, %v1019_v34   ;;  %1092 = vperm.xlu0 (!%p2243_p6), %2883, %v1018_v35   ;;  %v1039_v5 = vld [vmem:[%s3193_s25 + $0xf8] sm:$0xff] (!%p2243_p6)  ;;  %v2906_v7 = vld [vmem:[%s3188_s11 + $0x28] sm:$0xff] (!%p2243_p6)  }
 0x185   : > { %2657 = vmatprep.subr.bf16.mxu0 (!%p2243_p6), %v2895_v44  ;;  %v2907_v8 = vld [vmem:[%s3188_s11 + $0x30] sm:$0xff] (!%p2243_p6)   ;;  %v2908_v9 = vld [vmem:[%s3188_s11 + $0x38] sm:$0xff] (!%p2243_p6)   ;;  %v2910_v11 = vld [vmem:[%s3188_s11 + $0x48] sm:$0xff] (!%p2243_p6)  }
 0x186   : > { %955 = vst [vmem:[#allocation2 + $0x78] sm:$0xff] %v923_v15  ;;  %971 = vst [vmem:[#allocation2 + $0xf8] sm:$0xff] %v939_v16  ;;  %2608 = vmatpush3.bf16.msra.mxu1 (!%p2243_p6), %v2894_v41  ;;  %v2911_v12 = vld [vmem:[%s3188_s11 + $0x50] sm:$0xff] (!%p2243_p6)   ;;  %v2912_v13 = vld [vmem:[%s3188_s11 + $0x58] sm:$0xff] (!%p2243_p6)  }
 0x187   : > { %2609 = vmatprep.subr.bf16.mxu1 %v2896_v46  ;;  %2658 = vmatpush3.bf16.msra.mxu0 %v2895_v44  ;;  %v2913_v14 = vld [vmem:[%s3188_s11 + $0x60] sm:$0xff]   ;;  %v2914_v15 = vld [vmem:[%s3188_s11 + $0x68] sm:$0xff]   ;;  %v2915_v16 = vld [vmem:[%s3188_s11 + $0x70] sm:$0xff]  }
 0x188   : > { %1107 = vperm.xlu1 %2884, %v1021_v38   ;;  %1102 = vperm.xlu0 %2883, %v1020_v39   ;;  %v981_v30 = vld [vmem:[#allocation2 + $0x28] sm:$0xff]  ;;  %v980_v31 = vld [vmem:[#allocation2 + $0x20] sm:$0xff]  ;;  %v983_v38 = vld [vmem:[#allocation2 + $0x38] sm:$0xff] }
 0x189   : > { %2659 = vmatprep.subr.bf16.mxu0 %v2897_v49  ;;  %v982_v39 = vld [vmem:[#allocation2 + $0x30] sm:$0xff]  ;;  %v985_v45 = vld [vmem:[#allocation2 + $0x48] sm:$0xff] }
 0x18a   : > { %2610 = vmatpush3.bf16.msra.mxu1 %v2896_v46  ;;  %v984_v46 = vld [vmem:[#allocation2 + $0x40] sm:$0xff] }
 0x18b   : > { %2611 = vmatprep.subr.bf16.mxu1 %v2898_v50  ;;  %2660 = vmatpush3.bf16.msra.mxu0 %v2897_v49 }
 0x18c   : > { %1117 = vperm.xlu1 %2884, %v1023_v42   ;;  %1112 = vperm.xlu0 %2883, %v1022_v43  }
 0x18d   : > { %2661 = vmatprep.subr.bf16.mxu0 %v2899_v53 }
 0x18e   : > { %2612 = vmatpush3.bf16.msra.mxu1 %v2898_v50 }
 0x18f   : > { %2613 = vmatprep.subr.bf16.mxu1 %v2900_v54  ;;  %2662 = vmatpush3.bf16.msra.mxu0 %v2899_v53  ;;  %v986_v53 = vld [vmem:[#allocation2 + $0x50] sm:$0xff] }
 0x190   : > { %1127 = vperm.xlu1 %2884, %v1025_v47   ;;  %1122 = vperm.xlu0 %2883, %v1024_v48  }
 0x192   : > { %2614 = vmatpush3.bf16.msra.mxu1 %v2900_v54  ;;  %2664 = vmatmul.mubr.bf16.vlgmr.msra.gmra.mrb[0].mxu0 %v2902_v59  ;;  %v989_v59 = vld [vmem:[#allocation2 + $0x68] sm:$0xff] }
 0x193   : > { %2667 = vmatprep.mubr.bf16.mxu0 %v2903_v60  ;;  %v988_v60 = vld [vmem:[#allocation2 + $0x60] sm:$0xff] }
 0x194   : > { %1137 = vperm.xlu1 %2884, %v1027_v51   ;;  %1132 = vperm.xlu0 %2883, %v1026_v52   ;;  %v987_v52 = vld [vmem:[#allocation2 + $0x58] sm:$0xff] }
 0x198   : > { %1147 = vperm.xlu1 %2884, %v1029_v55   ;;  %1142 = vperm.xlu0 %2883, %v1028_v56  }
 0x19a   : > { %2668 = vmatmul.mubr.bf16.gmra.mrb[4].mxu0 %v2904_v1 }
 0x19b   : > { %2671 = vmatprep.mubr.bf16.mxu0 %v2905_v2  ;;  %v991_v2 = vld [vmem:[#allocation2 + $0x78] sm:$0xff] }
 0x19c   : > { %1157 = vperm.xlu1 %2884, %v1031_v57   ;;  %1152 = vperm.xlu0 %2883, %v1030_v58  }
 0x1a0   : > { %1167 = vperm.xlu1 %2884, %v1033_v61   ;;  %1162 = vperm.xlu0 %2883, %v1032_v62  }
 0x1a2   : > { %2672 = vmatmul.mubr.bf16.gmra.mrb[8].mxu0 %v2906_v7 }
 0x1a3   : > { %2675 = vmatprep.mubr.bf16.mxu0 %v2907_v8 }
 0x1a4   : > { %1177 = vperm.xlu1 %2884, %v1035_v63   ;;  %1172 = vperm.xlu0 %2883, %v1034_v0  }
 0x1a8   : > { %1187 = vperm.xlu1 %2884, %v1037_v3   ;;  %1182 = vperm.xlu0 %2883, %v1036_v4   ;;  %v990_v3 = vld [vmem:[#allocation2 + $0x70] sm:$0xff] }
 0x1aa   : > { %2676 = vmatmul.mubr.bf16.gmra.mrb[12].mxu0 %v2908_v9  ;;  %v993_v9 = vld [vmem:[#allocation2 + $0x88] sm:$0xff] }
 0x1ab   : > { %2679 = vmatprep.mubr.bf16.mxu0 %v2909_v10  ;;  %v992_v10 = vld [vmem:[#allocation2 + $0x80] sm:$0xff] }
 0x1ac   : > { %1197 = vperm.xlu1 %2884, %v1039_v5   ;;  %1192 = vperm.xlu0 %2883, %v1038_v6  }
 0x1b2   : > { %2680 = vmatmul.mubr.bf16.gmra.mrb[16].mxu0 %v2910_v11 }
 0x1b3   : > { %2683 = vmatprep.mubr.bf16.mxu0 %v2911_v12 }
 0x1ba   : > { %2684 = vmatmul.mubr.bf16.gmra.mrb[20].mxu0 %v2912_v13 }
 0x1bb   : > { %2687 = vmatprep.mubr.bf16.mxu0 %v2913_v14 }
 0x1c2   : > { %2688 = vmatmul.mubr.bf16.gmra.mrb[24].mxu0 %v2914_v15 }
 0x1c3   : > { %2691 = vmatprep.mubr.bf16.mxu0 %v2915_v16  ;;  %v995_v16 = vld [vmem:[#allocation2 + $0x98] sm:$0xff] }
 0x1ca   : > { %2692 = vmatmul.mubr.bf16.gmra.mrb[28].mxu0 %v2916_v17  ;;  %v994_v17 = vld [vmem:[#allocation2 + $0x90] sm:$0xff] }
 0x1ef   : > { %v1053_v18 = vpop.permute.xlu1 %1052  ;;  %v1043_v19 = vpop.permute.xlu0 %1042 }
 0x1f0   : > { %v1202_v26 = vmul.f32 %v1053_v18, %v978_v20  ;;  %v1200_v27 = vmul.f32 %v1043_v19, %v976_v21 }
 0x1f3   : > { %v1058_v24 = vpop.permute.xlu1 %1057  ;;  %v1048_v25 = vpop.permute.xlu0 %1047 }
 0x1f4   : > { %v1203_v28 = vmul.f32 %v1058_v24, %v979_v22  ;;  %v1201_v29 = vmul.f32 %v1048_v25, %v977_v23  ;;  %v997_v23 = vld [vmem:[#allocation2 + $0xa8] sm:$0xff]  ;;  %v996_v24 = vld [vmem:[#allocation2 + $0xa0] sm:$0xff] }
 0x1f6   : > { %v1233_v32 = vpack.c.bf16 %v1203_v28, %v1202_v26  ;;  %v1232_v33 = vpack.c.bf16 %v1201_v29, %v1200_v27 }
 0x1f7   : > { %v1068_v34 = vpop.permute.xlu1 %1067  ;;  %v1063_v35 = vpop.permute.xlu0 %1062 }
 0x1f8   : > { %v1205_v36 = vmul.f32 %v1068_v34, %v981_v30  ;;  %v1204_v37 = vmul.f32 %v1063_v35, %v980_v31  ;;  %2615 = vmatprep.mubr.bf16.mxu1 %v1232_v33  ;;  %v999_v30 = vld [vmem:[#allocation2 + $0xb8] sm:$0xff]  ;;  %v998_v31 = vld [vmem:[#allocation2 + $0xb0] sm:$0xff] }
 0x1f9   : > { %2616 = vmatmul.mubr.bf16.vlgmr.msra.gmra.mrb[0].mxu1 %v1233_v32 }
 0x1fa   : > { %v1234_v40 = vpack.c.bf16 %v1205_v36, %v1204_v37  ;;  %v1001_v37 = vld [vmem:[#allocation2 + $0xc8] sm:$0xff] }
 0x1fb   : > { %v1078_v41 = vpop.permute.xlu1 %1077  ;;  %v1073_v42 = vpop.permute.xlu0 %1072 }
 0x1fc   : > { %v1207_v43 = vmul.f32 %v1078_v41, %v983_v38  ;;  %v1206_v44 = vmul.f32 %v1073_v42, %v982_v39  ;;  %2619 = vmatprep.mubr.bf16.mxu1 %v1234_v40  ;;  %v1000_v38 = vld [vmem:[#allocation2 + $0xc0] sm:$0xff] }
 0x1fe   : > { %v1235_v47 = vpack.c.bf16 %v1207_v43, %v1206_v44  ;;  %v1003_v44 = vld [vmem:[#allocation2 + $0xd8] sm:$0xff] }
 0x1ff   : > { %v1088_v48 = vpop.permute.xlu1 %1087  ;;  %v1083_v49 = vpop.permute.xlu0 %1082 }
 0x200   : > { %v1209_v50 = vmul.f32 %v1088_v48, %v985_v45  ;;  %v1208_v51 = vmul.f32 %v1083_v49, %v984_v46  ;;  %v1002_v45 = vld [vmem:[#allocation2 + $0xd0] sm:$0xff] }
 0x201   : > { %2620 = vmatmul.mubr.bf16.gmra.mrb[4].mxu1 %v1235_v47 }
 0x202   : > { %v1236_v54 = vpack.c.bf16 %v1209_v50, %v1208_v51  ;;  %v1005_v51 = vld [vmem:[#allocation2 + $0xe8] sm:$0xff] }
 0x203   : > { %v1098_v55 = vpop.permute.xlu1 %1097  ;;  %v1093_v56 = vpop.permute.xlu0 %1092 }
 0x204   : > { %v1211_v57 = vmul.f32 %v1098_v55, %v987_v52  ;;  %v1210_v58 = vmul.f32 %v1093_v56, %v986_v53  ;;  %2623 = vmatprep.mubr.bf16.mxu1 %v1236_v54  ;;  %v1004_v52 = vld [vmem:[#allocation2 + $0xe0] sm:$0xff] }
 0x206   : > { %v1237_v61 = vpack.c.bf16 %v1211_v57, %v1210_v58  ;;  %v1007_v58 = vld [vmem:[#allocation2 + $0xf8] sm:$0xff] }
 0x207   : > { %v1108_v62 = vpop.permute.xlu1 %1107  ;;  %v1103_v63 = vpop.permute.xlu0 %1102 }
 0x208   : > { %v1213_v0 = vmul.f32 %v1108_v62, %v989_v59  ;;  %v1212_v1 = vmul.f32 %v1103_v63, %v988_v60  ;;  %v1006_v59 = vld [vmem:[#allocation2 + $0xf0] sm:$0xff] }
 0x209   : > { %2624 = vmatmul.mubr.bf16.gmra.mrb[8].mxu1 %v1237_v61 }
 0x20a   : > { %v1238_v4 = vpack.c.bf16 %v1213_v0, %v1212_v1 }
 0x20b   : > { %v1118_v5 = vpop.permute.xlu1 %1117  ;;  %v1113_v6 = vpop.permute.xlu0 %1112 }
 0x20c   : > { %v1215_v7 = vmul.f32 %v1118_v5, %v991_v2  ;;  %v1214_v8 = vmul.f32 %v1113_v6, %v990_v3  ;;  %2627 = vmatprep.mubr.bf16.mxu1 %v1238_v4 }
 0x20e   : > { %v1239_v11 = vpack.c.bf16 %v1215_v7, %v1214_v8 }
 0x20f   : > { %v1128_v12 = vpop.permute.xlu1 %1127  ;;  %v1123_v13 = vpop.permute.xlu0 %1122 }
 0x210   : > { %v1217_v14 = vmul.f32 %v1128_v12, %v993_v9  ;;  %v1216_v15 = vmul.f32 %v1123_v13, %v992_v10 }
 0x211   : > { %2628 = vmatmul.mubr.bf16.gmra.mrb[12].mxu1 %v1239_v11 }
 0x212   : > { %v1240_v18 = vpack.c.bf16 %v1217_v14, %v1216_v15 }
 0x213   : > { %v1138_v19 = vpop.permute.xlu1 %1137  ;;  %v1133_v20 = vpop.permute.xlu0 %1132 }
 0x214   : > { %v1219_v21 = vmul.f32 %v1138_v19, %v995_v16  ;;  %v1218_v22 = vmul.f32 %v1133_v20, %v994_v17  ;;  %2631 = vmatprep.mubr.bf16.mxu1 %v1240_v18 }
 0x216   : > { %v1241_v25 = vpack.c.bf16 %v1219_v21, %v1218_v22 }
 0x217   : > { %v1148_v26 = vpop.permute.xlu1 %1147  ;;  %v1143_v27 = vpop.permute.xlu0 %1142 }
 0x218   : > { %v1221_v28 = vmul.f32 %v1148_v26, %v997_v23  ;;  %v1220_v29 = vmul.f32 %v1143_v27, %v996_v24 }
 0x219   : > { %2632 = vmatmul.mubr.bf16.gmra.mrb[16].mxu1 %v1241_v25 }
 0x21a   : > { %v1242_v32 = vpack.c.bf16 %v1221_v28, %v1220_v29 }
 0x21b   : > { %v1158_v33 = vpop.permute.xlu1 %1157  ;;  %v1153_v34 = vpop.permute.xlu0 %1152 }
 0x21c   : > { %v1223_v35 = vmul.f32 %v1158_v33, %v999_v30  ;;  %v1222_v36 = vmul.f32 %v1153_v34, %v998_v31  ;;  %2635 = vmatprep.mubr.bf16.mxu1 %v1242_v32 }
 0x21e   : > { %v1243_v39 = vpack.c.bf16 %v1223_v35, %v1222_v36  ;;  %v3397_v35 = vld [vmem:[%s3511_s4] ss:$0 sm:$0xff] }
 0x21f   : > { %v1168_v40 = vpop.permute.xlu1 %1167  ;;  %v1163_v41 = vpop.permute.xlu0 %1162 }
 0x220   : > { %v1225_v42 = vmul.f32 %v1168_v40, %v1001_v37  ;;  %v1224_v43 = vmul.f32 %v1163_v41, %v1000_v38 }
 0x221   : > { %2636 = vmatmul.mubr.bf16.gmra.mrb[20].mxu1 %v1243_v39 }
 0x222   : > { %v1244_v46 = vpack.c.bf16 %v1225_v42, %v1224_v43 }
 0x223   : > { %v1178_v47 = vpop.permute.xlu1 %1177  ;;  %v1173_v48 = vpop.permute.xlu0 %1172 }
 0x224   : > { %v1227_v49 = vmul.f32 %v1178_v47, %v1003_v44  ;;  %v1226_v50 = vmul.f32 %v1173_v48, %v1002_v45  ;;  %2639 = vmatprep.mubr.bf16.mxu1 %v1244_v46 }
 0x226   : > { %v1245_v53 = vpack.c.bf16 %v1227_v49, %v1226_v50 }
 0x227   : > { %v1188_v54 = vpop.permute.xlu1 %1187  ;;  %v1183_v55 = vpop.permute.xlu0 %1182 }
 0x228   : > { %v1229_v56 = vmul.f32 %v1188_v54, %v1005_v51  ;;  %v1228_v57 = vmul.f32 %v1183_v55, %v1004_v52 }
 0x229   : > { %2640 = vmatmul.mubr.bf16.gmra.mrb[24].mxu1 %v1245_v53 }
 0x22a   : > { %v1246_v60 = vpack.c.bf16 %v1229_v56, %v1228_v57 }
 0x22b   : > { %v1198_v61 = vpop.permute.xlu1 %1197  ;;  %v1193_v62 = vpop.permute.xlu0 %1192 }
 0x22c   : > { %v1231_v63 = vmul.f32 %v1198_v61, %v1007_v58  ;;  %v1230_v0 = vmul.f32 %v1193_v62, %v1006_v59  ;;  %2643 = vmatprep.mubr.bf16.mxu1 %v1246_v60 }
 0x22e   : > { %v1247_v1 = vpack.c.bf16 %v1231_v63, %v1230_v0 }
 0x231   : > { %2644 = vmatmul.mubr.bf16.gmra.mrb[28].mxu1 %v1247_v1 }
 0x265   : > { %v2665_v2 = vpop.f32.mrb[0].mxu0 }
 0x266   : > { %v1699_v3 = vpop.f32.mrb[1].mxu0 }
 0x267   : > { %v2666_v4 = vpop.f32.mrb[2].mxu0 }
 0x268   : > { %v1702_v5 = vpop.f32.mrb[3].mxu0 }
 0x26d   : > { %v2669_v6 = vpop.f32.mrb[4].mxu0 }
 0x26e   : > { %v1715_v7 = vpop.f32.mrb[5].mxu0 }
 0x26f   : > { %v2670_v8 = vpop.f32.mrb[6].mxu0 }
 0x270   : > { %v1718_v9 = vpop.f32.mrb[7].mxu0 }
 0x275   : > { %v3346_v10 = vpop.f32.mrb[8].mxu0 }
 0x276   : > { %v3348_v11 = vpop.f32.mrb[9].mxu0 }
 0x277   : > { %v3350_v12 = vpop.f32.mrb[10].mxu0 }
 0x278   : > { %v3352_v13 = vpop.f32.mrb[11].mxu0 }
 0x27d   : > { %v3354_v14 = vpop.f32.mrb[12].mxu0 }
 0x27e   : > { %v3356_v15 = vpop.f32.mrb[13].mxu0 }
 0x27f   : > { %v3358_v16 = vpop.f32.mrb[14].mxu0 }
 0x280   : > { %v3360_v17 = vpop.f32.mrb[15].mxu0 }
 0x285   : > { %v3362_v18 = vpop.f32.mrb[16].mxu0 }
 0x286   : > { %v3364_v19 = vpop.f32.mrb[17].mxu0 }
 0x287   : > { %v3366_v20 = vpop.f32.mrb[18].mxu0 }
 0x288   : > { %v3368_v21 = vpop.f32.mrb[19].mxu0 }
 0x28d   : > { %v3370_v22 = vpop.f32.mrb[20].mxu0 }
 0x28e   : > { %v3372_v23 = vpop.f32.mrb[21].mxu0 }
 0x28f   : > { %v3374_v24 = vpop.f32.mrb[22].mxu0 }
 0x290   : > { %v3376_v25 = vpop.f32.mrb[23].mxu0 }
 0x295   : > { %v3378_v26 = vpop.f32.mrb[24].mxu0 }
 0x296   : > { %v3380_v27 = vpop.f32.mrb[25].mxu0 }
 0x297   : > { %v3382_v28 = vpop.f32.mrb[26].mxu0 }
 0x298   : > { %v3384_v29 = vpop.f32.mrb[27].mxu0 }
 0x29d   : > { %v3386_v30 = vpop.f32.mrb[28].mxu0 }
 0x29e   : > { %v3388_v31 = vpop.f32.mrb[29].mxu0 }
 0x29f   : > { %v3390_v32 = vpop.f32.mrb[30].mxu0 }
 0x2a0   : > { %v3392_v33 = vpop.f32.mrb[31].mxu0 }
 0x2cc   : > { %v2617_v34 = vpop.f32.mrb[0].mxu1 }
 0x2cd   : > { %v1708_v36 = vadd.f32 %v2665_v2, %v2617_v34  ;;  %v1394_v37 = vpop.f32.mrb[1].mxu1 }
 0x2ce   : > { %v1700_v38 = vadd.f32 %v1699_v3, %v1394_v37  ;;  %v2618_v39 = vpop.f32.mrb[2].mxu1 }
 0x2cf   : > { %v1835_v40 = vadd.f32 %v3397_v35, %v1708_v36  ;;  %v1711_v41 = vadd.f32 %v2666_v4, %v2618_v39  ;;  %v1397_v42 = vpop.f32.mrb[3].mxu1 }
 0x2d0   : > { %v1833_v43 = vadd.f32 %v3397_v35, %v1700_v38  ;;  %v1703_v44 = vadd.f32 %v1702_v5, %v1397_v42 }
 0x2d1   : > { %v1836_v45 = vadd.f32 %v3397_v35, %v1711_v41  ;;  %v1867_v47 = vmax.f32 %v1835_v40, 0.0 }
 0x2d2   : > { %v1834_v46 = vadd.f32 %v3397_v35, %v1703_v44  ;;  %v1865_v49 = vmax.f32 %v1833_v43, 0.0 }
 0x2d3   : > { %v1868_v48 = vmax.f32 %v1836_v45, 0.0 }
 0x2d4   : > { %v1866_v50 = vmax.f32 %v1834_v46, 0.0  ;;  %v2621_v51 = vpop.f32.mrb[4].mxu1 }
 0x2d5   : > { %v2352_v52 = vpack.c.bf16 %v1868_v48, %v1867_v47  ;;  %v1724_v53 = vadd.f32 %v2669_v6, %v2621_v51  ;;  %v1410_v54 = vpop.f32.mrb[5].mxu1 }
 0x2d6   : > { %v2347_v55 = vpack.c.bf16 %v1866_v50, %v1865_v49  ;;  %v1716_v56 = vadd.f32 %v1715_v7, %v1410_v54  ;;  %v2622_v57 = vpop.f32.mrb[6].mxu1 }
 0x2d7   : > { %2424 = vst [vmem:[%s3198_s10 + $0x8] sm:$0xff] %v2352_v52   ;;  %v1839_v58 = vadd.f32 %v3397_v35, %v1724_v53  ;;  %v1727_v59 = vadd.f32 %v2670_v8, %v2622_v57  ;;  %v1413_v60 = vpop.f32.mrb[7].mxu1 }
 0x2d8   : > { %2348 = vst [vmem:[%s3198_s10] sm:$0xff] %v2347_v55   ;;  %v1837_v61 = vadd.f32 %v3397_v35, %v1716_v56  ;;  %v1719_v62 = vadd.f32 %v1718_v9, %v1413_v60 }
 0x2d9   : > { %v1840_v63 = vadd.f32 %v3397_v35, %v1727_v59  ;;  %v1871_v1 = vmax.f32 %v1839_v58, 0.0 }
 0x2da   : > { %v1838_v0 = vadd.f32 %v3397_v35, %v1719_v62  ;;  %v1869_v3 = vmax.f32 %v1837_v61, 0.0 }
 0x2db   : > { %v1872_v2 = vmax.f32 %v1840_v63, 0.0 }
 0x2dc   : > { %v1870_v4 = vmax.f32 %v1838_v0, 0.0  ;;  %v2625_v5 = vpop.f32.mrb[8].mxu1 }
 0x2dd   : > { %v2362_v6 = vpack.c.bf16 %v1872_v2, %v1871_v1  ;;  %v1740_v7 = vadd.f32 %v3346_v10, %v2625_v5  ;;  %v1426_v8 = vpop.f32.mrb[9].mxu1 }
 0x2de   : > { %v2357_v34 = vpack.c.bf16 %v1870_v4, %v1869_v3  ;;  %v1732_v36 = vadd.f32 %v3348_v11, %v1426_v8  ;;  %v2626_v37 = vpop.f32.mrb[10].mxu1 }
 0x2df   : > { %2426 = vst [vmem:[%s3198_s10 + $0x18] sm:$0xff] %v2362_v6   ;;  %v1843_v9 = vadd.f32 %v3397_v35, %v1740_v7  ;;  %v1743_v38 = vadd.f32 %v3350_v12, %v2626_v37  ;;  %v1429_v39 = vpop.f32.mrb[11].mxu1 }
 0x2e0   : > { %2425 = vst [vmem:[%s3198_s10 + $0x10] sm:$0xff] %v2357_v34   ;;  %v1841_v40 = vadd.f32 %v3397_v35, %v1732_v36  ;;  %v1735_v41 = vadd.f32 %v3352_v13, %v1429_v39 }
 0x2e1   : > { %v1844_v42 = vadd.f32 %v3397_v35, %v1743_v38  ;;  %v1875_v43 = vmax.f32 %v1843_v9, 0.0 }
 0x2e2   : > { %v1842_v10 = vadd.f32 %v3397_v35, %v1735_v41  ;;  %v1873_v44 = vmax.f32 %v1841_v40, 0.0 }
 0x2e3   : > { %v1876_v11 = vmax.f32 %v1844_v42, 0.0 }
 0x2e4   : > { %v1874_v45 = vmax.f32 %v1842_v10, 0.0  ;;  %v2629_v46 = vpop.f32.mrb[12].mxu1 }
 0x2e5   : > { %v2372_v47 = vpack.c.bf16 %v1876_v11, %v1875_v43  ;;  %v1756_v12 = vadd.f32 %v3354_v14, %v2629_v46  ;;  %v1442_v48 = vpop.f32.mrb[13].mxu1 }
 0x2e6   : > { %v2367_v49 = vpack.c.bf16 %v1874_v45, %v1873_v44  ;;  %v1748_v50 = vadd.f32 %v3356_v15, %v1442_v48  ;;  %v2630_v51 = vpop.f32.mrb[14].mxu1 }
 0x2e7   : > { %2428 = vst [vmem:[%s3198_s10 + $0x28] sm:$0xff] %v2372_v47   ;;  %v1847_v13 = vadd.f32 %v3397_v35, %v1756_v12  ;;  %v1759_v52 = vadd.f32 %v3358_v16, %v2630_v51  ;;  %v1445_v53 = vpop.f32.mrb[15].mxu1 }
 0x2e8   : > { %2427 = vst [vmem:[%s3198_s10 + $0x20] sm:$0xff] %v2367_v49   ;;  %v1845_v54 = vadd.f32 %v3397_v35, %v1748_v50  ;;  %v1751_v55 = vadd.f32 %v3360_v17, %v1445_v53 }
 0x2e9   : > { %v1848_v56 = vadd.f32 %v3397_v35, %v1759_v52  ;;  %v1879_v57 = vmax.f32 %v1847_v13, 0.0 }
 0x2ea   : > { %v1846_v14 = vadd.f32 %v3397_v35, %v1751_v55  ;;  %v1877_v58 = vmax.f32 %v1845_v54, 0.0 }
 0x2eb   : > { %v1880_v15 = vmax.f32 %v1848_v56, 0.0 }
 0x2ec   : > { %v1878_v59 = vmax.f32 %v1846_v14, 0.0  ;;  %v2633_v60 = vpop.f32.mrb[16].mxu1 }
 0x2ed   : > { %v2382_v61 = vpack.c.bf16 %v1880_v15, %v1879_v57  ;;  %v1772_v16 = vadd.f32 %v3362_v18, %v2633_v60  ;;  %v1458_v62 = vpop.f32.mrb[17].mxu1 }
 0x2ee   : > { %v2377_v63 = vpack.c.bf16 %v1878_v59, %v1877_v58  ;;  %v1764_v0 = vadd.f32 %v3364_v19, %v1458_v62  ;;  %v2634_v1 = vpop.f32.mrb[18].mxu1 }
 0x2ef   : > { %2430 = vst [vmem:[%s3198_s10 + $0x38] sm:$0xff] %v2382_v61   ;;  %v1851_v17 = vadd.f32 %v3397_v35, %v1772_v16  ;;  %v1775_v2 = vadd.f32 %v3366_v20, %v2634_v1  ;;  %v1461_v3 = vpop.f32.mrb[19].mxu1 }
 0x2f0   : > { %2429 = vst [vmem:[%s3198_s10 + $0x30] sm:$0xff] %v2377_v63   ;;  %v1849_v4 = vadd.f32 %v3397_v35, %v1764_v0  ;;  %v1767_v5 = vadd.f32 %v3368_v21, %v1461_v3 }
 0x2f1   : > { %v1852_v6 = vadd.f32 %v3397_v35, %v1775_v2  ;;  %v1883_v7 = vmax.f32 %v1851_v17, 0.0 }
 0x2f2   : > { %v1850_v18 = vadd.f32 %v3397_v35, %v1767_v5  ;;  %v1881_v8 = vmax.f32 %v1849_v4, 0.0 }
 0x2f3   : > { %v1884_v19 = vmax.f32 %v1852_v6, 0.0 }
 0x2f4   : > { %v1882_v34 = vmax.f32 %v1850_v18, 0.0  ;;  %v2637_v36 = vpop.f32.mrb[20].mxu1 }
 0x2f5   : > { %v2392_v37 = vpack.c.bf16 %v1884_v19, %v1883_v7  ;;  %v1788_v20 = vadd.f32 %v3370_v22, %v2637_v36  ;;  %v1474_v9 = vpop.f32.mrb[21].mxu1 }
 0x2f6   : > { %v2387_v38 = vpack.c.bf16 %v1882_v34, %v1881_v8  ;;  %v1780_v39 = vadd.f32 %v3372_v23, %v1474_v9  ;;  %v2638_v40 = vpop.f32.mrb[22].mxu1 }
 0x2f7   : > { %2432 = vst [vmem:[%s3198_s10 + $0x48] sm:$0xff] %v2392_v37   ;;  %v1855_v21 = vadd.f32 %v3397_v35, %v1788_v20  ;;  %v1791_v41 = vadd.f32 %v3374_v24, %v2638_v40  ;;  %v1477_v42 = vpop.f32.mrb[23].mxu1 }
 0x2f8   : > { %2431 = vst [vmem:[%s3198_s10 + $0x40] sm:$0xff] %v2387_v38   ;;  %v1853_v10 = vadd.f32 %v3397_v35, %v1780_v39  ;;  %v1783_v43 = vadd.f32 %v3376_v25, %v1477_v42 }
 0x2f9   : > { %v1856_v11 = vadd.f32 %v3397_v35, %v1791_v41  ;;  %v1887_v44 = vmax.f32 %v1855_v21, 0.0 }
 0x2fa   : > { %v1854_v22 = vadd.f32 %v3397_v35, %v1783_v43  ;;  %v1885_v45 = vmax.f32 %v1853_v10, 0.0 }
 0x2fb   : > { %v1888_v23 = vmax.f32 %v1856_v11, 0.0 }
 0x2fc   : > { %v1886_v46 = vmax.f32 %v1854_v22, 0.0  ;;  %v2641_v47 = vpop.f32.mrb[24].mxu1 }
 0x2fd   : > { %v2402_v12 = vpack.c.bf16 %v1888_v23, %v1887_v44  ;;  %v1804_v24 = vadd.f32 %v3378_v26, %v2641_v47  ;;  %v1490_v48 = vpop.f32.mrb[25].mxu1 }
 0x2fe   : > { %v2397_v49 = vpack.c.bf16 %v1886_v46, %v1885_v45  ;;  %v1796_v50 = vadd.f32 %v3380_v27, %v1490_v48  ;;  %v2642_v51 = vpop.f32.mrb[26].mxu1 }
 0x2ff   : > { %2434 = vst [vmem:[%s3198_s10 + $0x58] sm:$0xff] %v2402_v12   ;;  %v1859_v25 = vadd.f32 %v3397_v35, %v1804_v24  ;;  %v1807_v13 = vadd.f32 %v3382_v28, %v2642_v51  ;;  %v1493_v52 = vpop.f32.mrb[27].mxu1 }
 0x300   : > { %2433 = vst [vmem:[%s3198_s10 + $0x50] sm:$0xff] %v2397_v49   ;;  %v1857_v53 = vadd.f32 %v3397_v35, %v1796_v50  ;;  %v1799_v54 = vadd.f32 %v3384_v29, %v1493_v52 }
 0x301   : > { %v1860_v55 = vadd.f32 %v3397_v35, %v1807_v13  ;;  %v1891_v56 = vmax.f32 %v1859_v25, 0.0 }
 0x302   : > { %v1858_v26 = vadd.f32 %v3397_v35, %v1799_v54  ;;  %v1889_v14 = vmax.f32 %v1857_v53, 0.0 }
 0x303   : > { %v1892_v27 = vmax.f32 %v1860_v55, 0.0 }
 0x304   : > { %v1890_v57 = vmax.f32 %v1858_v26, 0.0  ;;  %v2645_v15 = vpop.f32.mrb[28].mxu1 }
 0x305   : > { %v2412_v58 = vpack.c.bf16 %v1892_v27, %v1891_v56  ;;  %v1820_v28 = vadd.f32 %v3386_v30, %v2645_v15  ;;  %v1506_v59 = vpop.f32.mrb[29].mxu1 }
 0x306   : > { %v2407_v60 = vpack.c.bf16 %v1890_v57, %v1889_v14  ;;  %v1812_v61 = vadd.f32 %v3388_v31, %v1506_v59  ;;  %v2646_v16 = vpop.f32.mrb[30].mxu1 }
 0x307   : > { %2436 = vst [vmem:[%s3198_s10 + $0x68] sm:$0xff] %v2412_v58   ;;  %v1863_v29 = vadd.f32 %v3397_v35, %v1820_v28  ;;  %v1823_v62 = vadd.f32 %v3390_v32, %v2646_v16  ;;  %v1509_v63 = vpop.f32.mrb[31].mxu1 }
 0x308   : > { %2435 = vst [vmem:[%s3198_s10 + $0x60] sm:$0xff] %v2407_v60   ;;  %v1861_v0 = vadd.f32 %v3397_v35, %v1812_v61  ;;  %v1815_v1 = vadd.f32 %v3392_v33, %v1509_v63 }
 0x309   : > { %v1864_v30 = vadd.f32 %v3397_v35, %v1823_v62  ;;  %v1895_v2 = vmax.f32 %v1863_v29, 0.0 }
 0x30a   : > { %v1862_v17 = vadd.f32 %v3397_v35, %v1815_v1  ;;  %v1893_v3 = vmax.f32 %v1861_v0, 0.0 }
 0x30b   : > { %v1896_v31 = vmax.f32 %v1864_v30, 0.0 }
 0x30c   : > { %v1894_v4 = vmax.f32 %v1862_v17, 0.0 }
 0x30d   : > { %v2422_v5 = vpack.c.bf16 %v1896_v31, %v1895_v2 }
 0x30e   : > { %v2417_v6 = vpack.c.bf16 %v1894_v4, %v1893_v3 }
 0x30f   : > { %2438 = vst [vmem:[%s3198_s10 + $0x78] sm:$0xff] %v2422_v5  }
 0x310   : > { %2437 = vst [vmem:[%s3198_s10 + $0x70] sm:$0xff] %v2417_v6  }
 0x311 PF: > { %s19_s28 = sadd.s32 1, %s3013_s28   ;;  %s3512_s9 = sld [smem:[#allocation6_spill]] }
 0x312   : > { %p16_p8 = scmp.ge.s32.totalorder %s19_s28, 6   ;;  %s3513_s21 = smov %s2989_s22 }
 0x313   : > { %s3514_s22 = smov %s2993_s23  ;;  %s3515_s23 = smov %s3123_s17 }
 0x314   : > { %s3516_s24 = smov %s3005_s26  ;;  %s3517_s25 = smov %s3009_s27 }
 0x315   : > { %s3519_s27 = smov %s3525_s7  ;;  %18 = sbr.rel (!%p16_p8) target bundleno = 8 (0x8), region = 101 }
 0x317   : > { %s3518_s26 = smov %s3512_s9 }
 0x31c   :  { %2079 = vsyncpa [#allocation4], 1 }
 0x31d   :  { %2081 = vsyncpa [#allocation4 + $0x1], 1 }

</bundles_post_ra>
